<compile_context>
chip_gen: v7x
topology: tpu7x:2x2x1
jax: 0.10.0
libtpu: 0.0.40
codegen_flags: <defaults>
</compile_context>

<pallas_src>
import jax
import jax.numpy as jnp
from jax.experimental import pallas as pl
from jax.experimental.pallas import tpu as pltpu

EPS = 1e-5


def _fused_kernel(x_ref, gate_ref, w_ref, gamma_ref, beta_ref, o_ref):
    # Per grid step j (block over Cout):
    #   x_ref    : (N, Cin, HW)  f32   (constant block index -> DMA'd once)
    #   gate_ref : (N, Cin, 1)   f32
    #   w_ref    : (CB, Cin)     bf16  (this step's slice of the conv weight)
    #   gamma_ref: (CB, 1)       f32
    #   beta_ref : (CB, 1)       f32
    #   o_ref    : (N, CB, HW)   f32
    n_batch = x_ref.shape[0]
    hw = x_ref.shape[2]
    cb = w_ref.shape[0]
    inv_n = 1.0 / float(n_batch * hw)

    w = w_ref[...]                                     # (CB, Cin) bf16, un-gated

    s = jnp.zeros((cb, 1), jnp.float32)
    ss = jnp.zeros((cb, 1), jnp.float32)
    for b in range(n_batch):                           # static unroll; N == 1 here
        # Gate the activation (broadcast (Cin,1) over HW lanes), cast to bf16
        # for the MXU. sum_c W[o,c] * (g[b,c] * x[b,c,k]) == gated conv.
        x_g = (x_ref[b] * gate_ref[b]).astype(jnp.bfloat16)               # (Cin, HW)
        y = jax.lax.dot_general(
            w, x_g, (((1,), (0,)), ((), ())),
            preferred_element_type=jnp.float32)                           # (CB, HW) f32
        # Store unnormalized now; rescale in-place after stats are known.
        # (Avoids keeping N full (CB, HW) f32 tiles live simultaneously.)
        o_ref[b] = y
        s = s + jnp.sum(y, axis=1, keepdims=True)      # (CB, 1)
        ss = ss + jnp.sum(y * y, axis=1, keepdims=True)

    # BatchNorm2d (training mode): biased batch stats per channel, folded into
    # a single per-channel scale/shift. Clamp var >= 0 so padded tail rows of
    # the last Cout block never feed a negative value to rsqrt.
    mean = s * inv_n
    var = jnp.maximum(ss * inv_n - mean * mean, 0.0)
    scale = gamma_ref[...] * jax.lax.rsqrt(var + EPS)  # (CB, 1)
    shift = beta_ref[...] - mean * scale               # (CB, 1)
    for b in range(n_batch):
        o_ref[b] = o_ref[b] * scale + shift


def fused_mul_conv1x1_bn(x_nchw, gate_nc11, weight_oc_ic, gamma, beta,
                         *, block_cout=176):
    """x: (N, Cin, H, W); gate: (N, Cin, 1, 1); weight: (Cout, Cin);
    gamma/beta: (Cout,). Returns (N, Cout, H, W) float32."""
    N, Cin, H, W = x_nchw.shape
    Cout = weight_oc_ic.shape[0]
    HW = H * W

    # Free (no-copy) reshapes only -- no XLA transposes on either side.
    x3 = x_nchw.reshape(N, Cin, HW).astype(jnp.float32)
    gate3 = gate_nc11.reshape(N, Cin, 1).astype(jnp.float32)
    w_bf16 = weight_oc_ic.astype(jnp.bfloat16)          # halve weight HBM stream
    gamma2 = gamma.reshape(Cout, 1).astype(jnp.float32)
    beta2 = beta.reshape(Cout, 1).astype(jnp.float32)

    block_cout = min(block_cout, Cout)                  # 176 = 16*11 (bf16 tiling ok)
    n_blocks = pl.cdiv(Cout, block_cout)                # 2 blocks for Cout = 344
    # NOTE(v6e): grid=(1,) (single 344 block) is worth benchmarking there; keep
    # 2 blocks for v5e (DMA/compute overlap) and v7x (one block per TensorCore).

    cost = pl.CostEstimate(
        flops=2 * N * HW * Cin * Cout,
        transcendentals=Cout,
        bytes_accessed=(x3.size * 4 + gate3.size * 4 + w_bf16.size * 2
                        + gamma2.size * 4 + beta2.size * 4 + N * Cout * HW * 4),
    )

    out3 = pl.pallas_call(
        _fused_kernel,
        out_shape=jax.ShapeDtypeStruct((N, Cout, HW), jnp.float32),
        grid=(n_blocks,),
        in_specs=[
            pl.BlockSpec((N, Cin, HW), lambda j: (0, 0, 0)),
            pl.BlockSpec((N, Cin, 1), lambda j: (0, 0, 0)),
            pl.BlockSpec((block_cout, Cin), lambda j: (j, 0)),
            pl.BlockSpec((block_cout, 1), lambda j: (j, 0)),
            pl.BlockSpec((block_cout, 1), lambda j: (j, 0)),
        ],
        out_specs=pl.BlockSpec((N, block_cout, HW), lambda j: (0, j, 0)),
        compiler_params=pltpu.CompilerParams(
            dimension_semantics=("parallel",)),
        cost_estimate=cost,
    )(x3, gate3, w_bf16, gamma2, beta2)

    return out3.reshape(N, Cout, H, W)                   # free reshape back to NCHW


def _reference_f32(x_nchw, gate_nc11, w, gamma, beta):
    """Pure f32 module semantics (explicit highest matmul precision)."""
    x = x_nchw * gate_nc11
    y = jnp.einsum('nchw,oc->nohw', x, w, precision=jax.lax.Precision.HIGHEST)
    mean = jnp.mean(y, axis=(0, 2, 3), keepdims=True)
    var = jnp.mean((y - mean) ** 2, axis=(0, 2, 3), keepdims=True)
    y_hat = (y - mean) / jnp.sqrt(var + EPS)
    return y_hat * gamma.reshape(1, -1, 1, 1) + beta.reshape(1, -1, 1, 1)


def _reference_bf16(x_nchw, gate_nc11, w, gamma, beta):
    """Reference at the kernel's operand precision: gate x in f32, round the
    gated activation and the weight to bf16, f32 MXU accumulation."""
    N, Cin, H, W = x_nchw.shape
    Cout = w.shape[0]
    HW = H * W
    xg = (x_nchw.reshape(N, Cin, HW)
          * gate_nc11.reshape(N, Cin, 1)).astype(jnp.bfloat16)        # (N, Cin, HW)
    wb = w.astype(jnp.bfloat16)                                       # (Cout, Cin)
    y = jnp.einsum('oc,nck->nok', wb, xg,
                   preferred_element_type=jnp.float32)                # (N, Cout, HW)
    mean = jnp.mean(y, axis=(0, 2), keepdims=True)
    var = jnp.mean((y - mean) ** 2, axis=(0, 2), keepdims=True)
    y_hat = (y - mean) * jax.lax.rsqrt(var + EPS)
    out = y_hat * gamma.reshape(1, Cout, 1) + beta.reshape(1, Cout, 1)
    return out.reshape(N, Cout, H, W)


if __name__ == "__main__":
    # Shapes implied by the PyTorch module.
    N, Cin, H, W = 1, 2064, 7, 7
    Cout = 344

    key = jax.random.PRNGKey(0)
    k_x, k_g, k_w, k_gamma, k_beta = jax.random.split(key, 5)

    x492 = jax.random.normal(k_x, (N, Cin, H, W), dtype=jnp.float32)
    x497 = jax.random.normal(k_g, (N, Cin, 1, 1), dtype=jnp.float32)

    # Conv2d(2064, 344, 1x1, bias=False) weight, Kaiming-ish scale.
    w = jax.random.normal(k_w, (Cout, Cin), dtype=jnp.float32) / jnp.sqrt(Cin)
    # BatchNorm2d(344) affine params.
    gamma = 1.0 + 0.1 * jax.random.normal(k_gamma, (Cout,), dtype=jnp.float32)
    beta = 0.1 * jax.random.normal(k_beta, (Cout,), dtype=jnp.float32)

    fused = jax.jit(fused_mul_conv1x1_bn)
    out = jax.block_until_ready(fused(x492, x497, w, gamma, beta))
    assert out.shape == (N, Cout, H, W)

    # Kernel-structure check: reference at the same operand precision (bf16
    # gated-x and weight operands, f32 accumulate) must agree tightly.
    ref_bf16 = jax.block_until_ready(_reference_bf16(x492, x497, w, gamma, beta))
    assert jnp.allclose(out, ref_bf16, atol=2e-3, rtol=2e-3), \
        float(jnp.max(jnp.abs(out - ref_bf16)))

    # Full-f32 module semantics check: tolerance reflects bf16 operand rounding
    # over the 2064-deep contraction (BN renormalizes, so errors stay ~1e-2).
    ref_f32 = jax.block_until_ready(_reference_f32(x492, x497, w, gamma, beta))
    assert jnp.allclose(out, ref_f32, atol=5e-2, rtol=5e-2), \
        float(jnp.max(jnp.abs(out - ref_f32)))

    print("KERNEL_OK")
</pallas_src>

<mosaic_0001>
module attributes {stable_mosaic.version = 11 : i64} {
  func.func @_fused_kernel(%arg0: i32, %arg1: memref<1x2064x49xf32, #tpu.memory_space<vmem>>, %arg2: memref<1x2064x1xf32, #tpu.memory_space<vmem>>, %arg3: memref<176x2064xbf16, #tpu.memory_space<vmem>>, %arg4: memref<176x1xf32, #tpu.memory_space<vmem>>, %arg5: memref<176x1xf32, #tpu.memory_space<vmem>>, %arg6: memref<1x176x49xf32, #tpu.memory_space<vmem>>) attributes {dimension_semantics = [#tpu.dimension_semantics<parallel>], iteration_bounds = array<i64: 2>, scalar_prefetch = 0 : i64, scratch_operands = 0 : i64, tpu.core_type = #tpu.core_type<tc>, window_params = [{pipeline_mode = #tpu.pipeline_mode<synchronous>, transform_indices = @transform_0, window_bounds = array<i64: 1, 2064, 49>}, {pipeline_mode = #tpu.pipeline_mode<synchronous>, transform_indices = @transform_1, window_bounds = array<i64: 1, 2064, 1>}, {transform_indices = @transform_2, window_bounds = array<i64: 176, 2064>}, {transform_indices = @transform_3, window_bounds = array<i64: 176, 1>}, {transform_indices = @transform_4, window_bounds = array<i64: 176, 1>}, {transform_indices = @transform_5, window_bounds = array<i64: 1, 176, 49>}]} {
    %c0 = arith.constant 0 : index
    %c0_0 = arith.constant 0 : index
    %0 = vector.load %arg3[%c0, %c0_0] : memref<176x2064xbf16, #tpu.memory_space<vmem>>, vector<176x2064xbf16>
    %cst = arith.constant 0.000000e+00 : f32
    %1 = vector.broadcast %cst : f32 to vector<176x1xf32>
    %cst_1 = arith.constant 0.000000e+00 : f32
    %2 = vector.broadcast %cst_1 : f32 to vector<176x1xf32>
    %c0_2 = arith.constant 0 : index
    %c0_3 = arith.constant 0 : index
    %c0_4 = arith.constant 0 : index
    %3 = vector.load %arg1[%c0_2, %c0_3, %c0_4] : memref<1x2064x49xf32, #tpu.memory_space<vmem>>, vector<1x2064x49xf32>
    %4 = vector.shape_cast %3 : vector<1x2064x49xf32> to vector<2064x49xf32>
    %c0_5 = arith.constant 0 : index
    %c0_6 = arith.constant 0 : index
    %c0_7 = arith.constant 0 : index
    %5 = vector.load %arg2[%c0_5, %c0_6, %c0_7] : memref<1x2064x1xf32, #tpu.memory_space<vmem>>, vector<1x2064x1xf32>
    %6 = vector.shape_cast %5 : vector<1x2064x1xf32> to vector<2064x1xf32>
    %7 = vector.broadcast %6 : vector<2064x1xf32> to vector<2064x49xf32>
    %8 = arith.mulf %4, %7 : vector<2064x49xf32>
    %9 = arith.truncf %8 : vector<2064x49xf32> to vector<2064x49xbf16>
    %cst_8 = arith.constant dense<0.000000e+00> : vector<176x49xf32>
    %10 = tpu.matmul %0, %9, %cst_8 {dimension_numbers = #tpu.dot_dimension_numbers<[1], [0], [0], [1], [0, 0, 1, 1], [], []>} : vector<176x2064xbf16>, vector<2064x49xbf16>, vector<176x49xf32> -> vector<176x49xf32>
    %c0_9 = arith.constant 0 : index
    %c0_10 = arith.constant 0 : index
    %c0_11 = arith.constant 0 : index
    %11 = vector.load %arg6[%c0_9, %c0_10, %c0_11] : memref<1x176x49xf32, #tpu.memory_space<vmem>>, vector<1x176x49xf32>
    %12 = vector.shape_cast %11 : vector<1x176x49xf32> to vector<176x49xf32>
    %13 = vector.shape_cast %10 : vector<176x49xf32> to vector<1x176x49xf32>
    tpu.vector_store %arg6[%c0_9, %c0_10, %c0_11], %13 {strides = array<i32>} : memref<1x176x49xf32, #tpu.memory_space<vmem>>, vector<1x176x49xf32>,
    %cst_12 = arith.constant dense<0.000000e+00> : vector<176xf32>
    %14 = vector.multi_reduction <add>, %10, %cst_12 [1] : vector<176x49xf32> to vector<176xf32>
    %15 = vector.shape_cast %14 : vector<176xf32> to vector<176x1xf32>
    %16 = arith.addf %1, %15 : vector<176x1xf32>
    %17 = arith.mulf %10, %10 : vector<176x49xf32>
    %cst_13 = arith.constant dense<0.000000e+00> : vector<176xf32>
    %18 = vector.multi_reduction <add>, %17, %cst_13 [1] : vector<176x49xf32> to vector<176xf32>
    %19 = vector.shape_cast %18 : vector<176xf32> to vector<176x1xf32>
    %20 = arith.addf %2, %19 : vector<176x1xf32>
    %cst_14 = arith.constant 0.0204081628 : f32
    %21 = vector.broadcast %cst_14 : f32 to vector<176x1xf32>
    %22 = arith.mulf %16, %21 : vector<176x1xf32>
    %cst_15 = arith.constant 0.0204081628 : f32
    %23 = vector.broadcast %cst_15 : f32 to vector<176x1xf32>
    %24 = arith.mulf %20, %23 : vector<176x1xf32>
    %25 = arith.mulf %22, %22 : vector<176x1xf32>
    %26 = arith.subf %24, %25 : vector<176x1xf32>
    %cst_16 = arith.constant 0.000000e+00 : f32
    %27 = vector.broadcast %cst_16 : f32 to vector<176x1xf32>
    %28 = arith.maximumf %26, %27 : vector<176x1xf32>
    %c0_17 = arith.constant 0 : index
    %c0_18 = arith.constant 0 : index
    %29 = vector.load %arg4[%c0_17, %c0_18] : memref<176x1xf32, #tpu.memory_space<vmem>>, vector<176x1xf32>
    %cst_19 = arith.constant 9.99999974E-6 : f32
    %30 = vector.broadcast %cst_19 : f32 to vector<176x1xf32>
    %31 = arith.addf %28, %30 : vector<176x1xf32>
    %32 = math.rsqrt %31 : vector<176x1xf32>
    %33 = arith.mulf %29, %32 : vector<176x1xf32>
    %c0_20 = arith.constant 0 : index
    %c0_21 = arith.constant 0 : index
    %34 = vector.load %arg5[%c0_20, %c0_21] : memref<176x1xf32, #tpu.memory_space<vmem>>, vector<176x1xf32>
    %35 = arith.mulf %22, %33 : vector<176x1xf32>
    %36 = arith.subf %34, %35 : vector<176x1xf32>
    %c0_22 = arith.constant 0 : index
    %c0_23 = arith.constant 0 : index
    %c0_24 = arith.constant 0 : index
    %37 = vector.load %arg6[%c0_22, %c0_23, %c0_24] : memref<1x176x49xf32, #tpu.memory_space<vmem>>, vector<1x176x49xf32>
    %38 = vector.shape_cast %37 : vector<1x176x49xf32> to vector<176x49xf32>
    %39 = vector.broadcast %33 : vector<176x1xf32> to vector<176x49xf32>
    %40 = arith.mulf %38, %39 : vector<176x49xf32>
    %41 = vector.broadcast %36 : vector<176x1xf32> to vector<176x49xf32>
    %42 = arith.addf %40, %41 : vector<176x49xf32>
    %c0_25 = arith.constant 0 : index
    %c0_26 = arith.constant 0 : index
    %c0_27 = arith.constant 0 : index
    %43 = vector.load %arg6[%c0_25, %c0_26, %c0_27] : memref<1x176x49xf32, #tpu.memory_space<vmem>>, vector<1x176x49xf32>
    %44 = vector.shape_cast %43 : vector<1x176x49xf32> to vector<176x49xf32>
    %45 = vector.shape_cast %42 : vector<176x49xf32> to vector<1x176x49xf32>
    tpu.vector_store %arg6[%c0_25, %c0_26, %c0_27], %45 {strides = array<i32>} : memref<1x176x49xf32, #tpu.memory_space<vmem>>, vector<1x176x49xf32>,
    return
  }
  func.func @transform_0(%arg0: i32) -> (i32, i32, i32) {
    %c0_i32 = arith.constant 0 : i32
    %c0_i32_0 = arith.constant 0 : i32
    %c0_i32_1 = arith.constant 0 : i32
    %c0_i32_2 = arith.constant 0 : i32
    return %c0_i32, %c0_i32_0, %c0_i32_1 : i32, i32, i32
  }
  func.func @transform_1(%arg0: i32) -> (i32, i32, i32) {
    %c0_i32 = arith.constant 0 : i32
    %c0_i32_0 = arith.constant 0 : i32
    %c0_i32_1 = arith.constant 0 : i32
    %c0_i32_2 = arith.constant 0 : i32
    return %c0_i32, %c0_i32_0, %c0_i32_1 : i32, i32, i32
  }
  func.func @transform_2(%arg0: i32) -> (i32, i32) {
    %c0_i32 = arith.constant 0 : i32
    %c0_i32_0 = arith.constant 0 : i32
    return %arg0, %c0_i32 : i32, i32
  }
  func.func @transform_3(%arg0: i32) -> (i32, i32) {
    %c0_i32 = arith.constant 0 : i32
    %c0_i32_0 = arith.constant 0 : i32
    return %arg0, %c0_i32 : i32, i32
  }
  func.func @transform_4(%arg0: i32) -> (i32, i32) {
    %c0_i32 = arith.constant 0 : i32
    %c0_i32_0 = arith.constant 0 : i32
    return %arg0, %c0_i32 : i32, i32
  }
  func.func @transform_5(%arg0: i32) -> (i32, i32, i32) {
    %c0_i32 = arith.constant 0 : i32
    %c0_i32_0 = arith.constant 0 : i32
    %c0_i32_1 = arith.constant 0 : i32
    return %c0_i32, %arg0, %c0_i32_0 : i32, i32, i32
  }
}

</mosaic_0001>

<bundles_post_ra>
// kernel: fused_mul_conv1x1_bn.1
= control target key start
LH: loop header
LB: loop body
LE: loop exit
PB: predicated region body
PF: predicated region fallthrough
CT: control target
= control target key end

     0   :  { %s7394_s18 = smov 0   ;;  %s7396_s19 = smov 0   ;;  %s10407_s0 = inlined_call_operand.vmem [shape: f32[1,2064,49], index: 0, kind: input, shape index: {}]   ;;  %s10408_s1 = inlined_call_operand.vmem [shape: f32[1,2064,1], index: 1, kind: input, shape index: {}]   ;;  %s10409_s2 = inlined_call_operand.vmem [shape: bf16[344,2064], index: 2, kind: input, shape index: {}]   ;;  %s10410_s3 = inlined_call_operand.vmem [shape: f32[344,1], index: 3, kind: input, shape index: {}]   ;;  %s10411_s4 = inlined_call_operand.vmem [shape: f32[344,1], index: 4, kind: input, shape index: {}]   ;;  %s10412_s5 = inlined_call_operand.vmem [shape: f32[1,344,49], index: 5, kind: output, shape index: {}]  }
   0x1   :  { %s7398_s20 = smov 0  }
   0x2 LB: > { %s7407_s21 = sadd.s32 4294967295, %s7327_s20   ;;  %s7409_s22 = sadd.s32 1, %s7327_s20   ;;  %s7327_s20 = sphi %s7398_s20, %s10420_s20   ;;  %s7323_s19 = sphi %s7396_s19, %s10419_s19   ;;  %s7319_s18 = sphi %s7394_s18, %s10418_s18  }
   0x3   : > { %s139_s23 = ssub.s32 %s7327_s20, %s7409_s22  ;;  %s142_s24 = sadd.s32 1, %s7323_s19 }
   0x4   : > { %p140_p0 = scmp.eq.s32.totalorder %s139_s23, 0  ;;  %p152_p1 = scmp.ne.s32.totalorder %s7323_s19, %s7319_s18 }
   0x5   : > { %p153_p2 = scmp.eq.s32.totalorder %s7407_s21, 1  ;;  %p5909_p3 = scmp.ge.s32.totalorder %s7327_s20, 1 }
   0x6   : > { %s7417_s25 = scalar_select %p140_p0, %s7323_s19, %s142_s24  }
   0x7   : > { %p7419_p4 = por %p153_p2, %p152_p1  ;;  %p237_p5 = scmp.lt.s32.totalorder %s7327_s20, 3 }
   0x9   : > { %p238_p6 = pnand %p5909_p3, %p237_p5 }
   0xa   : > { %v797_v0 = vld [vmem:[%s10408_s1 + $0x10] sm:$0xff] (!%p238_p6)  ;;  %v795_v1 = vld [vmem:[%s10408_s1] sm:$0xff] (!%p238_p6)  ;;  %v7361_v2 = vmov (!%p238_p6), 0   ;;  %v798_v3 = vld [vmem:[%s10408_s1 + $0x18] sm:$0xff] (!%p238_p6)  ;;  %s7568_s28 = smul.u32 (!%p238_p6), 22, %s7407_s21  ;;  %vm7363_vm0 = vmmov (!%p238_p6), 0  }
   0xb   : > { %241 = sbr.rel (%p238_p6) target bundleno = 1345 (0x541), region = 40  ;;  %6949 = vset.pattern.permute.xlu1 (!%p238_p6), %v7361_v2  ;;  %6948 = vset.pattern.permute.xlu0 (!%p238_p6), %v7361_v2  ;;  %v796_v4 = vld [vmem:[%s10408_s1 + $0x8] sm:$0xff] (!%p238_p6)  ;;  %v799_v6 = vld [vmem:[%s10408_s1 + $0x20] sm:$0xff] (!%p238_p6)  ;;  %v802_v7 = vld [vmem:[%s10408_s1 + $0x38] sm:$0xff] (!%p238_p6)  ;;  %vm3665_vm1 = vcmask (!%p238_p6), 130048   ;;  %vm4788_vm2 = vcmask (!%p238_p6), 400384  }
   0xc   : > { %1065 = vperm.xlu1 (!%p238_p6), %6949, %v797_v0   ;;  %1055 = vperm.xlu0 (!%p238_p6), %6948, %v795_v1   ;;  %v800_v5 = vld [vmem:[%s10408_s1 + $0x28] sm:$0xff] (!%p238_p6)  ;;  %v801_v8 = vld [vmem:[%s10408_s1 + $0x30] sm:$0xff] (!%p238_p6)  ;;  %v803_v10 = vld [vmem:[%s10408_s1 + $0x40] sm:$0xff] (!%p238_p6)  ;;  %p294_p7 = scmp.lt.s32.totalorder (!%p238_p6), %s7568_s28, 42 }
   0xd   : > { %v804_v9 = vld [vmem:[%s10408_s1 + $0x48] sm:$0xff] (!%p238_p6)  ;;  %v806_v11 = vld [vmem:[%s10408_s1 + $0x58] sm:$0xff] (!%p238_p6)  ;;  %v805_v12 = vld [vmem:[%s10408_s1 + $0x50] sm:$0xff] (!%p238_p6) }
   0xe   : > { %v808_v13 = vld [vmem:[%s10408_s1 + $0x68] sm:$0xff] (!%p238_p6)  ;;  %v807_v14 = vld [vmem:[%s10408_s1 + $0x60] sm:$0xff] (!%p238_p6)  ;;  %v810_v15 = vld [vmem:[%s10408_s1 + $0x78] sm:$0xff] (!%p238_p6) }
   0xf   : > { %v809_v16 = vld [vmem:[%s10408_s1 + $0x70] sm:$0xff] (!%p238_p6)  ;;  %v812_v17 = vld [vmem:[%s10408_s1 + $0x88] sm:$0xff] (!%p238_p6)  ;;  %v811_v18 = vld [vmem:[%s10408_s1 + $0x80] sm:$0xff] (!%p238_p6) }
  0x10   : > { %1070 = vperm.xlu1 (!%p238_p6), %6949, %v798_v3   ;;  %1060 = vperm.xlu0 (!%p238_p6), %6948, %v796_v4   ;;  %v814_v19 = vld [vmem:[%s10408_s1 + $0x98] sm:$0xff] (!%p238_p6)  ;;  %v813_v20 = vld [vmem:[%s10408_s1 + $0x90] sm:$0xff] (!%p238_p6)  ;;  %v816_v21 = vld [vmem:[%s10408_s1 + $0xa8] sm:$0xff] (!%p238_p6) }
  0x11   : > { %v815_v22 = vld [vmem:[%s10408_s1 + $0xa0] sm:$0xff] (!%p238_p6)  ;;  %v818_v23 = vld [vmem:[%s10408_s1 + $0xb8] sm:$0xff] (!%p238_p6)  ;;  %v817_v24 = vld [vmem:[%s10408_s1 + $0xb0] sm:$0xff] (!%p238_p6) }
  0x12   : > { %v820_v25 = vld [vmem:[%s10408_s1 + $0xc8] sm:$0xff]  ;;  %v819_v26 = vld [vmem:[%s10408_s1 + $0xc0] sm:$0xff]  ;;  %v822_v27 = vld [vmem:[%s10408_s1 + $0xd8] sm:$0xff]  ;;  %s7578_s8 = scalar_select %p294_p7, %s7568_s28, 42 }
  0x13   : > { %v821_v28 = vld [vmem:[%s10408_s1 + $0xd0] sm:$0xff]  ;;  %v824_v29 = vld [vmem:[%s10408_s1 + $0xe8] sm:$0xff]  ;;  %v823_v30 = vld [vmem:[%s10408_s1 + $0xe0] sm:$0xff]  ;;  %s5589_s6 = ssub.s32 (%p7419_p4), 43, %s7568_s28  ;;  %s6123_s7 = smul.u32 (%p7419_p4), 176, %s7407_s21 }
  0x14   : > { %1080 = vperm.xlu1 %6949, %v800_v5   ;;  %1075 = vperm.xlu0 %6948, %v799_v6   ;;  %v826_v31 = vld [vmem:[%s10408_s1 + $0xf8] sm:$0xff]  ;;  %v825_v32 = vld [vmem:[%s10408_s1 + $0xf0] sm:$0xff]  ;;  %v828_v33 = vld [vmem:[%s10408_s1 + $0x108] sm:$0xff]  ;;  %s6855_s9 = smul.u32 68, %s7578_s8  ;;  %s5911_s20 = sshll.u32 %s7578_s8, 3 }
  0x15   : > { %v827_v34 = vld [vmem:[%s10408_s1 + $0x100] sm:$0xff]  ;;  %v830_v35 = vld [vmem:[%s10408_s1 + $0x118] sm:$0xff]  ;;  %v829_v36 = vld [vmem:[%s10408_s1 + $0x110] sm:$0xff]  ;;  %s10088_s27 = scalar_lea.vmem %s10410_s3, %s5911_s20  ;;  %s10101_s30 = scalar_lea.vmem %s10411_s4, %s5911_s20 }
  0x16   : > { %v832_v37 = vld [vmem:[%s10408_s1 + $0x128] sm:$0xff]  ;;  %v831_v38 = vld [vmem:[%s10408_s1 + $0x120] sm:$0xff]  ;;  %v834_v39 = vld [vmem:[%s10408_s1 + $0x138] sm:$0xff]  ;;  %s7590_s16 = scalar_lea.vmem %s10409_s2, %s6855_s9  ;;  %p5590_p8 = scmp.lt.s32.totalorder (%p7419_p4), %s5589_s6, 22 }
  0x17   : > { %v833_v40 = vld [vmem:[%s10408_s1 + $0x130] sm:$0xff]  ;;  %v836_v41 = vld [vmem:[%s10408_s1 + $0x148] sm:$0xff]  ;;  %v835_v42 = vld [vmem:[%s10408_s1 + $0x140] sm:$0xff]  ;;  %s10303_s11 = scalar_lea.vmem (%p7419_p4), %s10412_s5, %s6123_s7  }
  0x18   : > { %1090 = vperm.xlu1 %6949, %v802_v7   ;;  %1085 = vperm.xlu0 %6948, %v801_v8   ;;  %v838_v43 = vld [vmem:[%s10408_s1 + $0x158] sm:$0xff]  ;;  %v837_v44 = vld [vmem:[%s10408_s1 + $0x150] sm:$0xff]  ;;  %v840_v45 = vld [vmem:[%s10408_s1 + $0x168] sm:$0xff] }
  0x19   : > { %v839_v46 = vld [vmem:[%s10408_s1 + $0x160] sm:$0xff]  ;;  %v842_v47 = vld [vmem:[%s10408_s1 + $0x178] sm:$0xff]  ;;  %v841_v48 = vld [vmem:[%s10408_s1 + $0x170] sm:$0xff] }
  0x1a   : > { %v844_v49 = vld [vmem:[%s10408_s1 + $0x188] sm:$0xff]  ;;  %v843_v50 = vld [vmem:[%s10408_s1 + $0x180] sm:$0xff]  ;;  %v846_v51 = vld [vmem:[%s10408_s1 + $0x198] sm:$0xff] }
  0x1b   : > { %v845_v52 = vld [vmem:[%s10408_s1 + $0x190] sm:$0xff]  ;;  %v848_v53 = vld [vmem:[%s10408_s1 + $0x1a8] sm:$0xff]  ;;  %v847_v54 = vld [vmem:[%s10408_s1 + $0x1a0] sm:$0xff] }
  0x1c   : > { %1100 = vperm.xlu1 %6949, %v804_v9   ;;  %1095 = vperm.xlu0 %6948, %v803_v10   ;;  %v6952_v55 = vld [vmem:[%s7590_s16 + $0x334] ss:$68 sps:$4 sm:$0xff]   ;;  %v852_v58 = vld [vmem:[%s10408_s1 + $0x1c8] sm:$0xff]  ;;  %v851_v59 = vld [vmem:[%s10408_s1 + $0x1c0] sm:$0xff] }
  0x1d   : > { %3779 = vmatprep.mubr.bf16.mxu1 %v6952_v55  ;;  %v850_v56 = vld [vmem:[%s10408_s1 + $0x1b8] sm:$0xff]  ;;  %v849_v57 = vld [vmem:[%s10408_s1 + $0x1b0] sm:$0xff]  ;;  %v856_v62 = vld [vmem:[%s10408_s1 + $0x1e8] sm:$0xff] }
  0x1e   : > { %v854_v60 = vld [vmem:[%s10408_s1 + $0x1d8] sm:$0xff]  ;;  %v853_v61 = vld [vmem:[%s10408_s1 + $0x1d0] sm:$0xff]  ;;  %v855_v63 = vld [vmem:[%s10408_s1 + $0x1e0] sm:$0xff] }
  0x1f   : > { %v858_v0 = vld [vmem:[%s10408_s1 + $0x1f8] sm:$0xff]  ;;  %v857_v1 = vld [vmem:[%s10408_s1 + $0x1f0] sm:$0xff]  ;;  %v860_v2 = vld [vmem:[%s10408_s1 + $0x208] sm:$0xff] }
  0x20   : > { %1110 = vperm.xlu1 %6949, %v806_v11   ;;  %1105 = vperm.xlu0 %6948, %v805_v12   ;;  %v859_v3 = vld [vmem:[%s10408_s1 + $0x200] sm:$0xff]  ;;  %v862_v6 = vld [vmem:[%s10408_s1 + $0x218] sm:$0xff]  ;;  %v861_v7 = vld [vmem:[%s10408_s1 + $0x210] sm:$0xff] }
  0x21   : > { %v864_v10 = vld [vmem:[%s10408_s1 + $0x228] sm:$0xff]  ;;  %v863_v11 = vld [vmem:[%s10408_s1 + $0x220] sm:$0xff] }
  0x22   : > { %v542_v55 = vld [vmem:[%s10407_s0 + $0x28] sm:$0xff] }
  0x24   : > { %1120 = vperm.xlu1 %6949, %v808_v13   ;;  %1115 = vperm.xlu0 %6948, %v807_v14   ;;  %v866_v14 = vld [vmem:[%s10408_s1 + $0x238] sm:$0xff] }
  0x28   : > { %1130 = vperm.xlu1 %6949, %v810_v15   ;;  %1125 = vperm.xlu0 %6948, %v809_v16   ;;  %v865_v15 = vld [vmem:[%s10408_s1 + $0x230] sm:$0xff] }
  0x2c   : > { %1140 = vperm.xlu1 %6949, %v812_v17   ;;  %1135 = vperm.xlu0 %6948, %v811_v18   ;;  %v868_v18 = vld [vmem:[%s10408_s1 + $0x248] sm:$0xff] }
  0x30   : > { %1150 = vperm.xlu1 %6949, %v814_v19   ;;  %1145 = vperm.xlu0 %6948, %v813_v20   ;;  %v867_v19 = vld [vmem:[%s10408_s1 + $0x240] sm:$0xff] }
  0x34   : > { %1160 = vperm.xlu1 %6949, %v816_v21   ;;  %1155 = vperm.xlu0 %6948, %v815_v22   ;;  %v870_v22 = vld [vmem:[%s10408_s1 + $0x258] sm:$0xff] }
  0x38   : > { %1170 = vperm.xlu1 %6949, %v818_v23   ;;  %1165 = vperm.xlu0 %6948, %v817_v24   ;;  %v869_v23 = vld [vmem:[%s10408_s1 + $0x250] sm:$0xff]  ;;  %v6966_v24 = vld [vmem:[%s7590_s16 + $0x4] ss:$68 sps:$4 sm:$0xff]  }
  0x39   : > { %3731 = vmatprep.mubr.bf16.mxu0 %v6966_v24  ;;  %v546_v24 = vld [vmem:[%s10407_s0 + $0x48] sm:$0xff] }
  0x3c   : > { %1180 = vperm.xlu1 %6949, %v820_v25   ;;  %1175 = vperm.xlu0 %6948, %v819_v26  }
  0x40   : > { %1190 = vperm.xlu1 %6949, %v822_v27   ;;  %1185 = vperm.xlu0 %6948, %v821_v28   ;;  %v872_v27 = vld [vmem:[%s10408_s1 + $0x268] sm:$0xff]  ;;  %v871_v28 = vld [vmem:[%s10408_s1 + $0x260] sm:$0xff] }
  0x44   : > { %1200 = vperm.xlu1 %6949, %v824_v29   ;;  %1195 = vperm.xlu0 %6948, %v823_v30  }
  0x48   : > { %1210 = vperm.xlu1 %6949, %v826_v31   ;;  %1205 = vperm.xlu0 %6948, %v825_v32   ;;  %v874_v31 = vld [vmem:[%s10408_s1 + $0x278] sm:$0xff]  ;;  %v873_v32 = vld [vmem:[%s10408_s1 + $0x270] sm:$0xff] }
  0x4c   : > { %1220 = vperm.xlu1 %6949, %v828_v33   ;;  %1215 = vperm.xlu0 %6948, %v827_v34   ;;  %v538_v33 = vld [vmem:[%s10407_s0 + $0x8] sm:$0xff] }
  0x50   : > { %1230 = vperm.xlu1 %6949, %v830_v35   ;;  %1225 = vperm.xlu0 %6948, %v829_v36   ;;  %v554_v36 = vld [vmem:[%s10407_s0 + $0x88] sm:$0xff] }
  0x54   : > { %1240 = vperm.xlu1 %6949, %v832_v37   ;;  %1235 = vperm.xlu0 %6948, %v831_v38   ;;  %v553_v37 = vld [vmem:[%s10407_s0 + $0x80] sm:$0xff]  ;;  %v876_v38 = vld [vmem:[%s10408_s1 + $0x288] sm:$0xff] }
  0x58   : > { %1250 = vperm.xlu1 %6949, %v834_v39   ;;  %1245 = vperm.xlu0 %6948, %v833_v40   ;;  %v875_v39 = vld [vmem:[%s10408_s1 + $0x280] sm:$0xff] }
  0x59   : > { %v537_v40 = vld [vmem:[%s10407_s0] sm:$0xff] }
  0x5c   : > { %1260 = vperm.xlu1 %6949, %v836_v41   ;;  %1255 = vperm.xlu0 %6948, %v835_v42   ;;  %v540_v41 = vld [vmem:[%s10407_s0 + $0x18] sm:$0xff] }
  0x60   : > { %1270 = vperm.xlu1 %6949, %v838_v43   ;;  %1265 = vperm.xlu0 %6948, %v837_v44   ;;  %v556_v44 = vld [vmem:[%s10407_s0 + $0x98] sm:$0xff] }
  0x64   : > { %1280 = vperm.xlu1 %6949, %v840_v45   ;;  %1275 = vperm.xlu0 %6948, %v839_v46  }
  0x68   : > { %1290 = vperm.xlu1 %6949, %v842_v47   ;;  %1285 = vperm.xlu0 %6948, %v841_v48   ;;  %v555_v48 = vld [vmem:[%s10407_s0 + $0x90] sm:$0xff] }
  0x6c   : > { %1300 = vperm.xlu1 %6949, %v844_v49   ;;  %1295 = vperm.xlu0 %6948, %v843_v50   ;;  %v878_v49 = vld [vmem:[%s10408_s1 + $0x298] sm:$0xff]  ;;  %v877_v50 = vld [vmem:[%s10408_s1 + $0x290] sm:$0xff] }
  0x70   : > { %1310 = vperm.xlu1 %6949, %v846_v51   ;;  %1305 = vperm.xlu0 %6948, %v845_v52   ;;  %v539_v51 = vld [vmem:[%s10407_s0 + $0x10] sm:$0xff] }
  0x74   : > { %1320 = vperm.xlu1 %6949, %v848_v53   ;;  %1315 = vperm.xlu0 %6948, %v847_v54  }
  0x78   : > { %1330 = vperm.xlu1 %6949, %v850_v56   ;;  %1325 = vperm.xlu0 %6948, %v849_v57   ;;  %v541_v56 = vld [vmem:[%s10407_s0 + $0x20] sm:$0xff] }
  0x7c   : > { %1340 = vperm.xlu1 %6949, %v852_v58   ;;  %1335 = vperm.xlu0 %6948, %v851_v59   ;;  %v558_v59 = vld [vmem:[%s10407_s0 + $0xa8] sm:$0xff] }
  0x80   : > { %1350 = vperm.xlu1 %6949, %v854_v60   ;;  %1345 = vperm.xlu0 %6948, %v853_v61  }
  0x84   : > { %1360 = vperm.xlu1 %6949, %v856_v62   ;;  %1355 = vperm.xlu0 %6948, %v855_v63   ;;  %v557_v63 = vld [vmem:[%s10407_s0 + $0xa0] sm:$0xff] }
  0x88   : > { %1370 = vperm.xlu1 %6949, %v858_v0   ;;  %1365 = vperm.xlu0 %6948, %v857_v1   ;;  %v880_v0 = vld [vmem:[%s10408_s1 + $0x2a8] sm:$0xff]  ;;  %v879_v1 = vld [vmem:[%s10408_s1 + $0x2a0] sm:$0xff] }
  0x8b   : > { %v7635_v4 = vpop.permute.xlu1 %1065  ;;  %v7637_v5 = vpop.permute.xlu0 %1055 }
  0x8c   : > { %1380 = vperm.xlu1 %6949, %v860_v2   ;;  %1375 = vperm.xlu0 %6948, %v859_v3   ;;  %v2343_v52 = vmul.f32 %v7637_v5, %v537_v40  ;;  %v2345_v2 = vmul.f32 %v7635_v4, %v539_v51  ;;  %v544_v3 = vld [vmem:[%s10407_s0 + $0x38] sm:$0xff] }
  0x8d   : > { %v560_v4 = vld [vmem:[%s10407_s0 + $0xb8] sm:$0xff] }
  0x8f   : > { %v7645_v8 = vpop.permute.xlu1 %1070  ;;  %v1061_v9 = vpop.permute.xlu0 %1060 }
  0x90   : > { %1390 = vperm.xlu1 %6949, %v862_v6   ;;  %1385 = vperm.xlu0 %6948, %v861_v7   ;;  %v2344_v45 = vmul.f32 %v1061_v9, %v538_v33  ;;  %v2346_v54 = vmul.f32 %v7645_v8, %v540_v41  ;;  %v543_v8 = vld [vmem:[%s10407_s0 + $0x30] sm:$0xff] }
  0x92   : > { %v2601_v62 = vpack.c.bf16 %v2344_v45, %v2343_v52 }
  0x93   : > { %v7653_v12 = vpop.permute.xlu1 %1080  ;;  %v7655_v13 = vpop.permute.xlu0 %1075 }
  0x94   : > { %1400 = vperm.xlu1 %6949, %v864_v10   ;;  %1395 = vperm.xlu0 %6948, %v863_v11   ;;  %v2348_v6 = vmul.f32 %v7653_v12, %v542_v55  ;;  %v2347_v7 = vmul.f32 %v7655_v13, %v541_v56  ;;  %v2602_v11 = vpack.c.bf16 %v2346_v54, %v2345_v2  ;;  %v559_v12 = vld [vmem:[%s10407_s0 + $0xb0] sm:$0xff]  ;;  %v882_v13 = vld [vmem:[%s10408_s1 + $0x2b8] sm:$0xff]  ;;  %v550_v54 = vld [vmem:[%s10407_s0 + $0x68] sm:$0xff] }
  0x95   : > { %v549_v55 = vld [vmem:[%s10407_s0 + $0x60] sm:$0xff] }
  0x97   : > { %v7663_v16 = vpop.permute.xlu1 %1090  ;;  %v7665_v17 = vpop.permute.xlu0 %1085 }
  0x98   : > { %1410 = vperm.xlu1 %6949, %v866_v14   ;;  %1405 = vperm.xlu0 %6948, %v865_v15   ;;  %v2349_v33 = vmul.f32 %v7665_v17, %v543_v8  ;;  %v548_v17 = vld [vmem:[%s10407_s0 + $0x58] sm:$0xff] }
  0x9b   : > { %v7673_v20 = vpop.permute.xlu1 %1100  ;;  %v7675_v21 = vpop.permute.xlu0 %1095 }
  0x9c   : > { %1420 = vperm.xlu1 %6949, %v868_v18   ;;  %1415 = vperm.xlu0 %6948, %v867_v19   ;;  %v881_v18 = vld [vmem:[%s10408_s1 + $0x2b0] sm:$0xff]  ;;  %v2352_v41 = vmul.f32 %v7673_v20, %v546_v24  ;;  %v891_v24 = vld [vmem:[%s10408_s1 + $0x300] sm:$0xff] }
  0x9d   : > { %v563_v20 = vld [vmem:[%s10407_s0 + $0xd0] sm:$0xff] }
  0x9f   : > { %v7684_v25 = vpop.permute.xlu1 %1110  ;;  %v7686_v26 = vpop.permute.xlu0 %1105 }
  0xa0   : > { %1430 = vperm.xlu1 %6949, %v870_v22   ;;  %1425 = vperm.xlu0 %6948, %v869_v23   ;;  %v2603_v22 = vpack.c.bf16 %v2348_v6, %v2347_v7  ;;  %v2350_v23 = vmul.f32 %v7663_v16, %v544_v3  ;;  %v561_v16 = vld [vmem:[%s10407_s0 + $0xc0] sm:$0xff]  ;;  %v551_v3 = vld [vmem:[%s10407_s0 + $0x70] sm:$0xff]  ;;  %v568_v7 = vld [vmem:[%s10407_s0 + $0xf8] sm:$0xff] }
  0xa3   : > { %v7694_v29 = vpop.permute.xlu1 %1120  ;;  %v7696_v30 = vpop.permute.xlu0 %1115 }
  0xa4   : > { %1440 = vperm.xlu1 %6949, %v872_v27   ;;  %1435 = vperm.xlu0 %6948, %v871_v28   ;;  %v545_v27 = vld [vmem:[%s10407_s0 + $0x40] sm:$0xff]  ;;  %v2355_v2 = vmul.f32 %v7696_v30, %v549_v55  ;;  %v890_v30 = vld [vmem:[%s10408_s1 + $0x2f8] sm:$0xff] }
  0xa5   : > { %v6958_v55 = vld [vmem:[%s7590_s16 + $0x440] ss:$68 sps:$4 sm:$0xff]  }
  0xa7   : > { %v7707_v34 = vpop.permute.xlu1 %1130  ;;  %v7709_v35 = vpop.permute.xlu0 %1125 }
  0xa8   : > { %1450 = vperm.xlu1 %6949, %v874_v31   ;;  %1445 = vperm.xlu0 %6948, %v873_v32   ;;  %v562_v32 = vld [vmem:[%s10407_s0 + $0xc8] sm:$0xff] }
  0xab   : > { %v1141_v42 = vpop.permute.xlu1 %1140  ;;  %v1136_v43 = vpop.permute.xlu0 %1135 }
  0xac   : > { %v2360_v46 = vmul.f32 %v1141_v42, %v554_v36  ;;  %v2359_v47 = vmul.f32 %v1136_v43, %v553_v37  ;;  %1460 = vperm.xlu1 %6949, %v876_v38   ;;  %1455 = vperm.xlu0 %6948, %v875_v39   ;;  %v884_v38 = vld [vmem:[%s10408_s1 + $0x2c8] sm:$0xff]  ;;  %v883_v39 = vld [vmem:[%s10408_s1 + $0x2c0] sm:$0xff]  ;;  %v2351_v42 = vmul.f32 %v7675_v21, %v545_v27  ;;  %v547_v43 = vld [vmem:[%s10407_s0 + $0x50] sm:$0xff] }
  0xad   : > { %v886_v21 = vld [vmem:[%s10408_s1 + $0x2d8] sm:$0xff] }
  0xae   : > { %v2609_v53 = vpack.c.bf16 %v2360_v46, %v2359_v47  ;;  %v564_v46 = vld [vmem:[%s10407_s0 + $0xd8] sm:$0xff]  ;;  %v2604_v47 = vpack.c.bf16 %v2350_v23, %v2349_v33  ;;  %v2605_v52 = vpack.c.bf16 %v2352_v41, %v2351_v42  ;;  %v892_v23 = vld [vmem:[%s10408_s1 + $0x308] sm:$0xff]  ;;  %v6950_v33 = vld [vmem:[%s7590_s16 + $0x330] ss:$68 sps:$4 sm:$0xff]  }
  0xaf   : > { %v1151_v57 = vpop.permute.xlu1 %1150  ;;  %v1146_v58 = vpop.permute.xlu0 %1145 }
  0xb0   : > { %v2362_v60 = vmul.f32 %v1151_v57, %v556_v44  ;;  %v2361_v61 = vmul.f32 %v1146_v58, %v555_v48  ;;  %1470 = vperm.xlu1 %6949, %v878_v49   ;;  %1465 = vperm.xlu0 %6948, %v877_v50   ;;  %v885_v50 = vld [vmem:[%s10408_s1 + $0x2d0] sm:$0xff]  ;;  %v566_v58 = vld [vmem:[%s10407_s0 + $0xe8] sm:$0xff] }
  0xb1   : > { %6124 = vmatprep.subr.bf16.mxu0 %v2609_v53  ;;  %6838 = vmatprep.subr.bf16.mxu1 %v2609_v53  ;;  %v2354_v53 = vmul.f32 %v7684_v25, %v548_v17  ;;  %v565_v25 = vld [vmem:[%s10407_s0 + $0xe0] sm:$0xff]  ;;  %v896_v17 = vld [vmem:[%s10408_s1 + $0x328] sm:$0xff] }
  0xb2   : > { %v2610_v5 = vpack.c.bf16 %v2362_v60, %v2361_v61  ;;  %6125 = vmatpush3.bf16.msra.mxu0 %v2601_v62  ;;  %6846 = vmatpush3.bf16.msra.mxu1 %v2601_v62  ;;  %v888_v62 = vld [vmem:[%s10408_s1 + $0x2e8] sm:$0xff] }
  0xb3   : > { %v1161_v9 = vpop.permute.xlu1 %1160  ;;  %v1156_v10 = vpop.permute.xlu0 %1155 }
  0xb4   : > { %v2364_v14 = vmul.f32 %v1161_v9, %v558_v59  ;;  %v2363_v15 = vmul.f32 %v1156_v10, %v557_v63  ;;  %1480 = vperm.xlu1 %6949, %v880_v0   ;;  %1475 = vperm.xlu0 %6948, %v879_v1   ;;  %v2353_v59 = vmul.f32 %v7686_v26, %v547_v43  ;;  %v887_v63 = vld [vmem:[%s10408_s1 + $0x2e0] sm:$0xff]  ;;  %v552_v26 = vld [vmem:[%s10407_s0 + $0x78] sm:$0xff] }
  0xb5   : > { %6126 = vmatprep.subr.bf16.mxu0 %v2610_v5  ;;  %6839 = vmatprep.subr.bf16.mxu1 %v2610_v5  ;;  %v2356_v1 = vmul.f32 %v7694_v29, %v550_v54  ;;  %v567_v29 = vld [vmem:[%s10407_s0 + $0xf0] sm:$0xff]  ;;  %v898_v43 = vld [vmem:[%s10408_s1 + $0x338] sm:$0xff] }
  0xb6   : > { %v2611_v19 = vpack.c.bf16 %v2364_v14, %v2363_v15  ;;  %6127 = vmatpush3.bf16.msra.mxu0 %v2602_v11  ;;  %6847 = vmatpush3.bf16.msra.mxu1 %v2602_v11  ;;  %v2606_v8 = vpack.c.bf16 %v2354_v53, %v2353_v59  ;;  %v2358_v15 = vmul.f32 %v7707_v34, %v552_v26  ;;  %v902_v53 = vld [vmem:[%s10408_s1 + $0x358] sm:$0xff]  ;;  %v901_v54 = vld [vmem:[%s10408_s1 + $0x350] sm:$0xff] }
  0xb7   : > { %v1171_v28 = vpop.permute.xlu1 %1170  ;;  %v1166_v31 = vpop.permute.xlu0 %1165  ;;  %v2607_v14 = vpack.c.bf16 %v2356_v1, %v2355_v2  ;;  %v906_v26 = vld [vmem:[%s10408_s1 + $0x378] sm:$0xff]  ;;  %v6961_v1 = vld [vmem:[%s7590_s16 + $0x4c8] ss:$68 sps:$4 sm:$0xff]  }
  0xb8   : > { %v2366_v36 = vmul.f32 %v1171_v28, %v560_v4  ;;  %v2365_v37 = vmul.f32 %v1166_v31, %v559_v12  ;;  %1490 = vperm.xlu1 %6949, %v882_v13   ;;  %1485 = vperm.xlu0 %6948, %v881_v18   ;;  %v889_v4 = vld [vmem:[%s10408_s1 + $0x2f0] sm:$0xff]  ;;  %v2357_v18 = vmul.f32 %v7709_v35, %v551_v3  ;;  %v894_v28 = vld [vmem:[%s10408_s1 + $0x318] sm:$0xff] }
  0xb9   : > { %6128 = vmatprep.subr.bf16.mxu0 %v2611_v19  ;;  %6840 = vmatprep.subr.bf16.mxu1 %v2611_v19  ;;  %v6993_v2 = vld [vmem:[%s7590_s16 + $0x198] ss:$68 sps:$4 sm:$0xff]  }
  0xba   : > { %v2612_v40 = vpack.c.bf16 %v2366_v36, %v2365_v37  ;;  %6129 = vmatpush3.bf16.msra.mxu0 %v2603_v22  ;;  %6848 = vmatpush3.bf16.msra.mxu1 %v2603_v22  ;;  %v2608_v31 = vpack.c.bf16 %v2358_v15, %v2357_v18  ;;  %v6964_v36 = vld [vmem:[%s7590_s16] ss:$68 sps:$4 sm:$0xff]   ;;  %v6962_v3 = vld [vmem:[%s7590_s16 + $0x554] ss:$68 sps:$4 sm:$0xff]  }
  0xbb   : > { %v1181_v44 = vpop.permute.xlu1 %1180  ;;  %v1176_v45 = vpop.permute.xlu0 %1175  ;;  %v6953_v37 = vld [vmem:[%s7590_s16 + $0x3bc] ss:$68 sps:$4 sm:$0xff]   ;;  %v571_v18 = vld [vmem:[%s10407_s0 + $0x110] sm:$0xff] }
  0xbc   : > { %v2368_v48 = vmul.f32 %v1181_v44, %v562_v32  ;;  %v2367_v49 = vmul.f32 %v1176_v45, %v561_v16  ;;  %1500 = vperm.xlu1 %6949, %v884_v38   ;;  %1495 = vperm.xlu0 %6948, %v883_v39   ;;  %v893_v32 = vld [vmem:[%s10408_s1 + $0x310] sm:$0xff]  ;;  %v6955_v45 = vld [vmem:[%s7590_s16 + $0x3b8] ss:$68 sps:$4 sm:$0xff]  }
  0xbd   : > { %6130 = vmatprep.subr.bf16.mxu0 %v2612_v40  ;;  %6841 = vmatprep.subr.bf16.mxu1 %v2612_v40  ;;  %v6977_v16 = vld [vmem:[%s7590_s16 + $0x8c] ss:$68 sps:$4 sm:$0xff]   ;;  %v895_v40 = vld [vmem:[%s10408_s1 + $0x320] sm:$0xff]  ;;  %v572_v15 = vld [vmem:[%s10407_s0 + $0x118] sm:$0xff] }
  0xbe   : > { %v2613_v51 = vpack.c.bf16 %v2368_v48, %v2367_v49  ;;  %6131 = vmatpush3.bf16.msra.mxu0 %v2604_v47  ;;  %6849 = vmatpush3.bf16.msra.mxu1 %v2604_v47  ;;  %v897_v44 = vld [vmem:[%s10408_s1 + $0x330] sm:$0xff]  ;;  %v6956_v47 = vld [vmem:[%s7590_s16 + $0x444] ss:$68 sps:$4 sm:$0xff]  }
  0xbf   : > { %v1191_v56 = vpop.permute.xlu1 %1190  ;;  %v1186_v57 = vpop.permute.xlu0 %1185  ;;  %v6983_v48 = vld [vmem:[%s7590_s16 + $0x114] ss:$68 sps:$4 sm:$0xff]  }
  0xc0   : > { %v2370_v60 = vmul.f32 %v1191_v56, %v564_v46  ;;  %v2369_v61 = vmul.f32 %v1186_v57, %v563_v20  ;;  %1510 = vperm.xlu1 %6949, %v886_v21   ;;  %1505 = vperm.xlu0 %6948, %v885_v50   ;;  %v6981_v46 = vld [vmem:[%s7590_s16 + $0x88] ss:$68 sps:$4 sm:$0xff]   ;;  %v899_v50 = vld [vmem:[%s10408_s1 + $0x340] sm:$0xff]  ;;  %v6987_v56 = vld [vmem:[%s7590_s16 + $0x110] ss:$68 sps:$4 sm:$0xff]  }
  0xc1   : > { %6132 = vmatprep.subr.bf16.mxu0 %v2613_v51  ;;  %6842 = vmatprep.subr.bf16.mxu1 %v2613_v51  ;;  %v900_v21 = vld [vmem:[%s10408_s1 + $0x348] sm:$0xff] }
  0xc2   : > { %v2614_v0 = vpack.c.bf16 %v2370_v60, %v2369_v61  ;;  %6133 = vmatpush3.bf16.msra.mxu0 %v2605_v52  ;;  %6850 = vmatpush3.bf16.msra.mxu1 %v2605_v52  ;;  %v6959_v57 = vld [vmem:[%s7590_s16 + $0x4cc] ss:$68 sps:$4 sm:$0xff]  }
  0xc3   : > { %v1201_v5 = vpop.permute.xlu1 %1200  ;;  %v1196_v6 = vpop.permute.xlu0 %1195  ;;  %v904_v61 = vld [vmem:[%s10408_s1 + $0x368] sm:$0xff] }
  0xc4   : > { %v2372_v9 = vmul.f32 %v1201_v5, %v566_v58  ;;  %v2371_v10 = vmul.f32 %v1196_v6, %v565_v25  ;;  %1520 = vperm.xlu1 %6949, %v888_v62   ;;  %1515 = vperm.xlu0 %6948, %v887_v63   ;;  %v6989_v58 = vld [vmem:[%s7590_s16 + $0x19c] ss:$68 sps:$4 sm:$0xff]   ;;  %v6995_v5 = vld [vmem:[%s7590_s16 + $0x224] ss:$68 sps:$4 sm:$0xff]  }
  0xc5   : > { %6134 = vmatprep.subr.bf16.mxu0 %v2614_v0  ;;  %6843 = vmatprep.subr.bf16.mxu1 %v2614_v0  ;;  %v903_v25 = vld [vmem:[%s10408_s1 + $0x360] sm:$0xff]  ;;  %v905_v0 = vld [vmem:[%s10408_s1 + $0x370] sm:$0xff] }
  0xc6   : > { %v2615_v11 = vpack.c.bf16 %v2372_v9, %v2371_v10  ;;  %6135 = vmatpush3.bf16.msra.mxu0 %v2606_v8  ;;  %6851 = vmatpush3.bf16.msra.mxu1 %v2606_v8  ;;  %v570_v8 = vld [vmem:[%s10407_s0 + $0x108] sm:$0xff]  ;;  %v569_v9 = vld [vmem:[%s10407_s0 + $0x100] sm:$0xff] }
  0xc7   : > { %v1211_v12 = vpop.permute.xlu1 %1210  ;;  %v1206_v13 = vpop.permute.xlu0 %1205  ;;  %v586_v10 = vld [vmem:[%s10407_s0 + $0x188] sm:$0xff] }
  0xc8   : > { %v2374_v19 = vmul.f32 %v1211_v12, %v568_v7  ;;  %v2373_v22 = vmul.f32 %v1206_v13, %v567_v29  ;;  %1530 = vperm.xlu1 %6949, %v890_v30   ;;  %1525 = vperm.xlu0 %6948, %v889_v4   ;;  %v585_v29 = vld [vmem:[%s10407_s0 + $0x180] sm:$0xff]  ;;  %v908_v30 = vld [vmem:[%s10408_s1 + $0x388] sm:$0xff] }
  0xc9   : > { %6136 = vmatprep.subr.bf16.mxu0 %v2615_v11  ;;  %6844 = vmatprep.subr.bf16.mxu1 %v2615_v11  ;;  %v907_v4 = vld [vmem:[%s10408_s1 + $0x380] sm:$0xff] }
  0xca   : > { %v2616_v34 = vpack.c.bf16 %v2374_v19, %v2373_v22  ;;  %6137 = vmatpush3.bf16.msra.mxu0 %v2607_v14  ;;  %6852 = vmatpush3.bf16.msra.mxu1 %v2607_v14 }
  0xcb   : > { %v7873_v35 = vpop.permute.xlu1 %1220  ;;  %v7875_v27 = vpop.permute.xlu0 %1215 }
  0xcc   : > { %1540 = vperm.xlu1 %6949, %v892_v23   ;;  %1535 = vperm.xlu0 %6948, %v891_v24   ;;  %v2376_v11 = vmul.f32 %v7873_v35, %v570_v8  ;;  %v2375_v14 = vmul.f32 %v7875_v27, %v569_v9  ;;  %v588_v23 = vld [vmem:[%s10407_s0 + $0x198] sm:$0xff]  ;;  %v587_v24 = vld [vmem:[%s10407_s0 + $0x190] sm:$0xff] }
  0xcd   : > { %6138 = vmatprep.subr.bf16.mxu0 %v2616_v34  ;;  %6845 = vmatprep.subr.bf16.mxu1 %v2616_v34  ;;  %v910_v34 = vld [vmem:[%s10408_s1 + $0x398] sm:$0xff]  ;;  %v909_v35 = vld [vmem:[%s10408_s1 + $0x390] sm:$0xff] }
  0xce   : > { %6139 = vmatpush3.bf16.msra.mxu0 %v2608_v31  ;;  %6853 = vmatpush3.bf16.msra.mxu1 %v2608_v31  ;;  %v6967_v27 = vld [vmem:[%s7590_s16 + $0x550] ss:$68 sps:$4 sm:$0xff]  }
  0xcf   : > { %v7887_v38 = vpop.permute.xlu1 %1230  ;;  %v7889_v39 = vpop.permute.xlu0 %1225  ;;  %v6970_v31 = vld [vmem:[%s7590_s16 + $0xc] ss:$68 sps:$4 sm:$0xff]  }
  0xd0   : > { %1550 = vperm.xlu1 %6949, %v894_v28   ;;  %1545 = vperm.xlu0 %6948, %v893_v32   ;;  %v2617_v32 = vpack.c.bf16 %v2376_v11, %v2375_v14  ;;  %v593_v14 = vld [vmem:[%s10407_s0 + $0x1c0] sm:$0xff] }
  0xd1   : > { %3780 = vmatmul.mubr.bf16.vlgmr.msra.gmra.mrb[0].mxu1 %v6950_v33  ;;  %3732 = vmatmul.mubr.bf16.vlgmr.msra.gmra.mrb[0].mxu0 %v6964_v36  ;;  %v2378_v33 = vmul.f32 %v7887_v38, %v572_v15  ;;  %v574_v36 = vld [vmem:[%s10407_s0 + $0x128] sm:$0xff]  ;;  %v915_v15 = vld [vmem:[%s10408_s1 + $0x3c0] sm:$0xff] }
  0xd2   : > { %3787 = vmatprep.mubr.bf16.mxu1 %v6953_v37  ;;  %3739 = vmatprep.mubr.bf16.mxu0 %v6977_v16  ;;  %v590_v38 = vld [vmem:[%s10407_s0 + $0x1a8] sm:$0xff] }
  0xd3   : > { %v7897_v41 = vpop.permute.xlu1 %1240  ;;  %v7899_v42 = vpop.permute.xlu0 %1235 }
  0xd4   : > { %1560 = vperm.xlu1 %6949, %v896_v17   ;;  %1555 = vperm.xlu0 %6948, %v895_v40   ;;  %v6999_v17 = vld [vmem:[%s7590_s16 + $0x220] ss:$68 sps:$4 sm:$0xff]   ;;  %v2377_v40 = vmul.f32 %v7889_v39, %v571_v18  ;;  %v912_v39 = vld [vmem:[%s10408_s1 + $0x3a8] sm:$0xff] }
  0xd7   : > { %v7911_v49 = vpop.permute.xlu1 %1250  ;;  %v7913_v20 = vpop.permute.xlu0 %1245 }
  0xd8   : > { %1570 = vperm.xlu1 %6949, %v898_v43   ;;  %1565 = vperm.xlu0 %6948, %v897_v44   ;;  %v573_v43 = vld [vmem:[%s10407_s0 + $0x120] sm:$0xff] }
  0xd9   : > { %3788 = vmatmul.mubr.bf16.gmra.mrb[4].mxu1 %v6955_v45  ;;  %3740 = vmatmul.mubr.bf16.gmra.mrb[4].mxu0 %v6981_v46  ;;  %v589_v46 = vld [vmem:[%s10407_s0 + $0x1a0] sm:$0xff] }
  0xda   : > { %3795 = vmatprep.mubr.bf16.mxu1 %v6956_v47  ;;  %3747 = vmatprep.mubr.bf16.mxu0 %v6983_v48  ;;  %v911_v47 = vld [vmem:[%s10408_s1 + $0x3a0] sm:$0xff]  ;;  %v7001_v48 = vld [vmem:[%s7590_s16 + $0x2ac] ss:$68 sps:$4 sm:$0xff]  }
  0xdb   : > { %v7921_v51 = vpop.permute.xlu1 %1260  ;;  %v7923_v52 = vpop.permute.xlu0 %1255 }
  0xdc   : > { %1580 = vperm.xlu1 %6949, %v900_v21   ;;  %1575 = vperm.xlu0 %6948, %v899_v50   ;;  %v2380_v50 = vmul.f32 %v7897_v41, %v574_v36  ;;  %v592_v41 = vld [vmem:[%s10407_s0 + $0x1b8] sm:$0xff] }
  0xdf   : > { %v7935_v59 = vpop.permute.xlu1 %1270  ;;  %v7937_v60 = vpop.permute.xlu0 %1265 }
  0xe0   : > { %1590 = vperm.xlu1 %6949, %v902_v53   ;;  %1585 = vperm.xlu0 %6948, %v901_v54   ;;  %v2379_v53 = vmul.f32 %v7899_v42, %v573_v43  ;;  %v591_v42 = vld [vmem:[%s10407_s0 + $0x1b0] sm:$0xff]  ;;  %v582_v43 = vld [vmem:[%s10407_s0 + $0x168] sm:$0xff] }
  0xe1   : > { %3796 = vmatmul.mubr.bf16.gmra.mrb[8].mxu1 %v6958_v55  ;;  %3748 = vmatmul.mubr.bf16.gmra.mrb[8].mxu0 %v6987_v56  ;;  %v2618_v56 = vpack.c.bf16 %v2378_v33, %v2377_v40 }
  0xe2   : > { %3803 = vmatprep.mubr.bf16.mxu1 %v6959_v57  ;;  %3755 = vmatprep.mubr.bf16.mxu0 %v6989_v58  ;;  %v576_v57 = vld [vmem:[%s10407_s0 + $0x138] sm:$0xff]  ;;  %v575_v58 = vld [vmem:[%s10407_s0 + $0x130] sm:$0xff] }
  0xe3   : > { %v7945_v62 = vpop.permute.xlu1 %1280  ;;  %v7947_v63 = vpop.permute.xlu0 %1275 }
  0xe4   : > { %1600 = vperm.xlu1 %6949, %v904_v61   ;;  %1595 = vperm.xlu0 %6948, %v903_v25  }
  0xe7   : > { %v7959_v6 = vpop.permute.xlu1 %1290  ;;  %v7961_v7 = vpop.permute.xlu0 %1285 }
  0xe8   : > { %1610 = vperm.xlu1 %6949, %v906_v26   ;;  %1605 = vperm.xlu0 %6948, %v905_v0   ;;  %v914_v26 = vld [vmem:[%s10408_s1 + $0x3b8] sm:$0xff]  ;;  %v913_v0 = vld [vmem:[%s10408_s1 + $0x3b0] sm:$0xff] }
  0xe9   : > { %3804 = vmatmul.mubr.bf16.gmra.mrb[12].mxu1 %v6961_v1  ;;  %3756 = vmatmul.mubr.bf16.gmra.mrb[12].mxu0 %v6993_v2  ;;  %v2619_v2 = vpack.c.bf16 %v2380_v50, %v2379_v53 }
  0xea   : > { %3811 = vmatprep.mubr.bf16.mxu1 %v6962_v3  ;;  %3763 = vmatprep.mubr.bf16.mxu0 %v6995_v5  ;;  %v2382_v3 = vmul.f32 %v7911_v49, %v576_v57  ;;  %v578_v5 = vld [vmem:[%s10407_s0 + $0x148] sm:$0xff] }
  0xeb   : > { %v1301_v12 = vpop.permute.xlu1 %1300  ;;  %v1296_v13 = vpop.permute.xlu0 %1295  ;;  %v594_v49 = vld [vmem:[%s10407_s0 + $0x1c8] sm:$0xff]  ;;  %v2384_v18 = vmul.f32 %v7921_v51, %v578_v5  ;;  %v596_v51 = vld [vmem:[%s10407_s0 + $0x1d8] sm:$0xff] }
  0xec   : > { %v2392_v19 = vmul.f32 %v1301_v12, %v586_v10  ;;  %v2391_v22 = vmul.f32 %v1296_v13, %v585_v29  ;;  %1620 = vperm.xlu1 %6949, %v908_v30   ;;  %1615 = vperm.xlu0 %6948, %v907_v4   ;;  %v7005_v10 = vld [vmem:[%s7590_s16 + $0x2a8] ss:$68 sps:$4 sm:$0xff]   ;;  %v2381_v29 = vmul.f32 %v7913_v20, %v575_v58  ;;  %v577_v30 = vld [vmem:[%s10407_s0 + $0x140] sm:$0xff]  ;;  %v7011_v12 = vld [vmem:[%s7590_s16 + $0x14] ss:$68 sps:$4 sm:$0xff]  }
  0xed   : > { %v916_v20 = vld [vmem:[%s10408_s1 + $0x3c8] sm:$0xff] }
  0xee   : > { %v2625_v28 = vpack.c.bf16 %v2392_v19, %v2391_v22  ;;  %v2383_v19 = vmul.f32 %v7923_v52, %v577_v30  ;;  %v595_v52 = vld [vmem:[%s10407_s0 + $0x1d0] sm:$0xff]  ;;  %v926_v30 = vld [vmem:[%s10408_s1 + $0x418] sm:$0xff] }
  0xef   : > { %v1311_v37 = vpop.permute.xlu1 %1310  ;;  %v1306_v16 = vpop.permute.xlu0 %1305 }
  0xf0   : > { %v2394_v44 = vmul.f32 %v1311_v37, %v588_v23  ;;  %v2393_v45 = vmul.f32 %v1306_v16, %v587_v24  ;;  %1630 = vperm.xlu1 %6949, %v910_v34   ;;  %1625 = vperm.xlu0 %6948, %v909_v35   ;;  %v2620_v24 = vpack.c.bf16 %v2382_v3, %v2381_v29  ;;  %v580_v34 = vld [vmem:[%s10407_s0 + $0x158] sm:$0xff]  ;;  %v579_v35 = vld [vmem:[%s10407_s0 + $0x150] sm:$0xff] }
  0xf1   : > { %6206 = vmatprep.subr.bf16.mxu1 %v2625_v28  ;;  %3812 = vmatmul.mubr.bf16.gmra.mrb[16].mxu1 %v6967_v27  ;;  %v2621_v36 = vpack.c.bf16 %v2384_v18, %v2383_v19  ;;  %v2386_v37 = vmul.f32 %v7935_v59, %v580_v34  ;;  %v2385_v40 = vmul.f32 %v7937_v60, %v579_v35  ;;  %v598_v59 = vld [vmem:[%s10407_s0 + $0x1e8] sm:$0xff]  ;;  %v597_v60 = vld [vmem:[%s10407_s0 + $0x1e0] sm:$0xff]  ;;  %v930_v19 = vld [vmem:[%s10408_s1 + $0x438] sm:$0xff] }
  0xf2   : > { %v2626_v21 = vpack.c.bf16 %v2394_v44, %v2393_v45  ;;  %6207 = vmatpush3.bf16.msra.mxu1 %v2617_v32  ;;  %3852 = vmatprep.mubr.bf16.mxu1 %v6970_v31  ;;  %v918_v31 = vld [vmem:[%s10408_s1 + $0x3d8] sm:$0xff]  ;;  %v917_v32 = vld [vmem:[%s10408_s1 + $0x3d0] sm:$0xff]  ;;  %v581_v44 = vld [vmem:[%s10407_s0 + $0x160] sm:$0xff] }
  0xf3   : > { %v1321_v54 = vpop.permute.xlu1 %1320  ;;  %v1316_v55 = vpop.permute.xlu0 %1315  ;;  %3764 = vmatmul.mubr.bf16.gmra.mrb[16].mxu0 %v6999_v17 }
  0xf4   : > { %v2396_v61 = vmul.f32 %v1321_v54, %v590_v38  ;;  %v2395_v25 = vmul.f32 %v1316_v55, %v589_v46  ;;  %1640 = vperm.xlu1 %6949, %v912_v39   ;;  %1635 = vperm.xlu0 %6948, %v911_v47   ;;  %v920_v46 = vld [vmem:[%s10408_s1 + $0x3e8] sm:$0xff]  ;;  %v919_v39 = vld [vmem:[%s10408_s1 + $0x3e0] sm:$0xff]  ;;  %v2622_v54 = vpack.c.bf16 %v2386_v37, %v2385_v40  ;;  %v584_v55 = vld [vmem:[%s10407_s0 + $0x178] sm:$0xff] }
  0xf5   : > { %6208 = vmatprep.subr.bf16.mxu1 %v2626_v21  ;;  %3771 = vmatprep.mubr.bf16.mxu0 %v7001_v48  ;;  %v2388_v48 = vmul.f32 %v7945_v62, %v582_v43  ;;  %v2387_v21 = vmul.f32 %v7947_v63, %v581_v44  ;;  %v600_v62 = vld [vmem:[%s10407_s0 + $0x1f8] sm:$0xff]  ;;  %v599_v63 = vld [vmem:[%s10407_s0 + $0x1f0] sm:$0xff]  ;;  %v935_v40 = vld [vmem:[%s10408_s1 + $0x460] sm:$0xff] }
  0xf6   : > { %v2627_v1 = vpack.c.bf16 %v2396_v61, %v2395_v25  ;;  %6209 = vmatpush3.bf16.msra.mxu1 %v2618_v56  ;;  %v583_v56 = vld [vmem:[%s10407_s0 + $0x170] sm:$0xff]  ;;  %v922_v61 = vld [vmem:[%s10408_s1 + $0x3f8] sm:$0xff] }
  0xf7   : > { %v1331_v8 = vpop.permute.xlu1 %1330  ;;  %v1326_v9 = vpop.permute.xlu0 %1325  ;;  %v921_v25 = vld [vmem:[%s10408_s1 + $0x3f0] sm:$0xff] }
  0xf8   : > { %v2398_v4 = vmul.f32 %v1331_v8, %v592_v41  ;;  %v2397_v11 = vmul.f32 %v1326_v9, %v591_v42  ;;  %1650 = vperm.xlu1 %6949, %v914_v26   ;;  %1645 = vperm.xlu0 %6948, %v913_v0   ;;  %v2623_v42 = vpack.c.bf16 %v2388_v48, %v2387_v21  ;;  %v924_v8 = vld [vmem:[%s10408_s1 + $0x408] sm:$0xff]  ;;  %v923_v9 = vld [vmem:[%s10408_s1 + $0x400] sm:$0xff] }
  0xf9   : > { %6210 = vmatprep.subr.bf16.mxu1 %v2627_v1  ;;  %v2390_v26 = vmul.f32 %v7959_v6, %v584_v55  ;;  %v601_v48 = vld [vmem:[%s10407_s0 + $0x200] sm:$0xff]  ;;  %v618_v21 = vld [vmem:[%s10407_s0 + $0x288] sm:$0xff] }
  0xfa   : > { %v2628_v13 = vpack.c.bf16 %v2398_v4, %v2397_v11  ;;  %6211 = vmatpush3.bf16.msra.mxu1 %v2619_v2  ;;  %v2389_v2 = vmul.f32 %v7961_v7, %v583_v56  ;;  %v925_v4 = vld [vmem:[%s10408_s1 + $0x410] sm:$0xff]  ;;  %v6968_v11 = vld [vmem:[%s7590_s16 + $0x8] ss:$68 sps:$4 sm:$0xff]  }
  0xfb   : > { %v1341_v22 = vpop.permute.xlu1 %1340  ;;  %v1336_v23 = vpop.permute.xlu0 %1335  ;;  %3772 = vmatmul.mubr.bf16.gmra.mrb[20].mxu0 %v7005_v10 }
  0xfc   : > { %v2400_v27 = vmul.f32 %v1341_v22, %v594_v49  ;;  %v2399_v28 = vmul.f32 %v1336_v23, %v593_v14  ;;  %1660 = vperm.xlu1 %6949, %v916_v20   ;;  %1655 = vperm.xlu0 %6948, %v915_v15   ;;  %v2624_v29 = vpack.c.bf16 %v2390_v26, %v2389_v2  ;;  %v6971_v49 = vld [vmem:[%s7590_s16 + $0x94] ss:$68 sps:$4 sm:$0xff]   ;;  %v928_v15 = vld [vmem:[%s10408_s1 + $0x428] sm:$0xff] }
  0xfd   : > { %6212 = vmatprep.subr.bf16.mxu1 %v2628_v13  ;;  %3973 = vmatprep.mubr.bf16.mxu0 %v7011_v12  ;;  %v927_v12 = vld [vmem:[%s10408_s1 + $0x420] sm:$0xff]  ;;  %v929_v22 = vld [vmem:[%s10408_s1 + $0x430] sm:$0xff]  ;;  %v942_v26 = vld [vmem:[%s10408_s1 + $0x498] sm:$0xff] }
  0xfe   : > { %v2629_v33 = vpack.c.bf16 %v2400_v27, %v2399_v28  ;;  %6213 = vmatpush3.bf16.msra.mxu1 %v2620_v24  ;;  %v6973_v23 = vld [vmem:[%s7590_s16 + $0x90] ss:$68 sps:$4 sm:$0xff]   ;;  %v6974_v24 = vld [vmem:[%s7590_s16 + $0x11c] ss:$68 sps:$4 sm:$0xff]   ;;  %v932_v27 = vld [vmem:[%s10408_s1 + $0x448] sm:$0xff] }
  0xff   : > { %v1351_v16 = vpop.permute.xlu1 %1350  ;;  %v1346_v17 = vpop.permute.xlu0 %1345  ;;  %v931_v28 = vld [vmem:[%s10408_s1 + $0x440] sm:$0xff] }
 0x100   : > { %v2402_v45 = vmul.f32 %v1351_v16, %v596_v51  ;;  %v2401_v38 = vmul.f32 %v1346_v17, %v595_v52  ;;  %1670 = vperm.xlu1 %6949, %v918_v31   ;;  %1665 = vperm.xlu0 %6948, %v917_v32   ;;  %v934_v31 = vld [vmem:[%s10408_s1 + $0x458] sm:$0xff]  ;;  %v933_v32 = vld [vmem:[%s10408_s1 + $0x450] sm:$0xff]  ;;  %v936_v17 = vld [vmem:[%s10408_s1 + $0x468] sm:$0xff] }
 0x101   : > { %6214 = vmatprep.subr.bf16.mxu1 %v2629_v33  ;;  %v6976_v33 = vld [vmem:[%s7590_s16 + $0x118] ss:$68 sps:$4 sm:$0xff]  }
 0x102   : > { %v2630_v47 = vpack.c.bf16 %v2402_v45, %v2401_v38  ;;  %6215 = vmatpush3.bf16.msra.mxu1 %v2621_v36  ;;  %v6979_v36 = vld [vmem:[%s7590_s16 + $0x1a4] ss:$68 sps:$4 sm:$0xff]   ;;  %v938_v45 = vld [vmem:[%s10408_s1 + $0x478] sm:$0xff]  ;;  %v937_v38 = vld [vmem:[%s10408_s1 + $0x470] sm:$0xff] }
 0x103   : > { %v1361_v50 = vpop.permute.xlu1 %1360  ;;  %v1356_v53 = vpop.permute.xlu0 %1355 }
 0x104   : > { %v2404_v57 = vmul.f32 %v1361_v50, %v598_v59  ;;  %v2403_v58 = vmul.f32 %v1356_v53, %v597_v60  ;;  %1680 = vperm.xlu1 %6949, %v920_v46   ;;  %1675 = vperm.xlu0 %6948, %v919_v39   ;;  %v6982_v59 = vld [vmem:[%s7590_s16 + $0x1a0] ss:$68 sps:$4 sm:$0xff]   ;;  %v6985_v60 = vld [vmem:[%s7590_s16 + $0x22c] ss:$68 sps:$4 sm:$0xff]  }
 0x105   : > { %6216 = vmatprep.subr.bf16.mxu1 %v2630_v47  ;;  %v602_v47 = vld [vmem:[%s10407_s0 + $0x208] sm:$0xff]  ;;  %v617_v50 = vld [vmem:[%s10407_s0 + $0x280] sm:$0xff] }
 0x106   : > { %v2631_v41 = vpack.c.bf16 %v2404_v57, %v2403_v58  ;;  %6217 = vmatpush3.bf16.msra.mxu1 %v2622_v54  ;;  %v940_v53 = vld [vmem:[%s10408_s1 + $0x488] sm:$0xff]  ;;  %v939_v54 = vld [vmem:[%s10408_s1 + $0x480] sm:$0xff]  ;;  %v604_v57 = vld [vmem:[%s10407_s0 + $0x218] sm:$0xff] }
 0x107   : > { %v1371_v0 = vpop.permute.xlu1 %1370  ;;  %v1366_v1 = vpop.permute.xlu0 %1365 }
 0x108   : > { %v2406_v3 = vmul.f32 %v1371_v0, %v600_v62  ;;  %v2405_v5 = vmul.f32 %v1366_v1, %v599_v63  ;;  %1690 = vperm.xlu1 %6949, %v922_v61   ;;  %1685 = vperm.xlu0 %6948, %v921_v25   ;;  %v603_v63 = vld [vmem:[%s10407_s0 + $0x210] sm:$0xff]  ;;  %v6988_v1 = vld [vmem:[%s7590_s16 + $0x228] ss:$68 sps:$4 sm:$0xff]  }
 0x109   : > { %6218 = vmatprep.subr.bf16.mxu1 %v2631_v41  ;;  %v620_v41 = vld [vmem:[%s10407_s0 + $0x298] sm:$0xff]  ;;  %v941_v0 = vld [vmem:[%s10408_s1 + $0x490] sm:$0xff] }
 0x10a   : > { %v2632_v6 = vpack.c.bf16 %v2406_v3, %v2405_v5  ;;  %6219 = vmatpush3.bf16.msra.mxu1 %v2623_v42  ;;  %v619_v42 = vld [vmem:[%s10407_s0 + $0x290] sm:$0xff] }
 0x10b   : > { %v8135_v10 = vpop.permute.xlu1 %1380  ;;  %v8137_v7 = vpop.permute.xlu0 %1375  ;;  %v6991_v3 = vld [vmem:[%s7590_s16 + $0x2b4] ss:$68 sps:$4 sm:$0xff]  }
 0x10c   : > { %1700 = vperm.xlu1 %6949, %v924_v8   ;;  %1695 = vperm.xlu0 %6948, %v923_v9   ;;  %v2408_v55 = vmul.f32 %v8135_v10, %v602_v47  ;;  %v2407_v56 = vmul.f32 %v8137_v7, %v601_v48  ;;  %v606_v7 = vld [vmem:[%s10407_s0 + $0x228] sm:$0xff] }
 0x10d   : > { %6220 = vmatprep.subr.bf16.mxu1 %v2632_v6 }
 0x10e   : > { %6221 = vmatpush3.bf16.msra.mxu1 %v2624_v29  ;;  %v2633_v5 = vpack.c.bf16 %v2408_v55, %v2407_v56  ;;  %v605_v29 = vld [vmem:[%s10407_s0 + $0x220] sm:$0xff]  ;;  %v948_v55 = vld [vmem:[%s10408_s1 + $0x4c8] sm:$0xff] }
 0x10f   : > { %v8147_v14 = vpop.permute.xlu1 %1390  ;;  %v8149_v20 = vpop.permute.xlu0 %1385  ;;  %v947_v56 = vld [vmem:[%s10408_s1 + $0x4c0] sm:$0xff] }
 0x110   : > { %1710 = vperm.xlu1 %6949, %v926_v30   ;;  %1705 = vperm.xlu0 %6948, %v925_v4   ;;  %v2410_v8 = vmul.f32 %v8147_v14, %v604_v57  ;;  %v2409_v10 = vmul.f32 %v8149_v20, %v603_v63  ;;  %v944_v14 = vld [vmem:[%s10408_s1 + $0x4a8] sm:$0xff]  ;;  %v943_v20 = vld [vmem:[%s10408_s1 + $0x4a0] sm:$0xff]  ;;  %v612_v63 = vld [vmem:[%s10407_s0 + $0x258] sm:$0xff] }
 0x111   : > { %3853 = vmatmul.mubr.bf16.vlgmr.msra.gmra.mrb[20].mxu1 %v6968_v11  ;;  %v622_v11 = vld [vmem:[%s10407_s0 + $0x2a8] sm:$0xff] }
 0x112   : > { %3860 = vmatprep.mubr.bf16.mxu1 %v6971_v49  ;;  %v621_v49 = vld [vmem:[%s10407_s0 + $0x2a0] sm:$0xff] }
 0x113   : > { %v8157_v13 = vpop.permute.xlu1 %1400  ;;  %v8159_v18 = vpop.permute.xlu0 %1395 }
 0x114   : > { %1720 = vperm.xlu1 %6949, %v928_v15   ;;  %1715 = vperm.xlu0 %6948, %v927_v12   ;;  %v2412_v12 = vmul.f32 %v8157_v13, %v606_v7  ;;  %v624_v13 = vld [vmem:[%s10407_s0 + $0x2b8] sm:$0xff] }
 0x117   : > { %v8169_v34 = vpop.permute.xlu1 %1410  ;;  %v8171_v35 = vpop.permute.xlu0 %1405 }
 0x118   : > { %1730 = vperm.xlu1 %6949, %v930_v19   ;;  %1725 = vperm.xlu0 %6948, %v929_v22   ;;  %v2411_v19 = vmul.f32 %v8159_v18, %v605_v29  ;;  %v608_v22 = vld [vmem:[%s10407_s0 + $0x238] sm:$0xff]  ;;  %v623_v18 = vld [vmem:[%s10407_s0 + $0x2b0] sm:$0xff] }
 0x119   : > { %3861 = vmatmul.mubr.bf16.gmra.mrb[24].mxu1 %v6973_v23 }
 0x11a   : > { %3868 = vmatprep.mubr.bf16.mxu1 %v6974_v24 }
 0x11b   : > { %v8179_v51 = vpop.permute.xlu1 %1420  ;;  %v8181_v52 = vpop.permute.xlu0 %1415 }
 0x11c   : > { %1740 = vperm.xlu1 %6949, %v932_v27   ;;  %1735 = vperm.xlu0 %6948, %v931_v28   ;;  %v2634_v27 = vpack.c.bf16 %v2410_v8, %v2409_v10  ;;  %v607_v28 = vld [vmem:[%s10407_s0 + $0x230] sm:$0xff]  ;;  %v7003_v8 = vld [vmem:[%s7590_s16 + $0x3c4] ss:$68 sps:$4 sm:$0xff]  }
 0x11d   : > { %v2413_v48 = vmul.f32 %v8171_v35, %v607_v28  ;;  %v625_v35 = vld [vmem:[%s10407_s0 + $0x2c0] sm:$0xff]  ;;  %v615_v28 = vld [vmem:[%s10407_s0 + $0x270] sm:$0xff] }
 0x11f   : > { %v8191_v37 = vpop.permute.xlu1 %1430  ;;  %v8193_v16 = vpop.permute.xlu0 %1425 }
 0x120   : > { %1750 = vperm.xlu1 %6949, %v934_v31   ;;  %1745 = vperm.xlu0 %6948, %v933_v32  }
 0x121   : > { %3869 = vmatmul.mubr.bf16.gmra.mrb[28].mxu1 %v6976_v33  ;;  %v946_v33 = vld [vmem:[%s10408_s1 + $0x4b8] sm:$0xff] }
 0x122   : > { %3876 = vmatprep.mubr.bf16.mxu1 %v6979_v36  ;;  %v945_v36 = vld [vmem:[%s10408_s1 + $0x4b0] sm:$0xff] }
 0x123   : > { %v8201_v43 = vpop.permute.xlu1 %1440  ;;  %v8203_v44 = vpop.permute.xlu0 %1435 }
 0x124   : > { %1760 = vperm.xlu1 %6949, %v936_v17   ;;  %1755 = vperm.xlu0 %6948, %v935_v40   ;;  %v6994_v17 = vld [vmem:[%s7590_s16 + $0x2b0] ss:$68 sps:$4 sm:$0xff]  }
 0x127   : > { %v8213_v46 = vpop.permute.xlu1 %1450  ;;  %v8215_v39 = vpop.permute.xlu0 %1445 }
 0x128   : > { %1770 = vperm.xlu1 %6949, %v938_v45   ;;  %1765 = vperm.xlu0 %6948, %v937_v38   ;;  %v6997_v45 = vld [vmem:[%s7590_s16 + $0x33c] ss:$68 sps:$4 sm:$0xff]   ;;  %v2635_v38 = vpack.c.bf16 %v2412_v12, %v2411_v19 }
 0x129   : > { %3877 = vmatmul.mubr.bf16.gmra.mrb[32].mxu1 %v6982_v59  ;;  %v2414_v59 = vmul.f32 %v8169_v34, %v608_v22  ;;  %v626_v34 = vld [vmem:[%s10407_s0 + $0x2c8] sm:$0xff]  ;;  %v616_v22 = vld [vmem:[%s10407_s0 + $0x278] sm:$0xff] }
 0x12a   : > { %3884 = vmatprep.mubr.bf16.mxu1 %v6985_v60 }
 0x12b   : > { %v1461_v58 = vpop.permute.xlu1 %1460  ;;  %v1456_v62 = vpop.permute.xlu0 %1455 }
 0x12c   : > { %v2424_v61 = vmul.f32 %v1461_v58, %v618_v21  ;;  %v2423_v25 = vmul.f32 %v1456_v62, %v617_v50  ;;  %1780 = vperm.xlu1 %6949, %v940_v53   ;;  %1775 = vperm.xlu0 %6948, %v939_v54   ;;  %v610_v21 = vld [vmem:[%s10407_s0 + $0x248] sm:$0xff]  ;;  %v609_v50 = vld [vmem:[%s10407_s0 + $0x240] sm:$0xff] }
 0x12d   : > { %v2416_v58 = vmul.f32 %v8179_v51, %v610_v21  ;;  %v2415_v62 = vmul.f32 %v8181_v52, %v609_v50  ;;  %v628_v51 = vld [vmem:[%s10407_s0 + $0x2d8] sm:$0xff]  ;;  %v627_v52 = vld [vmem:[%s10407_s0 + $0x2d0] sm:$0xff]  ;;  %v956_v21 = vld [vmem:[%s10408_s1 + $0x508] sm:$0xff] }
 0x12e   : > { %v2641_v2 = vpack.c.bf16 %v2424_v61, %v2423_v25  ;;  %v955_v50 = vld [vmem:[%s10408_s1 + $0x500] sm:$0xff] }
 0x12f   : > { %v1471_v9 = vpop.permute.xlu1 %1470  ;;  %v1466_v6 = vpop.permute.xlu0 %1465 }
 0x130   : > { %v2426_v30 = vmul.f32 %v1471_v9, %v620_v41  ;;  %v2425_v4 = vmul.f32 %v1466_v6, %v619_v42  ;;  %1790 = vperm.xlu1 %6949, %v942_v26   ;;  %1785 = vperm.xlu0 %6948, %v941_v0   ;;  %v2636_v41 = vpack.c.bf16 %v2414_v59, %v2413_v48  ;;  %v611_v42 = vld [vmem:[%s10407_s0 + $0x250] sm:$0xff] }
 0x131   : > { %6288 = vmatprep.subr.bf16.mxu0 %v2641_v2  ;;  %3885 = vmatmul.mubr.bf16.gmra.mrb[36].mxu1 %v6988_v1  ;;  %v950_v1 = vld [vmem:[%s10408_s1 + $0x4d8] sm:$0xff]  ;;  %v949_v2 = vld [vmem:[%s10408_s1 + $0x4d0] sm:$0xff]  ;;  %v2637_v9 = vpack.c.bf16 %v2416_v58, %v2415_v62  ;;  %v2418_v6 = vmul.f32 %v8191_v37, %v612_v63  ;;  %v2417_v29 = vmul.f32 %v8193_v16, %v611_v42  ;;  %v630_v37 = vld [vmem:[%s10407_s0 + $0x2e8] sm:$0xff] }
 0x132   : > { %v2642_v15 = vpack.c.bf16 %v2426_v30, %v2425_v4  ;;  %6289 = vmatpush3.bf16.msra.mxu0 %v2633_v5  ;;  %3892 = vmatprep.mubr.bf16.mxu1 %v6991_v3  ;;  %v7000_v3 = vld [vmem:[%s7590_s16 + $0x338] ss:$68 sps:$4 sm:$0xff]   ;;  %v614_v30 = vld [vmem:[%s10407_s0 + $0x268] sm:$0xff]  ;;  %v613_v4 = vld [vmem:[%s10407_s0 + $0x260] sm:$0xff] }
 0x133   : > { %v1481_v23 = vpop.permute.xlu1 %1480  ;;  %v1476_v24 = vpop.permute.xlu0 %1475  ;;  %v629_v16 = vld [vmem:[%s10407_s0 + $0x2e0] sm:$0xff]  ;;  %v2420_v12 = vmul.f32 %v8201_v43, %v614_v30  ;;  %v2419_v19 = vmul.f32 %v8203_v44, %v613_v4  ;;  %v632_v43 = vld [vmem:[%s10407_s0 + $0x2f8] sm:$0xff]  ;;  %v631_v44 = vld [vmem:[%s10407_s0 + $0x2f0] sm:$0xff] }
 0x134   : > { %v2428_v31 = vmul.f32 %v1481_v23, %v622_v11  ;;  %v2427_v32 = vmul.f32 %v1476_v24, %v621_v49  ;;  %1800 = vperm.xlu1 %6949, %v944_v14   ;;  %1795 = vperm.xlu0 %6948, %v943_v20   ;;  %v952_v14 = vld [vmem:[%s10408_s1 + $0x4e8] sm:$0xff]  ;;  %v951_v20 = vld [vmem:[%s10408_s1 + $0x4e0] sm:$0xff]  ;;  %v973_v30 = vld [vmem:[%s10408_s1 + $0x590] sm:$0xff] }
 0x135   : > { %6290 = vmatprep.subr.bf16.mxu0 %v2642_v15  ;;  %v7015_v58 = vld [vmem:[%s7590_s16 + $0x9c] ss:$68 sps:$4 sm:$0xff]  }
 0x136   : > { %v2643_v40 = vpack.c.bf16 %v2428_v31, %v2427_v32  ;;  %6291 = vmatpush3.bf16.msra.mxu0 %v2634_v27  ;;  %v2638_v27 = vpack.c.bf16 %v2418_v6, %v2417_v29  ;;  %v974_v29 = vld [vmem:[%s10408_s1 + $0x598] sm:$0xff] }
 0x137   : > { %v1491_v60 = vpop.permute.xlu1 %1490  ;;  %v1486_v47 = vpop.permute.xlu0 %1485  ;;  %v7023_v4 = vld [vmem:[%s7590_s16 + $0x558] ss:$68 sps:$4 sm:$0xff]  }
 0x138   : > { %v2430_v53 = vmul.f32 %v1491_v60, %v624_v13  ;;  %v2429_v54 = vmul.f32 %v1486_v47, %v623_v18  ;;  %1810 = vperm.xlu1 %6949, %v946_v33   ;;  %1805 = vperm.xlu0 %6948, %v945_v36   ;;  %v954_v13 = vld [vmem:[%s10408_s1 + $0x4f8] sm:$0xff]  ;;  %v953_v18 = vld [vmem:[%s10408_s1 + $0x4f0] sm:$0xff]  ;;  %v7006_v33 = vld [vmem:[%s7590_s16 + $0x3c0] ss:$68 sps:$4 sm:$0xff]   ;;  %v2421_v60 = vmul.f32 %v8215_v39, %v615_v28 }
 0x139   : > { %6292 = vmatprep.subr.bf16.mxu0 %v2643_v40  ;;  %3893 = vmatmul.mubr.bf16.gmra.mrb[40].mxu1 %v6994_v17  ;;  %v7007_v17 = vld [vmem:[%s7590_s16 + $0x44c] ss:$68 sps:$4 sm:$0xff]   ;;  %v2639_v40 = vpack.c.bf16 %v2420_v12, %v2419_v19 }
 0x13a   : > { %v2644_v57 = vpack.c.bf16 %v2430_v53, %v2429_v54  ;;  %6293 = vmatpush3.bf16.msra.mxu0 %v2635_v38  ;;  %3900 = vmatprep.mubr.bf16.mxu1 %v6997_v45  ;;  %v2422_v45 = vmul.f32 %v8213_v46, %v616_v22  ;;  %v988_v19 = vld [vmem:[%s10408_s1 + $0x608] sm:$0xff]  ;;  %v987_v22 = vld [vmem:[%s10408_s1 + $0x600] sm:$0xff] }
 0x13b   : > { %v1501_v61 = vpop.permute.xlu1 %1500  ;;  %v1496_v25 = vpop.permute.xlu0 %1495 }
 0x13c   : > { %v2432_v26 = vmul.f32 %v1501_v61, %v626_v34  ;;  %v2431_v0 = vmul.f32 %v1496_v25, %v625_v35  ;;  %1820 = vperm.xlu1 %6949, %v948_v55   ;;  %1815 = vperm.xlu0 %6948, %v947_v56   ;;  %v2640_v54 = vpack.c.bf16 %v2422_v45, %v2421_v60  ;;  %v7009_v34 = vld [vmem:[%s7590_s16 + $0x10] ss:$68 sps:$4 sm:$0xff]   ;;  %v958_v35 = vld [vmem:[%s10408_s1 + $0x518] sm:$0xff]  ;;  %v7012_v56 = vld [vmem:[%s7590_s16 + $0x448] ss:$68 sps:$4 sm:$0xff]  }
 0x13d   : > { %6294 = vmatprep.subr.bf16.mxu0 %v2644_v57  ;;  %v957_v55 = vld [vmem:[%s10408_s1 + $0x510] sm:$0xff]  ;;  %v960_v61 = vld [vmem:[%s10408_s1 + $0x528] sm:$0xff]  ;;  %v959_v25 = vld [vmem:[%s10408_s1 + $0x520] sm:$0xff] }
 0x13e   : > { %v2645_v5 = vpack.c.bf16 %v2432_v26, %v2431_v0  ;;  %6295 = vmatpush3.bf16.msra.mxu0 %v2636_v41  ;;  %v7013_v57 = vld [vmem:[%s7590_s16 + $0x4d4] ss:$68 sps:$4 sm:$0xff]  }
 0x13f   : > { %v1511_v10 = vpop.permute.xlu1 %1510  ;;  %v1506_v7 = vpop.permute.xlu0 %1505  ;;  %v7018_v26 = vld [vmem:[%s7590_s16 + $0x98] ss:$68 sps:$4 sm:$0xff]  }
 0x140   : > { %v2434_v11 = vmul.f32 %v1511_v10, %v628_v51  ;;  %v2433_v49 = vmul.f32 %v1506_v7, %v627_v52  ;;  %1830 = vperm.xlu1 %6949, %v950_v1   ;;  %1825 = vperm.xlu0 %6948, %v949_v2   ;;  %v962_v0 = vld [vmem:[%s10408_s1 + $0x538] sm:$0xff]  ;;  %v961_v51 = vld [vmem:[%s10408_s1 + $0x530] sm:$0xff]  ;;  %v7021_v2 = vld [vmem:[%s7590_s16 + $0x124] ss:$68 sps:$4 sm:$0xff]  }
 0x141   : > { %6296 = vmatprep.subr.bf16.mxu0 %v2645_v5  ;;  %3901 = vmatmul.mubr.bf16.gmra.mrb[44].mxu1 %v7000_v3  ;;  %v7017_v52 = vld [vmem:[%s7590_s16 + $0x4d0] ss:$68 sps:$4 sm:$0xff]   ;;  %v7019_v1 = vld [vmem:[%s7590_s16 + $0x55c] ss:$68 sps:$4 sm:$0xff]  }
 0x142   : > { %v2646_v15 = vpack.c.bf16 %v2434_v11, %v2433_v49  ;;  %6297 = vmatpush3.bf16.msra.mxu0 %v2637_v9  ;;  %3908 = vmatprep.mubr.bf16.mxu1 %v7003_v8  ;;  %v972_v8 = vld [vmem:[%s10408_s1 + $0x588] sm:$0xff]  ;;  %v971_v9 = vld [vmem:[%s10408_s1 + $0x580] sm:$0xff] }
 0x143   : > { %v1521_v23 = vpop.permute.xlu1 %1520  ;;  %v1516_v24 = vpop.permute.xlu0 %1515  ;;  %v7024_v7 = vld [vmem:[%s7590_s16 + $0x120] ss:$68 sps:$4 sm:$0xff]   ;;  %v7025_v11 = vld [vmem:[%s7590_s16 + $0x1ac] ss:$68 sps:$4 sm:$0xff]  }
 0x144   : > { %v2436_v31 = vmul.f32 %v1521_v23, %v630_v37  ;;  %v2435_v32 = vmul.f32 %v1516_v24, %v629_v16  ;;  %1840 = vperm.xlu1 %6949, %v952_v14   ;;  %1835 = vperm.xlu0 %6948, %v951_v20   ;;  %v7029_v49 = vld [vmem:[%s7590_s16 + $0x1c] ss:$68 sps:$4 sm:$0xff]   ;;  %v1004_v14 = vld [vmem:[%s10408_s1 + $0x688] sm:$0xff]  ;;  %v7031_v24 = vld [vmem:[%s7590_s16 + $0x234] ss:$68 sps:$4 sm:$0xff]  }
 0x145   : > { %6298 = vmatprep.subr.bf16.mxu0 %v2646_v15  ;;  %v1003_v20 = vld [vmem:[%s10408_s1 + $0x680] sm:$0xff]  ;;  %v7030_v23 = vld [vmem:[%s7590_s16 + $0x1a8] ss:$68 sps:$4 sm:$0xff]  }
 0x146   : > { %v2647_v36 = vpack.c.bf16 %v2436_v31, %v2435_v32  ;;  %6299 = vmatpush3.bf16.msra.mxu0 %v2638_v27  ;;  %v634_v31 = vld [vmem:[%s10407_s0 + $0x308] sm:$0xff]  ;;  %v633_v32 = vld [vmem:[%s10407_s0 + $0x300] sm:$0xff] }
 0x147   : > { %v1531_v38 = vpop.permute.xlu1 %1530  ;;  %v1526_v59 = vpop.permute.xlu0 %1525 }
 0x148   : > { %v2438_v47 = vmul.f32 %v1531_v38, %v632_v43  ;;  %v2437_v48 = vmul.f32 %v1526_v59, %v631_v44  ;;  %1850 = vperm.xlu1 %6949, %v954_v13   ;;  %1845 = vperm.xlu0 %6948, %v953_v18   ;;  %v650_v43 = vld [vmem:[%s10407_s0 + $0x388] sm:$0xff]  ;;  %v649_v44 = vld [vmem:[%s10407_s0 + $0x380] sm:$0xff]  ;;  %v635_v38 = vld [vmem:[%s10407_s0 + $0x310] sm:$0xff] }
 0x149   : > { %6300 = vmatprep.subr.bf16.mxu0 %v2647_v36  ;;  %3909 = vmatmul.mubr.bf16.gmra.mrb[48].mxu1 %v7006_v33  ;;  %v976_v13 = vld [vmem:[%s10408_s1 + $0x5a8] sm:$0xff]  ;;  %v975_v18 = vld [vmem:[%s10408_s1 + $0x5a0] sm:$0xff] }
 0x14a   : > { %v2648_v46 = vpack.c.bf16 %v2438_v47, %v2437_v48  ;;  %6301 = vmatpush3.bf16.msra.mxu0 %v2639_v40  ;;  %3916 = vmatprep.mubr.bf16.mxu1 %v7007_v17  ;;  %v636_v17 = vld [vmem:[%s10407_s0 + $0x318] sm:$0xff]  ;;  %v7035_v48 = vld [vmem:[%s7590_s16 + $0x230] ss:$68 sps:$4 sm:$0xff]  }
 0x14b   : > { %v8391_v39 = vpop.permute.xlu1 %1540  ;;  %v8393_v53 = vpop.permute.xlu0 %1535  ;;  %v652_v47 = vld [vmem:[%s10407_s0 + $0x398] sm:$0xff] }
 0x14c   : > { %1860 = vperm.xlu1 %6949, %v956_v21   ;;  %1855 = vperm.xlu0 %6948, %v955_v50   ;;  %v2440_v33 = vmul.f32 %v8391_v39, %v634_v31  ;;  %v2439_v36 = vmul.f32 %v8393_v53, %v633_v32  ;;  %v651_v21 = vld [vmem:[%s10407_s0 + $0x390] sm:$0xff]  ;;  %v1006_v50 = vld [vmem:[%s10408_s1 + $0x698] sm:$0xff] }
 0x14d   : > { %6302 = vmatprep.subr.bf16.mxu0 %v2648_v46  ;;  %v1005_v46 = vld [vmem:[%s10408_s1 + $0x690] sm:$0xff]  ;;  %v7037_v53 = vld [vmem:[%s7590_s16 + $0x2bc] ss:$68 sps:$4 sm:$0xff]  }
 0x14e   : > { %6303 = vmatpush3.bf16.msra.mxu0 %v2640_v54  ;;  %v2649_v54 = vpack.c.bf16 %v2440_v33, %v2439_v36  ;;  %v1008_v33 = vld [vmem:[%s10408_s1 + $0x6a8] sm:$0xff]  ;;  %v1007_v36 = vld [vmem:[%s10408_s1 + $0x6a0] sm:$0xff] }
 0x14f   : > { %v8405_v62 = vpop.permute.xlu1 %1550  ;;  %v8407_v63 = vpop.permute.xlu0 %1545 }
 0x150   : > { %1870 = vperm.xlu1 %6949, %v958_v35   ;;  %1865 = vperm.xlu0 %6948, %v957_v55  }
 0x151   : > { %3917 = vmatmul.mubr.bf16.gmra.mrb[52].mxu1 %v7012_v56  ;;  %3974 = vmatmul.mubr.bf16.vlgmr.msra.gmra.mrb[24].mxu0 %v7009_v34  ;;  %v2442_v34 = vmul.f32 %v8405_v62, %v636_v17  ;;  %v2441_v56 = vmul.f32 %v8407_v63, %v635_v38  ;;  %v654_v62 = vld [vmem:[%s10407_s0 + $0x3a8] sm:$0xff]  ;;  %v653_v63 = vld [vmem:[%s10407_s0 + $0x3a0] sm:$0xff]  ;;  %v644_v38 = vld [vmem:[%s10407_s0 + $0x358] sm:$0xff] }
 0x152   : > { %3924 = vmatprep.mubr.bf16.mxu1 %v7013_v57  ;;  %3981 = vmatprep.mubr.bf16.mxu0 %v7015_v58  ;;  %v638_v57 = vld [vmem:[%s10407_s0 + $0x328] sm:$0xff]  ;;  %v637_v58 = vld [vmem:[%s10407_s0 + $0x320] sm:$0xff] }
 0x153   : > { %v8415_v41 = vpop.permute.xlu1 %1560  ;;  %v8417_v42 = vpop.permute.xlu0 %1555 }
 0x154   : > { %1880 = vperm.xlu1 %6949, %v960_v61   ;;  %1875 = vperm.xlu0 %6948, %v959_v25  }
 0x157   : > { %v8429_v3 = vpop.permute.xlu1 %1570  ;;  %v8431_v5 = vpop.permute.xlu0 %1565 }
 0x158   : > { %1890 = vperm.xlu1 %6949, %v962_v0   ;;  %1885 = vperm.xlu0 %6948, %v961_v51   ;;  %v989_v0 = vld [vmem:[%s10408_s1 + $0x610] sm:$0xff] }
 0x159   : > { %3925 = vmatmul.mubr.bf16.gmra.mrb[56].mxu1 %v7017_v52  ;;  %3982 = vmatmul.mubr.bf16.gmra.mrb[28].mxu0 %v7018_v26  ;;  %v990_v26 = vld [vmem:[%s10408_s1 + $0x618] sm:$0xff]  ;;  %v2444_v52 = vmul.f32 %v8415_v41, %v638_v57 }
 0x15a   : > { %3932 = vmatprep.mubr.bf16.mxu1 %v7019_v1  ;;  %3989 = vmatprep.mubr.bf16.mxu0 %v7021_v2  ;;  %v2443_v1 = vmul.f32 %v8417_v42, %v637_v58  ;;  %v640_v2 = vld [vmem:[%s10407_s0 + $0x338] sm:$0xff] }
 0x15b   : > { %v8439_v6 = vpop.permute.xlu1 %1580  ;;  %v8441_v10 = vpop.permute.xlu0 %1575  ;;  %v656_v41 = vld [vmem:[%s10407_s0 + $0x3b8] sm:$0xff] }
 0x15c   : > { %1940 = vperm.xlu1 %6949, %v972_v8   ;;  %1935 = vperm.xlu0 %6948, %v971_v9   ;;  %v7041_v42 = vld [vmem:[%s7590_s16 + $0x2b8] ss:$68 sps:$4 sm:$0xff]  }
 0x15f   : > { %v8453_v37 = vpop.permute.xlu1 %1590  ;;  %v8455_v16 = vpop.permute.xlu0 %1585 }
 0x160   : > { %1950 = vperm.xlu1 %6949, %v974_v29   ;;  %1945 = vperm.xlu0 %6948, %v973_v30   ;;  %v639_v29 = vld [vmem:[%s10407_s0 + $0x330] sm:$0xff] }
 0x161   : > { %3933 = vmatmul.mubr.bf16.gmra.mrb[60].mxu1 %v7023_v4  ;;  %3990 = vmatmul.mubr.bf16.gmra.mrb[32].mxu0 %v7024_v7  ;;  %v2650_v7 = vpack.c.bf16 %v2442_v34, %v2441_v56  ;;  %v2445_v32 = vmul.f32 %v8431_v5, %v639_v29  ;;  %v657_v5 = vld [vmem:[%s10407_s0 + $0x3c0] sm:$0xff]  ;;  %v7049_v34 = vld [vmem:[%s7590_s16 + $0x3cc] ss:$68 sps:$4 sm:$0xff]  }
 0x162   : > { %3997 = vmatprep.mubr.bf16.mxu0 %v7025_v11  ;;  %4094 = vmatprep.mubr.bf16.mxu1 %v7029_v49  ;;  %v655_v11 = vld [vmem:[%s10407_s0 + $0x3b0] sm:$0xff]  ;;  %v978_v49 = vld [vmem:[%s10408_s1 + $0x5b8] sm:$0xff] }
 0x163   : > { %v8463_v15 = vpop.permute.xlu1 %1600  ;;  %v8465_v12 = vpop.permute.xlu0 %1595  ;;  %v647_v29 = vld [vmem:[%s10407_s0 + $0x370] sm:$0xff] }
 0x164   : > { %2100 = vperm.xlu1 %6949, %v1004_v14   ;;  %2095 = vperm.xlu0 %6948, %v1003_v20   ;;  %v977_v14 = vld [vmem:[%s10408_s1 + $0x5b0] sm:$0xff] }
 0x167   : > { %v8475_v27 = vpop.permute.xlu1 %1610  ;;  %v8477_v28 = vpop.permute.xlu0 %1605 }
 0x168   : > { %2020 = vperm.xlu1 %6949, %v988_v19   ;;  %2015 = vperm.xlu0 %6948, %v987_v22   ;;  %v7043_v19 = vld [vmem:[%s7590_s16 + $0x344] ss:$68 sps:$4 sm:$0xff]   ;;  %v2651_v22 = vpack.c.bf16 %v2444_v52, %v2443_v1 }
 0x169   : > { %3998 = vmatmul.mubr.bf16.gmra.mrb[36].mxu0 %v7030_v23  ;;  %v2446_v23 = vmul.f32 %v8429_v3, %v640_v2  ;;  %v658_v3 = vld [vmem:[%s10407_s0 + $0x3c8] sm:$0xff]  ;;  %v648_v2 = vld [vmem:[%s10407_s0 + $0x378] sm:$0xff] }
 0x16a   : > { %4005 = vmatprep.mubr.bf16.mxu0 %v7031_v24 }
 0x16b   : > { %v1621_v40 = vpop.permute.xlu1 %1620  ;;  %v1616_v45 = vpop.permute.xlu0 %1615 }
 0x16c   : > { %v2456_v59 = vmul.f32 %v1621_v40, %v650_v43  ;;  %v2455_v60 = vmul.f32 %v1616_v45, %v649_v44  ;;  %1960 = vperm.xlu1 %6949, %v976_v13   ;;  %1955 = vperm.xlu0 %6948, %v975_v18   ;;  %v642_v43 = vld [vmem:[%s10407_s0 + $0x348] sm:$0xff]  ;;  %v641_v44 = vld [vmem:[%s10407_s0 + $0x340] sm:$0xff] }
 0x16d   : > { %v2448_v40 = vmul.f32 %v8439_v6, %v642_v43  ;;  %v2447_v45 = vmul.f32 %v8441_v10, %v641_v44  ;;  %v660_v6 = vld [vmem:[%s10407_s0 + $0x3d8] sm:$0xff]  ;;  %v7047_v10 = vld [vmem:[%s7590_s16 + $0x340] ss:$68 sps:$4 sm:$0xff]   ;;  %v1009_v44 = vld [vmem:[%s10408_s1 + $0x6b0] sm:$0xff] }
 0x16e   : > { %v2657_v39 = vpack.c.bf16 %v2456_v59, %v2455_v60  ;;  %v1010_v43 = vld [vmem:[%s10408_s1 + $0x6b8] sm:$0xff] }
 0x16f   : > { %v1631_v35 = vpop.permute.xlu1 %1630  ;;  %v1626_v55 = vpop.permute.xlu0 %1625 }
 0x170   : > { %v2458_v61 = vmul.f32 %v1631_v35, %v652_v47  ;;  %v2457_v25 = vmul.f32 %v1626_v55, %v651_v21  ;;  %2110 = vperm.xlu1 %6949, %v1006_v50   ;;  %2105 = vperm.xlu0 %6948, %v1005_v46   ;;  %v2652_v47 = vpack.c.bf16 %v2446_v23, %v2445_v32  ;;  %v659_v46 = vld [vmem:[%s10407_s0 + $0x3d0] sm:$0xff] }
 0x171   : > { %6370 = vmatprep.subr.bf16.mxu1 %v2657_v39  ;;  %4006 = vmatmul.mubr.bf16.gmra.mrb[40].mxu0 %v7035_v48  ;;  %v643_v48 = vld [vmem:[%s10407_s0 + $0x350] sm:$0xff]  ;;  %v992_v39 = vld [vmem:[%s10408_s1 + $0x628] sm:$0xff]  ;;  %v2653_v35 = vpack.c.bf16 %v2448_v40, %v2447_v45  ;;  %v2450_v55 = vmul.f32 %v8453_v37, %v644_v38  ;;  %v7061_v40 = vld [vmem:[%s7590_s16 + $0x4dc] ss:$68 sps:$4 sm:$0xff]  }
 0x172   : > { %v2658_v51 = vpack.c.bf16 %v2458_v61, %v2457_v25  ;;  %6371 = vmatpush3.bf16.msra.mxu1 %v2649_v54  ;;  %4013 = vmatprep.mubr.bf16.mxu0 %v7037_v53  ;;  %v991_v53 = vld [vmem:[%s10408_s1 + $0x620] sm:$0xff]  ;;  %v2449_v58 = vmul.f32 %v8455_v16, %v643_v48  ;;  %v646_v61 = vld [vmem:[%s10407_s0 + $0x368] sm:$0xff] }
 0x173   : > { %v1641_v8 = vpop.permute.xlu1 %1640  ;;  %v1636_v9 = vpop.permute.xlu0 %1635  ;;  %v645_v25 = vld [vmem:[%s10407_s0 + $0x360] sm:$0xff]  ;;  %v662_v37 = vld [vmem:[%s10407_s0 + $0x3e8] sm:$0xff]  ;;  %v2452_v52 = vmul.f32 %v8463_v15, %v646_v61  ;;  %v664_v15 = vld [vmem:[%s10407_s0 + $0x3f8] sm:$0xff] }
 0x174   : > { %v2460_v30 = vmul.f32 %v1641_v8, %v654_v62  ;;  %v2459_v4 = vmul.f32 %v1636_v9, %v653_v63  ;;  %2030 = vperm.xlu1 %6949, %v990_v26   ;;  %2025 = vperm.xlu0 %6948, %v989_v0   ;;  %v661_v16 = vld [vmem:[%s10407_s0 + $0x3e0] sm:$0xff]  ;;  %v980_v26 = vld [vmem:[%s10408_s1 + $0x5c8] sm:$0xff]  ;;  %v2451_v1 = vmul.f32 %v8465_v12, %v645_v25 }
 0x175   : > { %6372 = vmatprep.subr.bf16.mxu1 %v2658_v51  ;;  %v979_v0 = vld [vmem:[%s10408_s1 + $0x5c0] sm:$0xff]  ;;  %v7053_v12 = vld [vmem:[%s7590_s16 + $0x3c8] ss:$68 sps:$4 sm:$0xff]  }
 0x176   : > { %v2659_v20 = vpack.c.bf16 %v2460_v30, %v2459_v4  ;;  %6373 = vmatpush3.bf16.msra.mxu1 %v2650_v7  ;;  %v2654_v7 = vpack.c.bf16 %v2450_v55, %v2449_v58  ;;  %v996_v58 = vld [vmem:[%s10408_s1 + $0x648] sm:$0xff]  ;;  %v995_v61 = vld [vmem:[%s10408_s1 + $0x640] sm:$0xff] }
 0x177   : > { %v1651_v24 = vpop.permute.xlu1 %1650  ;;  %v1646_v31 = vpop.permute.xlu0 %1645  ;;  %v7071_v25 = vld [vmem:[%s7590_s16 + $0x560] ss:$68 sps:$4 sm:$0xff]  }
 0x178   : > { %v2462_v13 = vmul.f32 %v1651_v24, %v656_v41  ;;  %v2461_v18 = vmul.f32 %v1646_v31, %v655_v11  ;;  %1970 = vperm.xlu1 %6949, %v978_v49   ;;  %1965 = vperm.xlu0 %6948, %v977_v14   ;;  %v663_v41 = vld [vmem:[%s10407_s0 + $0x3f0] sm:$0xff]  ;;  %v963_v11 = vld [vmem:[%s10408_s1 + $0x540] sm:$0xff]  ;;  %v2453_v24 = vmul.f32 %v8477_v28, %v647_v29 }
 0x179   : > { %6374 = vmatprep.subr.bf16.mxu1 %v2659_v20  ;;  %4014 = vmatmul.mubr.bf16.gmra.mrb[44].mxu0 %v7041_v42  ;;  %v964_v42 = vld [vmem:[%s10408_s1 + $0x548] sm:$0xff]  ;;  %v7055_v14 = vld [vmem:[%s7590_s16 + $0x454] ss:$68 sps:$4 sm:$0xff]   ;;  %v2655_v20 = vpack.c.bf16 %v2452_v52, %v2451_v1 }
 0x17a   : > { %v2660_v17 = vpack.c.bf16 %v2462_v13, %v2461_v18  ;;  %6375 = vmatpush3.bf16.msra.mxu1 %v2651_v22  ;;  %4021 = vmatprep.mubr.bf16.mxu0 %v7043_v19  ;;  %v2454_v19 = vmul.f32 %v8475_v27, %v648_v2  ;;  %v968_v2 = vld [vmem:[%s10408_s1 + $0x568] sm:$0xff] }
 0x17b   : > { %v1661_v59 = vpop.permute.xlu1 %1660  ;;  %v1656_v60 = vpop.permute.xlu0 %1655 }
 0x17c   : > { %v2464_v21 = vmul.f32 %v1661_v59, %v658_v3  ;;  %v2463_v50 = vmul.f32 %v1656_v60, %v657_v5  ;;  %2120 = vperm.xlu1 %6949, %v1008_v33   ;;  %2115 = vperm.xlu0 %6948, %v1007_v36   ;;  %v2656_v18 = vpack.c.bf16 %v2454_v19, %v2453_v24  ;;  %v7027_v3 = vld [vmem:[%s7590_s16 + $0x18] ss:$68 sps:$4 sm:$0xff]   ;;  %v993_v33 = vld [vmem:[%s10408_s1 + $0x630] sm:$0xff]  ;;  %v681_v19 = vld [vmem:[%s10407_s0 + $0x480] sm:$0xff] }
 0x17d   : > { %6376 = vmatprep.subr.bf16.mxu1 %v2660_v17  ;;  %v994_v5 = vld [vmem:[%s10408_s1 + $0x638] sm:$0xff]  ;;  %v7059_v36 = vld [vmem:[%s7590_s16 + $0x450] ss:$68 sps:$4 sm:$0xff]   ;;  %v7033_v17 = vld [vmem:[%s7590_s16 + $0xa4] ss:$68 sps:$4 sm:$0xff]  }
 0x17e   : > { %v2661_v54 = vpack.c.bf16 %v2464_v21, %v2463_v50  ;;  %6377 = vmatpush3.bf16.msra.mxu1 %v2652_v47  ;;  %v982_v59 = vld [vmem:[%s10408_s1 + $0x5d8] sm:$0xff]  ;;  %v981_v60 = vld [vmem:[%s10408_s1 + $0x5d0] sm:$0xff]  ;;  %v7036_v21 = vld [vmem:[%s7590_s16 + $0xa0] ss:$68 sps:$4 sm:$0xff]  }
 0x17f   : > { %v1671_v56 = vpop.permute.xlu1 %1670  ;;  %v1666_v57 = vpop.permute.xlu0 %1665  ;;  %v966_v50 = vld [vmem:[%s10408_s1 + $0x558] sm:$0xff] }
 0x180   : > { %v2466_v62 = vmul.f32 %v1671_v56, %v660_v6  ;;  %v2465_v63 = vmul.f32 %v1666_v57, %v659_v46  ;;  %2040 = vperm.xlu1 %6949, %v992_v39   ;;  %2035 = vperm.xlu0 %6948, %v991_v53   ;;  %v965_v6 = vld [vmem:[%s10408_s1 + $0x550] sm:$0xff]  ;;  %v7067_v39 = vld [vmem:[%s7590_s16 + $0x564] ss:$68 sps:$4 sm:$0xff]  }
 0x181   : > { %6378 = vmatprep.subr.bf16.mxu1 %v2661_v54  ;;  %4022 = vmatmul.mubr.bf16.gmra.mrb[48].mxu0 %v7047_v10  ;;  %v7065_v10 = vld [vmem:[%s7590_s16 + $0x4d8] ss:$68 sps:$4 sm:$0xff]   ;;  %v7039_v46 = vld [vmem:[%s7590_s16 + $0x12c] ss:$68 sps:$4 sm:$0xff]  }
 0x182   : > { %v2662_v51 = vpack.c.bf16 %v2466_v62, %v2465_v63  ;;  %6379 = vmatpush3.bf16.msra.mxu1 %v2653_v35  ;;  %4029 = vmatprep.mubr.bf16.mxu0 %v7049_v34  ;;  %v1012_v34 = vld [vmem:[%s10408_s1 + $0x6c8] sm:$0xff]  ;;  %v1011_v35 = vld [vmem:[%s10408_s1 + $0x6c0] sm:$0xff]  ;;  %v7045_v62 = vld [vmem:[%s7590_s16 + $0x1b4] ss:$68 sps:$4 sm:$0xff]  }
 0x183   : > { %v1681_v8 = vpop.permute.xlu1 %1680  ;;  %v1676_v9 = vpop.permute.xlu0 %1675  ;;  %v7042_v57 = vld [vmem:[%s7590_s16 + $0x128] ss:$68 sps:$4 sm:$0xff]  }
 0x184   : > { %v2468_v30 = vmul.f32 %v1681_v8, %v662_v37  ;;  %v2467_v4 = vmul.f32 %v1676_v9, %v661_v16  ;;  %1980 = vperm.xlu1 %6949, %v980_v26   ;;  %1975 = vperm.xlu0 %6948, %v979_v0   ;;  %v7077_v63 = vld [vmem:[%s7590_s16 + $0x24] ss:$68 sps:$4 sm:$0xff]   ;;  %v7048_v9 = vld [vmem:[%s7590_s16 + $0x1b0] ss:$68 sps:$4 sm:$0xff]  }
 0x185   : > { %6380 = vmatprep.subr.bf16.mxu1 %v2662_v51  ;;  %v984_v26 = vld [vmem:[%s10408_s1 + $0x5e8] sm:$0xff]  ;;  %v983_v0 = vld [vmem:[%s10408_s1 + $0x5e0] sm:$0xff] }
 0x186   : > { %v2663_v49 = vpack.c.bf16 %v2468_v30, %v2467_v4  ;;  %6381 = vmatpush3.bf16.msra.mxu1 %v2654_v7  ;;  %v967_v8 = vld [vmem:[%s10408_s1 + $0x560] sm:$0xff] }
 0x187   : > { %v1691_v22 = vpop.permute.xlu1 %1690  ;;  %v1686_v23 = vpop.permute.xlu0 %1685  ;;  %v7051_v30 = vld [vmem:[%s7590_s16 + $0x23c] ss:$68 sps:$4 sm:$0xff]  }
 0x188   : > { %v2470_v31 = vmul.f32 %v1691_v22, %v664_v15  ;;  %v2469_v32 = vmul.f32 %v1686_v23, %v663_v41  ;;  %1900 = vperm.xlu1 %6949, %v964_v42   ;;  %1895 = vperm.xlu0 %6948, %v963_v11   ;;  %v666_v42 = vld [vmem:[%s10407_s0 + $0x408] sm:$0xff]  ;;  %v665_v11 = vld [vmem:[%s10407_s0 + $0x400] sm:$0xff]  ;;  %v1014_v22 = vld [vmem:[%s10408_s1 + $0x6d8] sm:$0xff] }
 0x189   : > { %6382 = vmatprep.subr.bf16.mxu1 %v2663_v49  ;;  %4030 = vmatmul.mubr.bf16.gmra.mrb[52].mxu0 %v7053_v12  ;;  %v682_v49 = vld [vmem:[%s10407_s0 + $0x488] sm:$0xff]  ;;  %v1013_v23 = vld [vmem:[%s10408_s1 + $0x6d0] sm:$0xff] }
 0x18a   : > { %v2664_v27 = vpack.c.bf16 %v2470_v31, %v2469_v32  ;;  %6383 = vmatpush3.bf16.msra.mxu1 %v2655_v20  ;;  %4037 = vmatprep.mubr.bf16.mxu0 %v7055_v14 }
 0x18b   : > { %v8653_v28 = vpop.permute.xlu1 %1700  ;;  %v8655_v13 = vpop.permute.xlu0 %1695 }
 0x18c   : > { %2130 = vperm.xlu1 %6949, %v1010_v43   ;;  %2125 = vperm.xlu0 %6948, %v1009_v44   ;;  %v2472_v31 = vmul.f32 %v8653_v28, %v666_v42  ;;  %v2471_v32 = vmul.f32 %v8655_v13, %v665_v11  ;;  %v668_v43 = vld [vmem:[%s10407_s0 + $0x418] sm:$0xff] }
 0x18d   : > { %6384 = vmatprep.subr.bf16.mxu1 %v2664_v27  ;;  %v684_v28 = vld [vmem:[%s10407_s0 + $0x498] sm:$0xff] }
 0x18e   : > { %6385 = vmatpush3.bf16.msra.mxu1 %v2656_v18  ;;  %v667_v18 = vld [vmem:[%s10407_s0 + $0x410] sm:$0xff]  ;;  %v7054_v13 = vld [vmem:[%s7590_s16 + $0x238] ss:$68 sps:$4 sm:$0xff]  }
 0x18f   : > { %v8667_v45 = vpop.permute.xlu1 %1710  ;;  %v8669_v38 = vpop.permute.xlu0 %1705  ;;  %v672_v11 = vld [vmem:[%s10407_s0 + $0x438] sm:$0xff] }
 0x190   : > { %2050 = vperm.xlu1 %6949, %v994_v5   ;;  %2045 = vperm.xlu0 %6948, %v993_v33  }
 0x191   : > { %4095 = vmatmul.mubr.bf16.vlgmr.msra.gmra.mrb[64].mxu1 %v7027_v3  ;;  %4038 = vmatmul.mubr.bf16.gmra.mrb[56].mxu0 %v7059_v36 }
 0x192   : > { %4102 = vmatprep.mubr.bf16.mxu1 %v7033_v17  ;;  %4045 = vmatprep.mubr.bf16.mxu0 %v7061_v40  ;;  %v683_v17 = vld [vmem:[%s10407_s0 + $0x490] sm:$0xff]  ;;  %v998_v40 = vld [vmem:[%s10408_s1 + $0x658] sm:$0xff] }
 0x193   : > { %v8677_v47 = vpop.permute.xlu1 %1720  ;;  %v8679_v48 = vpop.permute.xlu0 %1715 }
 0x194   : > { %1990 = vperm.xlu1 %6949, %v982_v59   ;;  %1985 = vperm.xlu0 %6948, %v981_v60   ;;  %v997_v59 = vld [vmem:[%s10408_s1 + $0x650] sm:$0xff] }
 0x197   : > { %v8691_v53 = vpop.permute.xlu1 %1730  ;;  %v8693_v54 = vpop.permute.xlu0 %1725 }
 0x198   : > { %1910 = vperm.xlu1 %6949, %v966_v50   ;;  %1905 = vperm.xlu0 %6948, %v965_v6   ;;  %v7057_v6 = vld [vmem:[%s7590_s16 + $0x2c4] ss:$68 sps:$4 sm:$0xff]  }
 0x199   : > { %4103 = vmatmul.mubr.bf16.gmra.mrb[68].mxu1 %v7036_v21  ;;  %4046 = vmatmul.mubr.bf16.gmra.mrb[60].mxu0 %v7065_v10 }
 0x19a   : > { %4110 = vmatprep.mubr.bf16.mxu1 %v7039_v46  ;;  %4053 = vmatprep.mubr.bf16.mxu0 %v7067_v39  ;;  %v2665_v39 = vpack.c.bf16 %v2472_v31, %v2471_v32 }
 0x19b   : > { %v8701_v55 = vpop.permute.xlu1 %1740  ;;  %v8703_v56 = vpop.permute.xlu0 %1735 }
 0x19c   : > { %2140 = vperm.xlu1 %6949, %v1012_v34   ;;  %2135 = vperm.xlu0 %6948, %v1011_v35   ;;  %v2474_v34 = vmul.f32 %v8667_v45, %v668_v43  ;;  %v686_v45 = vld [vmem:[%s10407_s0 + $0x4a8] sm:$0xff] }
 0x19f   : > { %v8715_v37 = vpop.permute.xlu1 %1750  ;;  %v8717_v16 = vpop.permute.xlu0 %1745 }
 0x1a0   : > { %2060 = vperm.xlu1 %6949, %v996_v58   ;;  %2055 = vperm.xlu0 %6948, %v995_v61   ;;  %v2473_v58 = vmul.f32 %v8669_v38, %v667_v18  ;;  %v670_v61 = vld [vmem:[%s10407_s0 + $0x428] sm:$0xff]  ;;  %v685_v38 = vld [vmem:[%s10407_s0 + $0x4a0] sm:$0xff]  ;;  %v970_v18 = vld [vmem:[%s10408_s1 + $0x578] sm:$0xff] }
 0x1a1   : > { %4111 = vmatmul.mubr.bf16.gmra.mrb[72].mxu1 %v7042_v57  ;;  %4054 = vmatmul.mubr.bf16.gmra.mrb[64].mxu0 %v7071_v25  ;;  %v669_v25 = vld [vmem:[%s10407_s0 + $0x420] sm:$0xff] }
 0x1a2   : > { %4118 = vmatprep.mubr.bf16.mxu1 %v7045_v62  ;;  %4215 = vmatprep.mubr.bf16.mxu0 %v7077_v63  ;;  %v2475_v42 = vmul.f32 %v8679_v48, %v669_v25  ;;  %v7060_v48 = vld [vmem:[%s7590_s16 + $0x2c0] ss:$68 sps:$4 sm:$0xff]  }
 0x1a3   : > { %v8725_v51 = vpop.permute.xlu1 %1760  ;;  %v8727_v52 = vpop.permute.xlu0 %1755 }
 0x1a4   : > { %2000 = vperm.xlu1 %6949, %v984_v26   ;;  %1995 = vperm.xlu0 %6948, %v983_v0   ;;  %v8729_v1 = vpop.f32.mrb[0].mxu1  ;;  %v8740_v29 = vpop.f32.mrb[0].mxu0 }
 0x1a5   : > { %v8738_v7 = vpop.f32.mrb[1].mxu1  ;;  %v8745_v15 = vpop.f32.mrb[1].mxu0 }
 0x1a6   : > { %v8743_v4 = vpop.f32.mrb[2].mxu1  ;;  %v8762_v20 = vpop.f32.mrb[2].mxu0 }
 0x1a7   : > { %v8747_v12 = vpop.permute.xlu1 %1770  ;;  %v8749_v41 = vpop.permute.xlu0 %1765 }
 0x1a8   : > { %1920 = vperm.xlu1 %6949, %v968_v2   ;;  %1915 = vperm.xlu0 %6948, %v967_v8   ;;  %v8760_v14 = vpop.f32.mrb[3].mxu1  ;;  %v8773_v24 = vpop.f32.mrb[3].mxu0  ;;  %v986_v2 = vld [vmem:[%s10408_s1 + $0x5f8] sm:$0xff]  ;;  %v985_v8 = vld [vmem:[%s10408_s1 + $0x5f0] sm:$0xff] }
 0x1a9   : > { %4119 = vmatmul.mubr.bf16.gmra.mrb[76].mxu1 %v7048_v9 }
 0x1aa   : > { %4126 = vmatprep.mubr.bf16.mxu1 %v7051_v30  ;;  %v2476_v30 = vmul.f32 %v8677_v47, %v670_v61  ;;  %v688_v47 = vld [vmem:[%s10407_s0 + $0x4b8] sm:$0xff] }
 0x1ab   : > { %v1781_v44 = vpop.permute.xlu1 %1780  ;;  %v1776_v27 = vpop.permute.xlu0 %1775 }
 0x1ac   : > { %v2488_v3 = vmul.f32 %v1781_v44, %v682_v49  ;;  %v2487_v5 = vmul.f32 %v1776_v27, %v681_v19  ;;  %2150 = vperm.xlu1 %6949, %v1014_v22   ;;  %2145 = vperm.xlu0 %6948, %v1013_v23   ;;  %v8787_v33 = vpop.f32.mrb[4].mxu1  ;;  %v8789_v36 = vpop.f32.mrb[4].mxu0  ;;  %v2666_v22 = vpack.c.bf16 %v2474_v34, %v2473_v58  ;;  %v671_v23 = vld [vmem:[%s10407_s0 + $0x430] sm:$0xff]  ;;  %v673_v58 = vld [vmem:[%s10407_s0 + $0x440] sm:$0xff] }
 0x1ad   : > { %v8800_v60 = vpop.f32.mrb[5].mxu1  ;;  %v8802_v21 = vpop.f32.mrb[5].mxu0  ;;  %v687_v27 = vld [vmem:[%s10407_s0 + $0x4b0] sm:$0xff] }
 0x1ae   : > { %v2673_v50 = vpack.c.bf16 %v2488_v3, %v2487_v5  ;;  %v8805_v10 = vpop.f32.mrb[6].mxu1  ;;  %v8807_v46 = vpop.f32.mrb[6].mxu0  ;;  %v969_v3 = vld [vmem:[%s10408_s1 + $0x570] sm:$0xff] }
 0x1af   : > { %v1791_v35 = vpop.permute.xlu1 %1790  ;;  %v1786_v57 = vpop.permute.xlu0 %1785 }
 0x1b0   : > { %v2490_v62 = vmul.f32 %v1791_v35, %v684_v28  ;;  %v2489_v63 = vmul.f32 %v1786_v57, %v683_v17  ;;  %2070 = vperm.xlu1 %6949, %v998_v40   ;;  %2065 = vperm.xlu0 %6948, %v997_v59   ;;  %v8820_v26 = vpop.f32.mrb[7].mxu1  ;;  %v8822_v0 = vpop.f32.mrb[7].mxu0  ;;  %v7063_v17 = vld [vmem:[%s7590_s16 + $0x34c] ss:$68 sps:$4 sm:$0xff]   ;;  %v2477_v35 = vmul.f32 %v8693_v54, %v671_v23  ;;  %v689_v54 = vld [vmem:[%s10407_s0 + $0x4c0] sm:$0xff] }
 0x1b1   : > { %4127 = vmatmul.mubr.bf16.gmra.mrb[80].mxu1 %v7054_v13  ;;  %6452 = vmatprep.subr.bf16.mxu0 %v2673_v50  ;;  %v2667_v50 = vpack.c.bf16 %v2476_v30, %v2475_v42  ;;  %v674_v57 = vld [vmem:[%s10407_s0 + $0x448] sm:$0xff]  ;;  %v676_v30 = vld [vmem:[%s10407_s0 + $0x458] sm:$0xff] }
 0x1b2   : > { %v2674_v9 = vpack.c.bf16 %v2490_v62, %v2489_v63  ;;  %6453 = vmatpush3.bf16.msra.mxu0 %v2665_v39  ;;  %4134 = vmatprep.mubr.bf16.mxu1 %v7057_v6  ;;  %v2478_v6 = vmul.f32 %v8691_v53, %v672_v11  ;;  %v690_v53 = vld [vmem:[%s10407_s0 + $0x4c8] sm:$0xff] }
 0x1b3   : > { %v1801_v49 = vpop.permute.xlu1 %1800  ;;  %v1796_v19 = vpop.permute.xlu0 %1795 }
 0x1b4   : > { %v2492_v31 = vmul.f32 %v1801_v49, %v686_v45  ;;  %v2491_v32 = vmul.f32 %v1796_v19, %v685_v38  ;;  %2010 = vperm.xlu1 %6949, %v986_v2   ;;  %2005 = vperm.xlu0 %6948, %v985_v8   ;;  %v8845_v43 = vpop.f32.mrb[8].mxu1  ;;  %v8847_v44 = vpop.f32.mrb[8].mxu0  ;;  %v1016_v45 = vld [vmem:[%s10408_s1 + $0x6e8] sm:$0xff]  ;;  %v1015_v38 = vld [vmem:[%s10408_s1 + $0x6e0] sm:$0xff]  ;;  %v2480_v8 = vmul.f32 %v8701_v55, %v674_v57  ;;  %v675_v19 = vld [vmem:[%s10407_s0 + $0x450] sm:$0xff] }
 0x1b5   : > { %6454 = vmatprep.subr.bf16.mxu0 %v2674_v9  ;;  %v8858_v5 = vpop.f32.mrb[9].mxu1  ;;  %v8860_v28 = vpop.f32.mrb[9].mxu0  ;;  %v2479_v9 = vmul.f32 %v8703_v56, %v673_v58  ;;  %v2668_v49 = vpack.c.bf16 %v2478_v6, %v2477_v35  ;;  %v692_v55 = vld [vmem:[%s10407_s0 + $0x4d8] sm:$0xff]  ;;  %v7066_v56 = vld [vmem:[%s7590_s16 + $0x348] ss:$68 sps:$4 sm:$0xff]   ;;  %v8927_v6 = vadd.f32 %v8760_v14, %v8743_v4  ;;  %v2482_v57 = vmul.f32 %v8715_v37, %v676_v30 }
 0x1b6   : > { %v2675_v13 = vpack.c.bf16 %v2492_v31, %v2491_v32  ;;  %6455 = vmatpush3.bf16.msra.mxu0 %v2666_v22  ;;  %v8863_v40 = vpop.f32.mrb[10].mxu1  ;;  %v8865_v59 = vpop.f32.mrb[10].mxu0  ;;  %v694_v37 = vld [vmem:[%s10407_s0 + $0x4e8] sm:$0xff] }
 0x1b7   : > { %v1811_v39 = vpop.permute.xlu1 %1810  ;;  %v1806_v34 = vpop.permute.xlu0 %1805  ;;  %v2669_v35 = vpack.c.bf16 %v2480_v8, %v2479_v9  ;;  %v8957_v8 = vadd.f32 %v8800_v60, %v8787_v33  ;;  %v8961_v9 = vadd.f32 %v8820_v26, %v8805_v10  ;;  %v679_v33 = vld [vmem:[%s10407_s0 + $0x470] sm:$0xff] }
 0x1b8   : > { %v2494_v61 = vmul.f32 %v1811_v39, %v688_v47  ;;  %v2493_v25 = vmul.f32 %v1806_v34, %v687_v27  ;;  %1930 = vperm.xlu1 %6949, %v970_v18   ;;  %1925 = vperm.xlu0 %6948, %v969_v3   ;;  %v8878_v62 = vpop.f32.mrb[11].mxu1  ;;  %v8880_v63 = vpop.f32.mrb[11].mxu0  ;;  %v691_v47 = vld [vmem:[%s10407_s0 + $0x4d0] sm:$0xff]  ;;  %v999_v27 = vld [vmem:[%s10408_s1 + $0x660] sm:$0xff] }
 0x1b9   : > { %4135 = vmatmul.mubr.bf16.gmra.mrb[84].mxu1 %v7060_v48  ;;  %6456 = vmatprep.subr.bf16.mxu0 %v2675_v13  ;;  %v1000_v48 = vld [vmem:[%s10408_s1 + $0x668] sm:$0xff]  ;;  %v695_v26 = vld [vmem:[%s10407_s0 + $0x4f0] sm:$0xff] }
 0x1ba   : > { %v2676_v2 = vpack.c.bf16 %v2494_v61, %v2493_v25  ;;  %6457 = vmatpush3.bf16.msra.mxu0 %v2667_v50  ;;  %4142 = vmatprep.mubr.bf16.mxu1 %v7063_v17  ;;  %v7069_v17 = vld [vmem:[%s7590_s16 + $0x3d4] ss:$68 sps:$4 sm:$0xff]   ;;  %v8923_v50 = vadd.f32 %v8738_v7, %v8729_v1  ;;  %v2481_v25 = vmul.f32 %v8717_v16, %v675_v19  ;;  %v678_v1 = vld [vmem:[%s10407_s0 + $0x468] sm:$0xff]  ;;  %v677_v7 = vld [vmem:[%s10407_s0 + $0x460] sm:$0xff] }
 0x1bb   : > { %v1821_v42 = vpop.permute.xlu1 %1820  ;;  %v1816_v11 = vpop.permute.xlu0 %1815  ;;  %v693_v16 = vld [vmem:[%s10407_s0 + $0x4e0] sm:$0xff]  ;;  %v2484_v30 = vmul.f32 %v8725_v51, %v678_v1  ;;  %v696_v51 = vld [vmem:[%s10407_s0 + $0x4f8] sm:$0xff] }
 0x1bc   : > { %v2496_v22 = vmul.f32 %v1821_v42, %v690_v53  ;;  %v2495_v23 = vmul.f32 %v1816_v11, %v689_v54  ;;  %2160 = vperm.xlu1 %6949, %v1016_v45   ;;  %2155 = vperm.xlu0 %6948, %v1015_v38   ;;  %v8903_v31 = vpop.f32.mrb[12].mxu1  ;;  %v8905_v32 = vpop.f32.mrb[12].mxu0  ;;  %v1018_v45 = vld [vmem:[%s10408_s1 + $0x6f8] sm:$0xff]  ;;  %v1017_v38 = vld [vmem:[%s10408_s1 + $0x6f0] sm:$0xff]  ;;  %v2483_v42 = vmul.f32 %v8727_v52, %v677_v7 }
 0x1bd   : > { %6458 = vmatprep.subr.bf16.mxu0 %v2676_v2  ;;  %v8916_v18 = vpop.f32.mrb[13].mxu1  ;;  %v8918_v3 = vpop.f32.mrb[13].mxu0  ;;  %v680_v11 = vld [vmem:[%s10407_s0 + $0x478] sm:$0xff]  ;;  %v7072_v52 = vld [vmem:[%s7590_s16 + $0x3d0] ss:$68 sps:$4 sm:$0xff]  }
 0x1be   : > { %v2677_v13 = vpack.c.bf16 %v2496_v22, %v2495_v23  ;;  %6459 = vmatpush3.bf16.msra.mxu0 %v2668_v49  ;;  %v8929_v39 = vpop.f32.mrb[14].mxu1  ;;  %v8931_v34 = vpop.f32.mrb[14].mxu0  ;;  %v2670_v22 = vpack.c.bf16 %v2482_v57, %v2481_v25  ;;  %v8999_v57 = vadd.f32 %v8878_v62, %v8863_v40  ;;  %v1036_v40 = vld [vmem:[%s10408_s1 + $0x788] sm:$0xff] }
 0x1bf   : > { %v1831_v58 = vpop.permute.xlu1 %1830  ;;  %v1826_v61 = vpop.permute.xlu0 %1825 }
 0x1c0   : > { %v2498_v4 = vmul.f32 %v1831_v58, %v692_v55  ;;  %v2497_v14 = vmul.f32 %v1826_v61, %v691_v47  ;;  %2080 = vperm.xlu1 %6949, %v1000_v48   ;;  %2075 = vperm.xlu0 %6948, %v999_v27   ;;  %v6198_v53 = vpop.f32.mrb[15].mxu1  ;;  %v8944_v54 = vpop.f32.mrb[15].mxu0  ;;  %v1002_v55 = vld [vmem:[%s10408_s1 + $0x678] sm:$0xff]  ;;  %v8986_v48 = vadd.f32 %v8745_v15, %v8740_v29 }
 0x1c1   : > { %4143 = vmatmul.mubr.bf16.gmra.mrb[88].mxu1 %v7066_v56  ;;  %6460 = vmatprep.subr.bf16.mxu0 %v2677_v13  ;;  %v1001_v56 = vld [vmem:[%s10408_s1 + $0x670] sm:$0xff]  ;;  %v8990_v27 = vadd.f32 %v8773_v24, %v8762_v20  ;;  %v2671_v29 = vpack.c.bf16 %v2484_v30, %v2483_v42  ;;  %v2486_v15 = vmul.f32 %v8747_v12, %v680_v11  ;;  %v1035_v12 = vld [vmem:[%s10408_s1 + $0x780] sm:$0xff] }
 0x1c2   : > { %v2678_v2 = vpack.c.bf16 %v2498_v4, %v2497_v14  ;;  %6461 = vmatpush3.bf16.msra.mxu0 %v2669_v35  ;;  %4150 = vmatprep.mubr.bf16.mxu1 %v7069_v17  ;;  %v7073_v17 = vld [vmem:[%s7590_s16 + $0x45c] ss:$68 sps:$4 sm:$0xff]   ;;  %v8995_v35 = vadd.f32 %v8858_v5, %v8845_v43  ;;  %v2485_v24 = vmul.f32 %v8749_v41, %v679_v33  ;;  %v7079_v42 = vld [vmem:[%s7590_s16 + $0x4e4] ss:$68 sps:$4 sm:$0xff]   ;;  %v7081_v11 = vld [vmem:[%s7590_s16 + $0xac] ss:$68 sps:$4 sm:$0xff]  }
 0x1c3   : > { %v1841_v49 = vpop.permute.xlu1 %1840  ;;  %v1836_v19 = vpop.permute.xlu0 %1835  ;;  %v9017_v4 = vadd.f32 %v8916_v18, %v8903_v31  ;;  %v9020_v14 = vadd.f32 %v6198_v53, %v8929_v39  ;;  %v1020_v31 = vld [vmem:[%s10408_s1 + $0x708] sm:$0xff]  ;;  %v1019_v18 = vld [vmem:[%s10408_s1 + $0x700] sm:$0xff]  ;;  %v7078_v39 = vld [vmem:[%s7590_s16 + $0x458] ss:$68 sps:$4 sm:$0xff]   ;;  %v9038_v53 = vadd.f32 %v8802_v21, %v8789_v36  ;;  %v9042_v30 = vadd.f32 %v8822_v0, %v8807_v46 }
 0x1c4   : > { %v2500_v60 = vmul.f32 %v1841_v49, %v694_v37  ;;  %v2499_v23 = vmul.f32 %v1836_v19, %v693_v16  ;;  %2170 = vperm.xlu1 %6949, %v1018_v45   ;;  %2165 = vperm.xlu0 %6948, %v1017_v38   ;;  %v6200_v10 = vpop.f32.mrb[16].mxu1  ;;  %v2672_v38 = vpack.c.bf16 %v2486_v15, %v2485_v24  ;;  %v1038_v21 = vld [vmem:[%s10408_s1 + $0x798] sm:$0xff]  ;;  %v1037_v46 = vld [vmem:[%s10408_s1 + $0x790] sm:$0xff] }
 0x1c5   : > { %6462 = vmatprep.subr.bf16.mxu0 %v2678_v2  ;;  %v6201_v47 = vpop.f32.mrb[17].mxu1  ;;  %v7075_v2 = vld [vmem:[%s7590_s16 + $0x20] ss:$68 sps:$4 sm:$0xff]  }
 0x1c6   : > { %v2679_v13 = vpack.c.bf16 %v2500_v60, %v2499_v23  ;;  %6463 = vmatpush3.bf16.msra.mxu0 %v2670_v22  ;;  %v6203_v58 = vpop.f32.mrb[18].mxu1  ;;  %v9001_v61 = vpop.f32.mrb[16].mxu0  ;;  %v9046_v49 = vadd.f32 %v6201_v47, %v6200_v10  ;;  %v9082_v47 = vadd.f32 %v8860_v28, %v8847_v44  ;;  %v713_v44 = vld [vmem:[%s10407_s0 + $0x580] sm:$0xff]  ;;  %v1040_v28 = vld [vmem:[%s10408_s1 + $0x7a8] sm:$0xff] }
 0x1c7   : > { %v1851_v25 = vpop.permute.xlu1 %1850  ;;  %v1846_v20 = vpop.permute.xlu0 %1845 }
 0x1c8   : > { %v2502_v1 = vmul.f32 %v1851_v25, %v696_v51  ;;  %v2501_v7 = vmul.f32 %v1846_v20, %v695_v26  ;;  %2090 = vperm.xlu1 %6949, %v1002_v55   ;;  %2085 = vperm.xlu0 %6948, %v1001_v56   ;;  %v6204_v43 = vpop.f32.mrb[19].mxu1  ;;  %v9005_v5 = vpop.f32.mrb[17].mxu0  ;;  %v1022_v26 = vld [vmem:[%s10408_s1 + $0x718] sm:$0xff]  ;;  %v1021_v55 = vld [vmem:[%s10408_s1 + $0x710] sm:$0xff]  ;;  %v7084_v56 = vld [vmem:[%s7590_s16 + $0xa8] ss:$68 sps:$4 sm:$0xff]  }
 0x1c9   : > { %4151 = vmatmul.mubr.bf16.gmra.mrb[92].mxu1 %v7072_v52  ;;  %6464 = vmatprep.subr.bf16.mxu0 %v2679_v13  ;;  %v9013_v62 = vpop.f32.mrb[18].mxu0  ;;  %v9048_v19 = vadd.f32 %v6204_v43, %v6203_v58  ;;  %v7083_v52 = vld [vmem:[%s7590_s16 + $0x4e0] ss:$68 sps:$4 sm:$0xff]   ;;  %v9086_v13 = vadd.f32 %v8880_v63, %v8865_v59  ;;  %v7087_v58 = vld [vmem:[%s7590_s16 + $0x134] ss:$68 sps:$4 sm:$0xff]   ;;  %v714_v25 = vld [vmem:[%s10407_s0 + $0x588] sm:$0xff] }
 0x1ca   : > { %v2680_v41 = vpack.c.bf16 %v2502_v1, %v2501_v7  ;;  %6465 = vmatpush3.bf16.msra.mxu0 %v2671_v29  ;;  %4158 = vmatprep.mubr.bf16.mxu1 %v7073_v17  ;;  %v9022_v37 = vpop.f32.mrb[19].mxu0  ;;  %v7085_v17 = vld [vmem:[%s7590_s16 + $0x56c] ss:$68 sps:$4 sm:$0xff]   ;;  %v1039_v59 = vld [vmem:[%s10408_s1 + $0x7a0] sm:$0xff] }
 0x1cb   : > { %v9024_v16 = vpop.permute.xlu1 %1860  ;;  %v9026_v45 = vpop.permute.xlu0 %1855  ;;  %v698_v63 = vld [vmem:[%s10407_s0 + $0x508] sm:$0xff]  ;;  %v697_v20 = vld [vmem:[%s10407_s0 + $0x500] sm:$0xff] }
 0x1cc   : > { %2260 = vperm.xlu1 %6949, %v1036_v40   ;;  %2255 = vperm.xlu0 %6948, %v1035_v12   ;;  %v716_v40 = vld [vmem:[%s10407_s0 + $0x598] sm:$0xff]  ;;  %v7089_v12 = vld [vmem:[%s7590_s16 + $0x568] ss:$68 sps:$4 sm:$0xff]  }
 0x1cd   : > { %6466 = vmatprep.subr.bf16.mxu0 %v2680_v41  ;;  %v7090_v41 = vld [vmem:[%s7590_s16 + $0x130] ss:$68 sps:$4 sm:$0xff]  }
 0x1ce   : > { %6467 = vmatpush3.bf16.msra.mxu0 %v2672_v38  ;;  %v9054_v36 = vpop.f32.mrb[20].mxu0  ;;  %v2504_v38 = vmul.f32 %v9024_v16, %v698_v63  ;;  %v9134_v16 = vadd.f32 %v8944_v54, %v8931_v34 }
 0x1cf   : > { %v9050_v22 = vpop.permute.xlu1 %1870  ;;  %v9052_v33 = vpop.permute.xlu0 %1865 }
 0x1d0   : > { %2180 = vperm.xlu1 %6949, %v1020_v31   ;;  %2175 = vperm.xlu0 %6948, %v1019_v18   ;;  %v9062_v0 = vpop.f32.mrb[21].mxu0  ;;  %v715_v31 = vld [vmem:[%s10407_s0 + $0x590] sm:$0xff]  ;;  %v1024_v18 = vld [vmem:[%s10408_s1 + $0x728] sm:$0xff] }
 0x1d1   : > { %4159 = vmatmul.mubr.bf16.gmra.mrb[96].mxu1 %v7078_v39  ;;  %4216 = vmatmul.mubr.bf16.vlgmr.msra.gmra.mrb[68].mxu0 %v7075_v2  ;;  %v9064_v60 = vpop.f32.mrb[22].mxu0  ;;  %v2503_v2 = vmul.f32 %v9026_v45, %v697_v20  ;;  %v1023_v39 = vld [vmem:[%s10408_s1 + $0x720] sm:$0xff]  ;;  %v700_v45 = vld [vmem:[%s10407_s0 + $0x518] sm:$0xff]  ;;  %v730_v20 = vld [vmem:[%s10407_s0 + $0x608] sm:$0xff] }
 0x1d2   : > { %4166 = vmatprep.mubr.bf16.mxu1 %v7079_v42  ;;  %4223 = vmatprep.mubr.bf16.mxu0 %v7081_v11  ;;  %v9071_v10 = vpop.f32.mrb[23].mxu0  ;;  %v9130_v42 = vadd.f32 %v8918_v3, %v8905_v32  ;;  %v699_v11 = vld [vmem:[%s10407_s0 + $0x510] sm:$0xff]  ;;  %v746_v3 = vld [vmem:[%s10407_s0 + $0x688] sm:$0xff]  ;;  %v2506_v54 = vmul.f32 %v9050_v22, %v700_v45 }
 0x1d3   : > { %v9066_v23 = vpop.permute.xlu1 %1880  ;;  %v9068_v51 = vpop.permute.xlu0 %1875  ;;  %v2681_v34 = vpack.c.bf16 %v2504_v38, %v2503_v2  ;;  %v9173_v38 = vadd.f32 %v9005_v5, %v9001_v61  ;;  %v9177_v2 = vadd.f32 %v9022_v37, %v9013_v62  ;;  %v701_v61 = vld [vmem:[%s10407_s0 + $0x520] sm:$0xff]  ;;  %v718_v62 = vld [vmem:[%s10407_s0 + $0x5a8] sm:$0xff] }
 0x1d4   : > { %2270 = vperm.xlu1 %6949, %v1038_v21   ;;  %2265 = vperm.xlu0 %6948, %v1037_v46   ;;  %v7091_v46 = vld [vmem:[%s7590_s16 + $0x1bc] ss:$68 sps:$4 sm:$0xff]  }
 0x1d7   : > { %v9090_v29 = vpop.permute.xlu1 %1890  ;;  %v9092_v15 = vpop.permute.xlu0 %1885 }
 0x1d8   : > { %2190 = vperm.xlu1 %6949, %v1022_v26   ;;  %2185 = vperm.xlu0 %6948, %v1021_v55   ;;  %v7117_v55 = vld [vmem:[%s7590_s16 + $0x2c] ss:$68 sps:$4 sm:$0xff]  }
 0x1d9   : > { %4167 = vmatmul.mubr.bf16.gmra.mrb[100].mxu1 %v7083_v52  ;;  %4224 = vmatmul.mubr.bf16.gmra.mrb[72].mxu0 %v7084_v56 }
 0x1da   : > { %4174 = vmatprep.mubr.bf16.mxu1 %v7085_v17  ;;  %4231 = vmatprep.mubr.bf16.mxu0 %v7087_v58  ;;  %v2505_v17 = vmul.f32 %v9052_v33, %v699_v11  ;;  %v745_v58 = vld [vmem:[%s10407_s0 + $0x680] sm:$0xff] }
 0x1db   : > { %v1941_v24 = vpop.permute.xlu1 %1940  ;;  %v1936_v1 = vpop.permute.xlu0 %1935 }
 0x1dc   : > { %v2520_v7 = vmul.f32 %v1941_v24, %v714_v25  ;;  %v2519_v43 = vmul.f32 %v1936_v1, %v713_v44  ;;  %2280 = vperm.xlu1 %6949, %v1040_v28   ;;  %2275 = vperm.xlu0 %6948, %v1039_v59   ;;  %v1042_v25 = vld [vmem:[%s10408_s1 + $0x7b8] sm:$0xff]  ;;  %v1041_v44 = vld [vmem:[%s10408_s1 + $0x7b0] sm:$0xff]  ;;  %v729_v24 = vld [vmem:[%s10407_s0 + $0x600] sm:$0xff] }
 0x1de   : > { %v2689_v21 = vpack.c.bf16 %v2520_v7, %v2519_v43  ;;  %v2682_v7 = vpack.c.bf16 %v2506_v54, %v2505_v17  ;;  %v1026_v43 = vld [vmem:[%s10408_s1 + $0x738] sm:$0xff]  ;;  %v2507_v17 = vmul.f32 %v9068_v51, %v701_v61  ;;  %v1028_v51 = vld [vmem:[%s10408_s1 + $0x748] sm:$0xff] }
 0x1df   : > { %v1951_v52 = vpop.permute.xlu1 %1950  ;;  %v1946_v26 = vpop.permute.xlu0 %1945 }
 0x1e0   : > { %v2522_v56 = vmul.f32 %v1951_v52, %v716_v40  ;;  %v2521_v32 = vmul.f32 %v1946_v26, %v715_v31  ;;  %2200 = vperm.xlu1 %6949, %v1024_v18   ;;  %2195 = vperm.xlu0 %6948, %v1023_v39   ;;  %v1025_v40 = vld [vmem:[%s10408_s1 + $0x730] sm:$0xff]  ;;  %v7094_v18 = vld [vmem:[%s7590_s16 + $0x244] ss:$68 sps:$4 sm:$0xff]  }
 0x1e1   : > { %4175 = vmatmul.mubr.bf16.gmra.mrb[104].mxu1 %v7089_v12  ;;  %4232 = vmatmul.mubr.bf16.gmra.mrb[76].mxu0 %v7090_v41  ;;  %v7093_v12 = vld [vmem:[%s7590_s16 + $0x1b8] ss:$68 sps:$4 sm:$0xff]  }
 0x1e2   : > { %v2690_v28 = vpack.c.bf16 %v2522_v56, %v2521_v32  ;;  %6534 = vmatprep.subr.bf16.mxu1 %v2689_v21  ;;  %4239 = vmatprep.mubr.bf16.mxu0 %v7091_v46  ;;  %v702_v46 = vld [vmem:[%s10407_s0 + $0x528] sm:$0xff]  ;;  %v1043_v32 = vld [vmem:[%s10408_s1 + $0x7c0] sm:$0xff] }
 0x1e3   : > { %6535 = vmatpush3.bf16.msra.mxu1 %v2681_v34  ;;  %v2101_v22 = vpop.permute.xlu1 %2100  ;;  %v2096_v33 = vpop.permute.xlu0 %2095  ;;  %4336 = vmatprep.mubr.bf16.mxu1 %v7117_v55  ;;  %v717_v55 = vld [vmem:[%s10407_s0 + $0x5a0] sm:$0xff]  ;;  %v1044_v56 = vld [vmem:[%s10408_s1 + $0x7c8] sm:$0xff]  ;;  %v2508_v54 = vmul.f32 %v9066_v23, %v702_v46 }
 0x1e4   : > { %v2552_v59 = vmul.f32 %v2101_v22, %v746_v3  ;;  %v2551_v63 = vmul.f32 %v2096_v33, %v745_v58  ;;  %2290 = vperm.xlu1 %6949, %v1042_v25   ;;  %2285 = vperm.xlu0 %6948, %v1041_v44   ;;  %v6222_v1 = vpop.f32.mrb[20].mxu1  ;;  %v7096_v33 = vld [vmem:[%s7590_s16 + $0x240] ss:$68 sps:$4 sm:$0xff]  }
 0x1e5   : > { %6536 = vmatprep.subr.bf16.mxu1 %v2690_v28  ;;  %v6223_v41 = vpop.f32.mrb[21].mxu1 }
 0x1e6   : > { %v2705_v31 = vpack.c.bf16 %v2552_v59, %v2551_v63  ;;  %v6224_v39 = vadd.f32 %v6223_v41, %v6222_v1  ;;  %v6225_v45 = vpop.f32.mrb[22].mxu1  ;;  %v9225_v63 = vadd.f32 %v9071_v10, %v9064_v60  ;;  %v731_v60 = vld [vmem:[%s10407_s0 + $0x610] sm:$0xff]  ;;  %v1046_v10 = vld [vmem:[%s10408_s1 + $0x7d8] sm:$0xff] }
 0x1e7   : > { %6537 = vmatpush3.bf16.msra.mxu1 %v2682_v7  ;;  %v2021_v11 = vpop.permute.xlu1 %2020  ;;  %v2016_v21 = vpop.permute.xlu0 %2015 }
 0x1e8   : > { %v2536_v5 = vmul.f32 %v2021_v11, %v730_v20  ;;  %v2535_v52 = vmul.f32 %v2016_v21, %v729_v24  ;;  %2210 = vperm.xlu1 %6949, %v1026_v43   ;;  %2205 = vperm.xlu0 %6948, %v1025_v40   ;;  %v6226_v37 = vpop.f32.mrb[23].mxu1  ;;  %v9190_v26 = vadd.f32 %v6224_v39, %v8986_v48  ;;  %v7097_v24 = vld [vmem:[%s7590_s16 + $0x2cc] ss:$68 sps:$4 sm:$0xff]  }
 0x1e9   : > { %4240 = vmatmul.mubr.bf16.gmra.mrb[80].mxu0 %v7093_v12  ;;  %6616 = vmatprep.subr.bf16.mxu0 %v2705_v31  ;;  %v6227_v3 = vadd.f32 %v6226_v37, %v6225_v45  ;;  %v9203_v48 = vadd.f32 %v9062_v0, %v9054_v36  ;;  %v748_v36 = vld [vmem:[%s10407_s0 + $0x698] sm:$0xff]  ;;  %v747_v0 = vld [vmem:[%s10407_s0 + $0x690] sm:$0xff]  ;;  %v2683_v43 = vpack.c.bf16 %v2508_v54, %v2507_v17  ;;  %v7099_v54 = vld [vmem:[%s7590_s16 + $0x2c8] ss:$68 sps:$4 sm:$0xff]  }
 0x1ea   : > { %v2697_v34 = vpack.c.bf16 %v2536_v5, %v2535_v52  ;;  %4247 = vmatprep.mubr.bf16.mxu0 %v7094_v18  ;;  %v732_v18 = vld [vmem:[%s10407_s0 + $0x618] sm:$0xff]  ;;  %v1045_v11 = vld [vmem:[%s10408_s1 + $0x7d0] sm:$0xff] }
 0x1eb   : > { %v1961_v58 = vpop.permute.xlu1 %1960  ;;  %v1956_v25 = vpop.permute.xlu0 %1955  ;;  %v9208_v44 = vadd.f32 %v6227_v3, %v8990_v27  ;;  %v1027_v27 = vld [vmem:[%s10408_s1 + $0x740] sm:$0xff] }
 0x1ec   : > { %v2524_v28 = vmul.f32 %v1961_v58, %v718_v62  ;;  %v2523_v22 = vmul.f32 %v1956_v25, %v717_v55  ;;  %2300 = vperm.xlu1 %6949, %v1044_v56   ;;  %2295 = vperm.xlu0 %6948, %v1043_v32   ;;  %v6228_v23 = vpop.f32.mrb[24].mxu1  ;;  %v703_v62 = vld [vmem:[%s10407_s0 + $0x530] sm:$0xff]  ;;  %v720_v56 = vld [vmem:[%s10407_s0 + $0x5b8] sm:$0xff] }
 0x1ed   : > { %6617 = vmatpush3.bf16.msra.mxu0 %v2697_v34  ;;  %v6229_v59 = vpop.f32.mrb[25].mxu1  ;;  %v719_v32 = vld [vmem:[%s10407_s0 + $0x5b0] sm:$0xff] }
 0x1ee   : > { %v2691_v20 = vpack.c.bf16 %v2524_v28, %v2523_v22  ;;  %v6230_v1 = vadd.f32 %v6229_v59, %v6228_v23  ;;  %v6231_v7 = vpop.f32.mrb[26].mxu1  ;;  %v1029_v34 = vld [vmem:[%s10408_s1 + $0x750] sm:$0xff]  ;;  %v750_v59 = vld [vmem:[%s10407_s0 + $0x6a8] sm:$0xff] }
 0x1ef   : > { %v2111_v40 = vpop.permute.xlu1 %2110  ;;  %v2106_v12 = vpop.permute.xlu0 %2105  ;;  %v7100_v25 = vld [vmem:[%s7590_s16 + $0x354] ss:$68 sps:$4 sm:$0xff]  }
 0x1f0   : > { %v2554_v41 = vmul.f32 %v2111_v40, %v748_v36  ;;  %v2553_v31 = vmul.f32 %v2106_v12, %v747_v0  ;;  %2220 = vperm.xlu1 %6949, %v1028_v51   ;;  %2215 = vperm.xlu0 %6948, %v1027_v27   ;;  %v6232_v39 = vpop.f32.mrb[27].mxu1  ;;  %v9232_v45 = vadd.f32 %v6230_v1, %v9038_v53  ;;  %v704_v53 = vld [vmem:[%s10407_s0 + $0x538] sm:$0xff]  ;;  %v1047_v1 = vld [vmem:[%s10408_s1 + $0x7e0] sm:$0xff] }
 0x1f1   : > { %4248 = vmatmul.mubr.bf16.gmra.mrb[84].mxu0 %v7096_v33  ;;  %6538 = vmatprep.subr.bf16.mxu1 %v2691_v20  ;;  %v6233_v21 = vadd.f32 %v6232_v39, %v6231_v7  ;;  %v2510_v36 = vmul.f32 %v9090_v29, %v704_v53  ;;  %v2509_v0 = vmul.f32 %v9092_v15, %v703_v62  ;;  %v749_v29 = vld [vmem:[%s10407_s0 + $0x6a0] sm:$0xff]  ;;  %v1048_v15 = vld [vmem:[%s10408_s1 + $0x7e8] sm:$0xff] }
 0x1f2   : > { %v2706_v46 = vpack.c.bf16 %v2554_v41, %v2553_v31  ;;  %6539 = vmatpush3.bf16.msra.mxu1 %v2683_v43  ;;  %4255 = vmatprep.mubr.bf16.mxu0 %v7097_v24  ;;  %v734_v39 = vld [vmem:[%s10407_s0 + $0x628] sm:$0xff] }
 0x1f3   : > { %v2031_v61 = vpop.permute.xlu1 %2030  ;;  %v2026_v5 = vpop.permute.xlu0 %2025  ;;  %v9247_v52 = vadd.f32 %v6233_v21, %v9042_v30  ;;  %v1030_v30 = vld [vmem:[%s10408_s1 + $0x758] sm:$0xff]  ;;  %v2684_v41 = vpack.c.bf16 %v2510_v36, %v2509_v0  ;;  %v7102_v21 = vld [vmem:[%s7590_s16 + $0x350] ss:$68 sps:$4 sm:$0xff]  }
 0x1f4   : > { %v2538_v37 = vmul.f32 %v2031_v61, %v732_v18  ;;  %v2537_v55 = vmul.f32 %v2026_v5, %v731_v60  ;;  %2310 = vperm.xlu1 %6949, %v1046_v10   ;;  %2305 = vperm.xlu0 %6948, %v1045_v11   ;;  %v6234_v3 = vpop.f32.mrb[28].mxu1  ;;  %v733_v60 = vld [vmem:[%s10407_s0 + $0x620] sm:$0xff] }
 0x1f5   : > { %6618 = vmatprep.subr.bf16.mxu0 %v2706_v46  ;;  %v6235_v17 = vpop.f32.mrb[29].mxu1  ;;  %v1031_v11 = vld [vmem:[%s10408_s1 + $0x760] sm:$0xff] }
 0x1f6   : > { %v2698_v58 = vpack.c.bf16 %v2538_v37, %v2537_v55  ;;  %v6236_v28 = vadd.f32 %v6235_v17, %v6234_v3  ;;  %v6237_v22 = vpop.f32.mrb[30].mxu1  ;;  %v7103_v61 = vld [vmem:[%s7590_s16 + $0x3dc] ss:$68 sps:$4 sm:$0xff]   ;;  %v722_v3 = vld [vmem:[%s10407_s0 + $0x5c8] sm:$0xff] }
 0x1f7   : > { %v1971_v23 = vpop.permute.xlu1 %1970  ;;  %v1966_v51 = vpop.permute.xlu0 %1965  ;;  %v1050_v17 = vld [vmem:[%s10408_s1 + $0x7f8] sm:$0xff] }
 0x1f8   : > { %v2526_v27 = vmul.f32 %v1971_v23, %v720_v56  ;;  %v2525_v33 = vmul.f32 %v1966_v51, %v719_v32  ;;  %2230 = vperm.xlu1 %6949, %v1030_v30   ;;  %2225 = vperm.xlu0 %6948, %v1029_v34   ;;  %v6238_v20 = vpop.f32.mrb[31].mxu1  ;;  %v9272_v24 = vadd.f32 %v6236_v28, %v9082_v47  ;;  %v706_v51 = vld [vmem:[%s10407_s0 + $0x548] sm:$0xff] }
 0x1f9   : > { %4256 = vmatmul.mubr.bf16.gmra.mrb[88].mxu0 %v7099_v54  ;;  %v6239_v7 = vadd.f32 %v6238_v20, %v6237_v22  ;;  %v721_v54 = vld [vmem:[%s10407_s0 + $0x5c0] sm:$0xff]  ;;  %v7105_v20 = vld [vmem:[%s7590_s16 + $0x3d8] ss:$68 sps:$4 sm:$0xff]  }
 0x1fa   : > { %v2692_v43 = vpack.c.bf16 %v2526_v27, %v2525_v33  ;;  %6619 = vmatpush3.bf16.msra.mxu0 %v2698_v58  ;;  %4263 = vmatprep.mubr.bf16.mxu0 %v7100_v25  ;;  %v1049_v58 = vld [vmem:[%s10408_s1 + $0x7f0] sm:$0xff]  ;;  %v705_v27 = vld [vmem:[%s10407_s0 + $0x540] sm:$0xff] }
 0x1fb   : > { %v2121_v47 = vpop.permute.xlu1 %2120  ;;  %v2116_v40 = vpop.permute.xlu0 %2115  ;;  %v9284_v12 = vadd.f32 %v6239_v7, %v9086_v13  ;;  %v1032_v13 = vld [vmem:[%s10408_s1 + $0x768] sm:$0xff] }
 0x1fc   : > { %v2556_v31 = vmul.f32 %v2121_v47, %v750_v59  ;;  %v2555_v18 = vmul.f32 %v2116_v40, %v749_v29  ;;  %2320 = vperm.xlu1 %6949, %v1048_v15   ;;  %2315 = vperm.xlu0 %6948, %v1047_v1   ;;  %v6240_v10 = vpop.f32.mrb[32].mxu1  ;;  %v1034_v59 = vld [vmem:[%s10408_s1 + $0x778] sm:$0xff]  ;;  %v7106_v1 = vld [vmem:[%s7590_s16 + $0x464] ss:$68 sps:$4 sm:$0xff]  }
 0x1fd   : > { %6540 = vmatprep.subr.bf16.mxu1 %v2692_v43  ;;  %v6241_v46 = vpop.f32.mrb[33].mxu1 }
 0x1fe   : > { %v2707_v53 = vpack.c.bf16 %v2556_v31, %v2555_v18  ;;  %6541 = vmatpush3.bf16.msra.mxu1 %v2684_v41  ;;  %v6242_v5 = vadd.f32 %v6241_v46, %v6240_v10  ;;  %v6243_v62 = vpop.f32.mrb[34].mxu1  ;;  %v752_v18 = vld [vmem:[%s10407_s0 + $0x6b8] sm:$0xff]  ;;  %v751_v10 = vld [vmem:[%s10407_s0 + $0x6b0] sm:$0xff] }
 0x1ff   : > { %v2041_v37 = vpop.permute.xlu1 %2040  ;;  %v2036_v55 = vpop.permute.xlu0 %2035 }
 0x200   : > { %v2540_v56 = vmul.f32 %v2041_v37, %v734_v39  ;;  %v2539_v32 = vmul.f32 %v2036_v55, %v733_v60  ;;  %2240 = vperm.xlu1 %6949, %v1032_v13   ;;  %2235 = vperm.xlu0 %6948, %v1031_v11   ;;  %v6244_v30 = vpop.f32.mrb[35].mxu1  ;;  %v9304_v34 = vadd.f32 %v6242_v5, %v9130_v42  ;;  %v1052_v13 = vld [vmem:[%s10408_s1 + $0x808] sm:$0xff]  ;;  %v1051_v11 = vld [vmem:[%s10408_s1 + $0x800] sm:$0xff]  ;;  %v736_v55 = vld [vmem:[%s10407_s0 + $0x638] sm:$0xff] }
 0x201   : > { %4264 = vmatmul.mubr.bf16.gmra.mrb[92].mxu0 %v7102_v21  ;;  %6620 = vmatprep.subr.bf16.mxu0 %v2707_v53  ;;  %v6245_v25 = vadd.f32 %v6244_v30, %v6243_v62 }
 0x202   : > { %v2699_v28 = vpack.c.bf16 %v2540_v56, %v2539_v32  ;;  %4271 = vmatprep.mubr.bf16.mxu0 %v7103_v61  ;;  %v735_v56 = vld [vmem:[%s10407_s0 + $0x630] sm:$0xff]  ;;  %v7108_v32 = vld [vmem:[%s7590_s16 + $0x460] ss:$68 sps:$4 sm:$0xff]  }
 0x203   : > { %v1981_v42 = vpop.permute.xlu1 %1980  ;;  %v1976_v22 = vpop.permute.xlu0 %1975  ;;  %v9316_v36 = vadd.f32 %v6245_v25, %v9134_v16  ;;  %v1033_v16 = vld [vmem:[%s10408_s1 + $0x770] sm:$0xff] }
 0x204   : > { %v2528_v0 = vmul.f32 %v1981_v42, %v722_v3  ;;  %v2527_v23 = vmul.f32 %v1976_v22, %v721_v54  ;;  %2330 = vperm.xlu1 %6949, %v1050_v17   ;;  %2325 = vperm.xlu0 %6948, %v1049_v58   ;;  %v6246_v33 = vpop.f32.mrb[36].mxu1  ;;  %v7109_v54 = vld [vmem:[%s7590_s16 + $0x4ec] ss:$68 sps:$4 sm:$0xff]  }
 0x205   : > { %6621 = vmatpush3.bf16.msra.mxu0 %v2699_v28  ;;  %v6247_v29 = vpop.f32.mrb[37].mxu1 }
 0x206   : > { %v2693_v15 = vpack.c.bf16 %v2528_v0, %v2527_v23  ;;  %v6248_v7 = vadd.f32 %v6247_v29, %v6246_v33  ;;  %v6249_v43 = vpop.f32.mrb[38].mxu1  ;;  %v724_v23 = vld [vmem:[%s10407_s0 + $0x5d8] sm:$0xff] }
 0x207   : > { %v1901_v47 = vpop.permute.xlu1 %1900  ;;  %v1896_v40 = vpop.permute.xlu0 %1895 }
 0x208   : > { %v2512_v41 = vmul.f32 %v1901_v47, %v706_v51  ;;  %v2511_v31 = vmul.f32 %v1896_v40, %v705_v27  ;;  %2250 = vperm.xlu1 %6949, %v1034_v59   ;;  %2245 = vperm.xlu0 %6948, %v1033_v16   ;;  %v6250_v39 = vpop.f32.mrb[39].mxu1  ;;  %v9336_v60 = vadd.f32 %v6248_v7, %v9173_v38  ;;  %v723_v51 = vld [vmem:[%s10407_s0 + $0x5d0] sm:$0xff] }
 0x209   : > { %4272 = vmatmul.mubr.bf16.gmra.mrb[96].mxu0 %v7105_v20  ;;  %6542 = vmatprep.subr.bf16.mxu1 %v2693_v15  ;;  %v6251_v21 = vadd.f32 %v6250_v39, %v6249_v43  ;;  %v707_v7 = vld [vmem:[%s10407_s0 + $0x550] sm:$0xff]  ;;  %v7111_v43 = vld [vmem:[%s7590_s16 + $0x4e8] ss:$68 sps:$4 sm:$0xff]  }
 0x20a   : > { %v2685_v46 = vpack.c.bf16 %v2512_v41, %v2511_v31  ;;  %4279 = vmatprep.mubr.bf16.mxu0 %v7106_v1  ;;  %v708_v1 = vld [vmem:[%s10407_s0 + $0x558] sm:$0xff] }
 0x20b   : > { %v2131_v38 = vpop.permute.xlu1 %2130  ;;  %v2126_v53 = vpop.permute.xlu0 %2125  ;;  %v9348_v61 = vadd.f32 %v6251_v21, %v9177_v2  ;;  %v7112_v41 = vld [vmem:[%s7590_s16 + $0x574] ss:$68 sps:$4 sm:$0xff]  }
 0x20c   : > { %v2558_v5 = vmul.f32 %v2131_v38, %v752_v18  ;;  %v2557_v62 = vmul.f32 %v2126_v53, %v751_v10  ;;  %2340 = vperm.xlu1 %6949, %v1052_v13   ;;  %2335 = vperm.xlu0 %6948, %v1051_v11   ;;  %v6252_v37 = vpop.f32.mrb[40].mxu1  ;;  %v753_v38 = vld [vmem:[%s10407_s0 + $0x6c0] sm:$0xff] }
 0x20d   : > { %6543 = vmatpush3.bf16.msra.mxu1 %v2685_v46  ;;  %v6253_v3 = vpop.f32.mrb[41].mxu1  ;;  %v754_v46 = vld [vmem:[%s10407_s0 + $0x6c8] sm:$0xff] }
 0x20e   : > { %v2708_v30 = vpack.c.bf16 %v2558_v5, %v2557_v62  ;;  %v6254_v2 = vadd.f32 %v6253_v3, %v6252_v37  ;;  %v6255_v17 = vpop.f32.mrb[42].mxu1  ;;  %v738_v3 = vld [vmem:[%s10407_s0 + $0x648] sm:$0xff] }
 0x20f   : > { %v2051_v58 = vpop.permute.xlu1 %2050  ;;  %v2046_v25 = vpop.permute.xlu0 %2045 }
 0x210   : > { %v2542_v28 = vmul.f32 %v2051_v58, %v736_v55  ;;  %v2541_v42 = vmul.f32 %v2046_v25, %v735_v56  ;;  %6622 = vmatprep.subr.bf16.mxu0 %v2708_v30  ;;  %v6256_v22 = vpop.f32.mrb[43].mxu1  ;;  %v9359_v0 = vadd.f32 %v6254_v2, %v9203_v48  ;;  %v737_v30 = vld [vmem:[%s10407_s0 + $0x640] sm:$0xff]  ;;  %v7125_v58 = vld [vmem:[%s7590_s16 + $0x34] ss:$68 sps:$4 sm:$0xff]  }
 0x211   : > { %4280 = vmatmul.mubr.bf16.gmra.mrb[100].mxu0 %v7108_v32  ;;  %v6257_v27 = vadd.f32 %v6256_v22, %v6255_v17 }
 0x212   : > { %v2700_v33 = vpack.c.bf16 %v2542_v28, %v2541_v42  ;;  %4287 = vmatprep.mubr.bf16.mxu0 %v7109_v54  ;;  %v7114_v54 = vld [vmem:[%s7590_s16 + $0x570] ss:$68 sps:$4 sm:$0xff]  }
 0x213   : > { %v1991_v59 = vpop.permute.xlu1 %1990  ;;  %v1986_v16 = vpop.permute.xlu0 %1985  ;;  %v9368_v20 = vadd.f32 %v6257_v27, %v9225_v63 }
 0x214   : > { %v2530_v48 = vmul.f32 %v1991_v59, %v724_v23  ;;  %v2529_v29 = vmul.f32 %v1986_v16, %v723_v51  ;;  %6623 = vmatpush3.bf16.msra.mxu0 %v2700_v33  ;;  %v6258_v15 = vpop.f32.mrb[44].mxu1  ;;  %v726_v33 = vld [vmem:[%s10407_s0 + $0x5e8] sm:$0xff]  ;;  %v725_v59 = vld [vmem:[%s10407_s0 + $0x5e0] sm:$0xff] }
 0x215   : > { %v6259_v47 = vpop.f32.mrb[45].mxu1 }
 0x216   : > { %v2694_v40 = vpack.c.bf16 %v2530_v48, %v2529_v29  ;;  %v6260_v31 = vadd.f32 %v6259_v47, %v6258_v15  ;;  %v6261_v18 = vpop.f32.mrb[46].mxu1 }
 0x217   : > { %v1911_v63 = vpop.permute.xlu1 %1910  ;;  %v1906_v39 = vpop.permute.xlu0 %1905 }
 0x218   : > { %v2514_v10 = vmul.f32 %v1911_v63, %v708_v1  ;;  %v2513_v13 = vmul.f32 %v1906_v39, %v707_v7  ;;  %6544 = vmatprep.subr.bf16.mxu1 %v2694_v40  ;;  %v9379_v11 = vadd.f32 %v6260_v31, %v8923_v50  ;;  %v6262_v21 = vpop.f32.mrb[47].mxu1  ;;  %v710_v40 = vld [vmem:[%s10407_s0 + $0x568] sm:$0xff] }
 0x219   : > { %4288 = vmatmul.mubr.bf16.gmra.mrb[104].mxu0 %v7111_v43  ;;  %v6263_v53 = vadd.f32 %v6262_v21, %v6261_v18 }
 0x21a   : > { %v2686_v5 = vpack.c.bf16 %v2514_v10, %v2513_v13  ;;  %4295 = vmatprep.mubr.bf16.mxu0 %v7112_v41  ;;  %v709_v41 = vld [vmem:[%s10407_s0 + $0x560] sm:$0xff] }
 0x21b   : > { %v2141_v62 = vpop.permute.xlu1 %2140  ;;  %v2136_v37 = vpop.permute.xlu0 %2135  ;;  %v9388_v50 = vadd.f32 %v6263_v53, %v8927_v6 }
 0x21c   : > { %v2560_v55 = vmul.f32 %v2141_v62, %v754_v46  ;;  %v2559_v56 = vmul.f32 %v2136_v37, %v753_v38  ;;  %6545 = vmatpush3.bf16.msra.mxu1 %v2686_v5  ;;  %v6264_v32 = vpop.f32.mrb[48].mxu1 }
 0x21d   : > { %v6265_v2 = vpop.f32.mrb[49].mxu1 }
 0x21e   : > { %v2709_v17 = vpack.c.bf16 %v2560_v55, %v2559_v56  ;;  %v6266_v25 = vadd.f32 %v6265_v2, %v6264_v32  ;;  %v6267_v28 = vpop.f32.mrb[50].mxu1  ;;  %v756_v56 = vld [vmem:[%s10407_s0 + $0x6d8] sm:$0xff]  ;;  %v755_v32 = vld [vmem:[%s10407_s0 + $0x6d0] sm:$0xff] }
 0x21f   : > { %v2061_v6 = vpop.permute.xlu1 %2060  ;;  %v2056_v42 = vpop.permute.xlu0 %2055 }
 0x220   : > { %v2544_v22 = vmul.f32 %v2061_v6, %v738_v3  ;;  %v2543_v23 = vmul.f32 %v2056_v42, %v737_v30  ;;  %6624 = vmatprep.subr.bf16.mxu0 %v2709_v17  ;;  %v9399_v51 = vadd.f32 %v6266_v25, %v8957_v8  ;;  %v6268_v27 = vpop.f32.mrb[51].mxu1  ;;  %v740_v42 = vld [vmem:[%s10407_s0 + $0x658] sm:$0xff] }
 0x221   : > { %4296 = vmatmul.mubr.bf16.gmra.mrb[108].mxu0 %v7114_v54  ;;  %v6269_v16 = vadd.f32 %v6268_v27, %v6267_v28 }
 0x222   : > { %v2701_v48 = vpack.c.bf16 %v2544_v22, %v2543_v23  ;;  %4457 = vmatprep.mubr.bf16.mxu0 %v7125_v58  ;;  %v739_v22 = vld [vmem:[%s10407_s0 + $0x650] sm:$0xff] }
 0x223   : > { %v2001_v29 = vpop.permute.xlu1 %2000  ;;  %v1996_v15 = vpop.permute.xlu0 %1995  ;;  %v9408_v1 = vadd.f32 %v6269_v16, %v8961_v9 }
 0x224   : > { %v2532_v8 = vmul.f32 %v2001_v29, %v726_v33  ;;  %v2531_v7 = vmul.f32 %v1996_v15, %v725_v59  ;;  %6625 = vmatpush3.bf16.msra.mxu0 %v2701_v48  ;;  %v6304_v43 = vpop.f32.mrb[24].mxu0  ;;  %v6270_v47 = vpop.f32.mrb[52].mxu1 }
 0x225   : > { %v6305_v31 = vpop.f32.mrb[25].mxu0  ;;  %v6271_v18 = vpop.f32.mrb[53].mxu1 }
 0x226   : > { %v2695_v63 = vpack.c.bf16 %v2532_v8, %v2531_v7  ;;  %v6306_v39 = vadd.f32 %v6305_v31, %v6304_v43  ;;  %v6307_v10 = vpop.f32.mrb[26].mxu0  ;;  %v6272_v9 = vadd.f32 %v6271_v18, %v6270_v47  ;;  %v6273_v13 = vpop.f32.mrb[54].mxu1  ;;  %v727_v31 = vld [vmem:[%s10407_s0 + $0x5f0] sm:$0xff] }
 0x227   : > { %v1921_v21 = vpop.permute.xlu1 %1920  ;;  %v1916_v46 = vpop.permute.xlu0 %1915 }
 0x228   : > { %v2516_v38 = vmul.f32 %v1921_v21, %v710_v40  ;;  %v2515_v53 = vmul.f32 %v1916_v46, %v709_v41  ;;  %6546 = vmatprep.subr.bf16.mxu1 %v2695_v63  ;;  %v9417_v5 = vadd.f32 %v6306_v39, %v9190_v26  ;;  %v9420_v62 = vadd.f32 %v6272_v9, %v8995_v35  ;;  %v6308_v37 = vpop.f32.mrb[27].mxu0  ;;  %v6274_v55 = vpop.f32.mrb[55].mxu1  ;;  %v728_v41 = vld [vmem:[%s10407_s0 + $0x5f8] sm:$0xff] }
 0x229   : > { %v6309_v3 = vadd.f32 %v6308_v37, %v6307_v10  ;;  %v6275_v30 = vadd.f32 %v6274_v55, %v6273_v13  ;;  %v711_v37 = vld [vmem:[%s10407_s0 + $0x570] sm:$0xff] }
 0x22a   : > { %v2687_v54 = vpack.c.bf16 %v2516_v38, %v2515_v53  ;;  %v712_v53 = vld [vmem:[%s10407_s0 + $0x578] sm:$0xff] }
 0x22b   : > { %v2151_v2 = vpop.permute.xlu1 %2150  ;;  %v2146_v17 = vpop.permute.xlu0 %2145  ;;  %v9429_v26 = vadd.f32 %v6309_v3, %v9208_v44  ;;  %v9432_v35 = vadd.f32 %v6275_v30, %v8999_v57 }
 0x22c   : > { %v2562_v58 = vmul.f32 %v2151_v2, %v756_v56  ;;  %v2561_v25 = vmul.f32 %v2146_v17, %v755_v32  ;;  %6547 = vmatpush3.bf16.msra.mxu1 %v2687_v54  ;;  %v6310_v28 = vpop.f32.mrb[28].mxu0  ;;  %v6276_v6 = vpop.f32.mrb[56].mxu1 }
 0x22d   : > { %v6311_v23 = vpop.f32.mrb[29].mxu0  ;;  %v6277_v27 = vpop.f32.mrb[57].mxu1 }
 0x22e   : > { %v2710_v44 = vpack.c.bf16 %v2562_v58, %v2561_v25  ;;  %v6312_v33 = vadd.f32 %v6311_v23, %v6310_v28  ;;  %v6313_v59 = vpop.f32.mrb[30].mxu0  ;;  %v6278_v57 = vadd.f32 %v6277_v27, %v6276_v6  ;;  %v6279_v16 = vpop.f32.mrb[58].mxu1  ;;  %v757_v23 = vld [vmem:[%s10407_s0 + $0x6e0] sm:$0xff] }
 0x22f   : > { %v2071_v48 = vpop.permute.xlu1 %2070  ;;  %v2066_v29 = vpop.permute.xlu0 %2065 }
 0x230   : > { %v2546_v15 = vmul.f32 %v2071_v48, %v740_v42  ;;  %v2545_v8 = vmul.f32 %v2066_v29, %v739_v22  ;;  %6626 = vmatprep.subr.bf16.mxu0 %v2710_v44  ;;  %v9441_v7 = vadd.f32 %v6312_v33, %v9232_v45  ;;  %v9444_v43 = vadd.f32 %v6278_v57, %v9017_v4  ;;  %v6314_v47 = vpop.f32.mrb[31].mxu0  ;;  %v6280_v40 = vpop.f32.mrb[59].mxu1  ;;  %v758_v22 = vld [vmem:[%s10407_s0 + $0x6e8] sm:$0xff] }
 0x231   : > { %v6315_v18 = vadd.f32 %v6314_v47, %v6313_v59  ;;  %v6281_v63 = vadd.f32 %v6280_v40, %v6279_v16  ;;  %v7115_v57 = vld [vmem:[%s7590_s16 + $0x28] ss:$68 sps:$4 sm:$0xff]   ;;  %v741_v40 = vld [vmem:[%s10407_s0 + $0x660] sm:$0xff] }
 0x232   : > { %v2702_v39 = vpack.c.bf16 %v2546_v15, %v2545_v8  ;;  %v7118_v15 = vld [vmem:[%s7590_s16 + $0xb4] ss:$68 sps:$4 sm:$0xff]   ;;  %v742_v47 = vld [vmem:[%s10407_s0 + $0x668] sm:$0xff] }
 0x233   : > { %v2011_v10 = vpop.permute.xlu1 %2010  ;;  %v2006_v9 = vpop.permute.xlu0 %2005  ;;  %v9453_v45 = vadd.f32 %v6315_v18, %v9247_v52  ;;  %v9456_v4 = vadd.f32 %v6281_v63, %v9020_v14 }
 0x234   : > { %v2534_v13 = vmul.f32 %v2011_v10, %v728_v41  ;;  %v2533_v21 = vmul.f32 %v2006_v9, %v727_v31  ;;  %6627 = vmatpush3.bf16.msra.mxu0 %v2702_v39  ;;  %v6316_v46 = vpop.f32.mrb[32].mxu0  ;;  %v6282_v38 = vpop.f32.mrb[60].mxu1 }
 0x235   : > { %v6317_v55 = vpop.f32.mrb[33].mxu0  ;;  %v6283_v56 = vpop.f32.mrb[61].mxu1 }
 0x236   : > { %v2696_v52 = vpack.c.bf16 %v2534_v13, %v2533_v21  ;;  %v6318_v32 = vadd.f32 %v6317_v55, %v6316_v46  ;;  %v6319_v3 = vpop.f32.mrb[34].mxu0  ;;  %v6284_v14 = vadd.f32 %v6283_v56, %v6282_v38  ;;  %v6285_v30 = vpop.f32.mrb[62].mxu1  ;;  %v760_v21 = vld [vmem:[%s10407_s0 + $0x6f8] sm:$0xff]  ;;  %v759_v46 = vld [vmem:[%s10407_s0 + $0x6f0] sm:$0xff] }
 0x237   : > { %v1931_v54 = vpop.permute.xlu1 %1930  ;;  %v1926_v2 = vpop.permute.xlu0 %1925  ;;  %v7120_v56 = vld [vmem:[%s7590_s16 + $0xb0] ss:$68 sps:$4 sm:$0xff]  }
 0x238   : > { %v2518_v17 = vmul.f32 %v1931_v54, %v712_v53  ;;  %v2517_v58 = vmul.f32 %v1926_v2, %v711_v37  ;;  %6548 = vmatprep.subr.bf16.mxu1 %v2696_v52  ;;  %v9465_v25 = vadd.f32 %v6318_v32, %v9272_v24  ;;  %v9468_v28 = vadd.f32 %v6284_v14, %v9046_v49  ;;  %v6320_v6 = vpop.f32.mrb[35].mxu0  ;;  %v6286_v42 = vpop.f32.mrb[63].mxu1  ;;  %v743_v54 = vld [vmem:[%s10407_s0 + $0x670] sm:$0xff] }
 0x239   : > { %v6321_v27 = vadd.f32 %v6320_v6, %v6319_v3  ;;  %v6287_v44 = vadd.f32 %v6286_v42, %v6285_v30  ;;  %v7121_v3 = vld [vmem:[%s7590_s16 + $0x13c] ss:$68 sps:$4 sm:$0xff]  }
 0x23a   : > { %v2688_v33 = vpack.c.bf16 %v2518_v17, %v2517_v58  ;;  %v744_v30 = vld [vmem:[%s10407_s0 + $0x678] sm:$0xff] }
 0x23b   : > { %v2161_v59 = vpop.permute.xlu1 %2160  ;;  %v2156_v24 = vpop.permute.xlu0 %2155  ;;  %v9478_v49 = vadd.f32 %v6321_v27, %v9284_v12  ;;  %v9481_v16 = vadd.f32 %v6287_v44, %v9048_v19 }
 0x23c   : > { %v2564_v48 = vmul.f32 %v2161_v59, %v758_v22  ;;  %v2563_v29 = vmul.f32 %v2156_v24, %v757_v23  ;;  %6549 = vmatpush3.bf16.msra.mxu1 %v2688_v33  ;;  %v6322_v8 = vpop.f32.mrb[36].mxu0  ;;  %v778_v33 = vld [vmem:[%s10407_s0 + $0x788] sm:$0xff]  ;;  %v777_v59 = vld [vmem:[%s10407_s0 + $0x780] sm:$0xff] }
 0x23d   : > { %v6323_v41 = vpop.f32.mrb[37].mxu0 }
 0x23e   : > { %v2711_v31 = vpack.c.bf16 %v2564_v48, %v2563_v29  ;;  %v6324_v12 = vadd.f32 %v6323_v41, %v6322_v8  ;;  %v6325_v18 = vpop.f32.mrb[38].mxu0  ;;  %v7126_v8 = vld [vmem:[%s7590_s16 + $0x138] ss:$68 sps:$4 sm:$0xff]   ;;  %v7127_v41 = vld [vmem:[%s7590_s16 + $0x1c4] ss:$68 sps:$4 sm:$0xff]  }
 0x23f   : > { %v2081_v19 = vpop.permute.xlu1 %2080  ;;  %v2076_v63 = vpop.permute.xlu0 %2075  ;;  %4337 = vmatmul.mubr.bf16.vlgmr.msra.gmra.mrb[108].mxu1 %v7115_v57 }
 0x240   : > { %v2548_v39 = vmul.f32 %v2081_v19, %v742_v47  ;;  %v2547_v10 = vmul.f32 %v2076_v63, %v741_v40  ;;  %6628 = vmatprep.subr.bf16.mxu0 %v2711_v31  ;;  %4344 = vmatprep.mubr.bf16.mxu1 %v7118_v15  ;;  %v9491_v9 = vadd.f32 %v6324_v12, %v9304_v34  ;;  %v6326_v13 = vpop.f32.mrb[39].mxu0  ;;  %v7123_v15 = vld [vmem:[%s7590_s16 + $0x30] ss:$68 sps:$4 sm:$0xff]   ;;  %v762_v12 = vld [vmem:[%s10407_s0 + $0x708] sm:$0xff]  ;;  %v7129_v19 = vld [vmem:[%s7590_s16 + $0xbc] ss:$68 sps:$4 sm:$0xff]  }
 0x241   : > { %v6327_v38 = vadd.f32 %v6326_v13, %v6325_v18  ;;  %v761_v18 = vld [vmem:[%s10407_s0 + $0x700] sm:$0xff] }
 0x242   : > { %v2703_v53 = vpack.c.bf16 %v2548_v39, %v2547_v10  ;;  %v7362_v39 = vmov 0.0  }
 0x243   : > { %v2171_v37 = vpop.permute.xlu1 %2170  ;;  %v2166_v55 = vpop.permute.xlu0 %2165  ;;  %v9501_v52 = vadd.f32 %v6327_v38, %v9316_v36 }
 0x244   : > { %v2566_v32 = vmul.f32 %v2171_v37, %v760_v21  ;;  %v2565_v34 = vmul.f32 %v2166_v55, %v759_v46  ;;  %6629 = vmatpush3.bf16.msra.mxu0 %v2703_v53  ;;  %v6328_v14 = vpop.f32.mrb[40].mxu0 }
 0x245   : > { %v6329_v2 = vpop.f32.mrb[41].mxu0 }
 0x246   : > { %v2712_v17 = vpack.c.bf16 %v2566_v32, %v2565_v34  ;;  %v6330_v58 = vadd.f32 %v6329_v2, %v6328_v14  ;;  %v6331_v6 = vpop.f32.mrb[42].mxu0  ;;  %v779_v32 = vld [vmem:[%s10407_s0 + $0x790] sm:$0xff]  ;;  %v7132_v2 = vld [vmem:[%s7590_s16 + $0xb8] ss:$68 sps:$4 sm:$0xff]  }
 0x247   : > { %v2091_v36 = vpop.permute.xlu1 %2090  ;;  %v2086_v42 = vpop.permute.xlu0 %2085  ;;  %4345 = vmatmul.mubr.bf16.gmra.mrb[112].mxu1 %v7120_v56  ;;  %v780_v56 = vld [vmem:[%s10407_s0 + $0x798] sm:$0xff] }
 0x248   : > { %v2550_v22 = vmul.f32 %v2091_v36, %v744_v30  ;;  %v2549_v23 = vmul.f32 %v2086_v42, %v743_v54  ;;  %6630 = vmatprep.subr.bf16.mxu0 %v2712_v17  ;;  %4352 = vmatprep.mubr.bf16.mxu1 %v7121_v3  ;;  %v9511_v27 = vadd.f32 %v6330_v58, %v9336_v60  ;;  %v6332_v44 = vpop.f32.mrb[43].mxu0  ;;  %v7131_v54 = vld [vmem:[%s7590_s16 + $0x1c0] ss:$68 sps:$4 sm:$0xff]   ;;  %v764_v42 = vld [vmem:[%s10407_s0 + $0x718] sm:$0xff] }
 0x249   : > { %v6333_v24 = vadd.f32 %v6332_v44, %v6331_v6  ;;  %v7133_v6 = vld [vmem:[%s7590_s16 + $0x24c] ss:$68 sps:$4 sm:$0xff]  }
 0x24a   : > { %v2704_v57 = vpack.c.bf16 %v2550_v22, %v2549_v23  ;;  %v763_v22 = vld [vmem:[%s10407_s0 + $0x710] sm:$0xff]  ;;  %v7135_v23 = vld [vmem:[%s7590_s16 + $0x144] ss:$68 sps:$4 sm:$0xff]  }
 0x24b   : > { %v2261_v48 = vpop.permute.xlu1 %2260  ;;  %v2256_v29 = vpop.permute.xlu0 %2255  ;;  %v9522_v47 = vadd.f32 %v6333_v24, %v9348_v61 }
 0x24c   : > { %v2584_v60 = vmul.f32 %v2261_v48, %v778_v33  ;;  %v2583_v40 = vmul.f32 %v2256_v29, %v777_v59  ;;  %6631 = vmatpush3.bf16.msra.mxu0 %v2704_v57  ;;  %v6334_v31 = vpop.f32.mrb[44].mxu0 }
 0x24d   : > { %v6335_v63 = vpop.f32.mrb[45].mxu0  ;;  %6792 = vmatprep.subr.bf16.mxu0 %v7362_v39 }
 0x24e   : > { %v2721_v61 = vpack.c.bf16 %v2584_v60, %v2583_v40  ;;  %v6336_v10 = vadd.f32 %v6335_v63, %v6334_v31  ;;  %v6337_v13 = vpop.f32.mrb[46].mxu0  ;;  %v782_v60 = vld [vmem:[%s10407_s0 + $0x7a8] sm:$0xff]  ;;  %v781_v40 = vld [vmem:[%s10407_s0 + $0x7a0] sm:$0xff] }
 0x24f   : > { %v2181_v21 = vpop.permute.xlu1 %2180  ;;  %v2176_v46 = vpop.permute.xlu0 %2175  ;;  %4353 = vmatmul.mubr.bf16.gmra.mrb[116].mxu1 %v7126_v8  ;;  %4458 = vmatmul.mubr.bf16.vlgmr.msra.gmra.mrb[112].mxu0 %v7123_v15  ;;  %v7138_v63 = vld [vmem:[%s7590_s16 + $0x140] ss:$68 sps:$4 sm:$0xff]  }
 0x250   : > { %v2568_v38 = vmul.f32 %v2181_v21, %v762_v12  ;;  %v2567_v53 = vmul.f32 %v2176_v46, %v761_v18  ;;  %6698 = vmatprep.subr.bf16.mxu1 %v2721_v61  ;;  %4360 = vmatprep.mubr.bf16.mxu1 %v7127_v41  ;;  %v9534_v37 = vadd.f32 %v6336_v10, %v9359_v0  ;;  %v6338_v55 = vpop.f32.mrb[47].mxu0  ;;  %v766_v46 = vld [vmem:[%s10407_s0 + $0x728] sm:$0xff] }
 0x251   : > { %4465 = vmatprep.mubr.bf16.mxu0 %v7129_v19  ;;  %v6339_v34 = vadd.f32 %v6338_v55, %v6337_v13  ;;  %v7137_v19 = vld [vmem:[%s7590_s16 + $0x248] ss:$68 sps:$4 sm:$0xff]   ;;  %v7139_v13 = vld [vmem:[%s7590_s16 + $0x2d4] ss:$68 sps:$4 sm:$0xff]  }
 0x252   : > { %v2713_v3 = vpack.c.bf16 %v2568_v38, %v2567_v53  ;;  %v765_v38 = vld [vmem:[%s10407_s0 + $0x720] sm:$0xff]  ;;  %v7141_v53 = vld [vmem:[%s7590_s16 + $0x1cc] ss:$68 sps:$4 sm:$0xff]  }
 0x253   : > { %v2271_v14 = vpop.permute.xlu1 %2270  ;;  %v2266_v30 = vpop.permute.xlu0 %2265  ;;  %v9545_v0 = vadd.f32 %v6339_v34, %v9368_v20 }
 0x254   : > { %v2586_v17 = vmul.f32 %v2271_v14, %v780_v56  ;;  %v2585_v58 = vmul.f32 %v2266_v30, %v779_v32  ;;  %6699 = vmatpush3.bf16.msra.mxu1 %v2713_v3  ;;  %v6340_v36 = vpop.f32.mrb[48].mxu0 }
 0x255   : > { %v6341_v44 = vpop.f32.mrb[49].mxu0 }
 0x256   : > { %v2722_v33 = vpack.c.bf16 %v2586_v17, %v2585_v58  ;;  %v6342_v59 = vadd.f32 %v6341_v44, %v6340_v36  ;;  %v6343_v24 = vpop.f32.mrb[50].mxu0  ;;  %v784_v17 = vld [vmem:[%s10407_s0 + $0x7b8] sm:$0xff]  ;;  %v783_v58 = vld [vmem:[%s10407_s0 + $0x7b0] sm:$0xff]  ;;  %v7144_v44 = vld [vmem:[%s7590_s16 + $0x1c8] ss:$68 sps:$4 sm:$0xff]  }
 0x257   : > { %v2191_v20 = vpop.permute.xlu1 %2190  ;;  %v2186_v57 = vpop.permute.xlu0 %2185  ;;  %4361 = vmatmul.mubr.bf16.gmra.mrb[120].mxu1 %v7131_v54  ;;  %4466 = vmatmul.mubr.bf16.gmra.mrb[116].mxu0 %v7132_v2 }
 0x258   : > { %v2570_v48 = vmul.f32 %v2191_v20, %v764_v42  ;;  %v2569_v29 = vmul.f32 %v2186_v57, %v763_v22  ;;  %6700 = vmatprep.subr.bf16.mxu1 %v2722_v33  ;;  %4368 = vmatprep.mubr.bf16.mxu1 %v7133_v6  ;;  %v9556_v15 = vadd.f32 %v6342_v59, %v9379_v11  ;;  %v6344_v8 = vpop.f32.mrb[51].mxu0 }
 0x259   : > { %4473 = vmatprep.mubr.bf16.mxu0 %v7135_v23  ;;  %v6345_v41 = vadd.f32 %v6344_v8, %v6343_v24  ;;  %v7143_v23 = vld [vmem:[%s7590_s16 + $0x2d0] ss:$68 sps:$4 sm:$0xff]   ;;  %v7145_v24 = vld [vmem:[%s7590_s16 + $0x35c] ss:$68 sps:$4 sm:$0xff]  }
 0x25a   : > { %v2714_v31 = vpack.c.bf16 %v2570_v48, %v2569_v29  ;;  %v768_v48 = vld [vmem:[%s10407_s0 + $0x738] sm:$0xff]  ;;  %v767_v29 = vld [vmem:[%s10407_s0 + $0x730] sm:$0xff] }
 0x25b   : > { %v2281_v12 = vpop.permute.xlu1 %2280  ;;  %v2276_v18 = vpop.permute.xlu0 %2275  ;;  %v9567_v11 = vadd.f32 %v6345_v41, %v9388_v50  ;;  %v7147_v8 = vld [vmem:[%s7590_s16 + $0x254] ss:$68 sps:$4 sm:$0xff]  }
 0x25c   : > { %v2588_v61 = vmul.f32 %v2281_v12, %v782_v60  ;;  %v2587_v10 = vmul.f32 %v2276_v18, %v781_v40  ;;  %6701 = vmatpush3.bf16.msra.mxu1 %v2714_v31  ;;  %v6346_v21 = vpop.f32.mrb[52].mxu0 }
 0x25d   : > { %v6347_v55 = vpop.f32.mrb[53].mxu0 }
 0x25e   : > { %v2723_v56 = vpack.c.bf16 %v2588_v61, %v2587_v10  ;;  %v6348_v32 = vadd.f32 %v6347_v55, %v6346_v21  ;;  %v6349_v34 = vpop.f32.mrb[54].mxu0 }
 0x25f   : > { %v2201_v50 = vpop.permute.xlu1 %2200  ;;  %v2196_v3 = vpop.permute.xlu0 %2195  ;;  %4369 = vmatmul.mubr.bf16.gmra.mrb[124].mxu1 %v7137_v19  ;;  %4474 = vmatmul.mubr.bf16.gmra.mrb[120].mxu0 %v7138_v63 }
 0x260   : > { %v2572_v14 = vmul.f32 %v2201_v50, %v766_v46  ;;  %v2571_v30 = vmul.f32 %v2196_v3, %v765_v38  ;;  %6702 = vmatprep.subr.bf16.mxu1 %v2723_v56  ;;  %4376 = vmatprep.mubr.bf16.mxu1 %v7139_v13  ;;  %v9578_v54 = vadd.f32 %v6348_v32, %v9399_v51  ;;  %v6350_v2 = vpop.f32.mrb[55].mxu0  ;;  %v786_v38 = vld [vmem:[%s10407_s0 + $0x7c8] sm:$0xff]  ;;  %v7149_v3 = vld [vmem:[%s7590_s16 + $0x358] ss:$68 sps:$4 sm:$0xff]  }
 0x261   : > { %4481 = vmatprep.mubr.bf16.mxu0 %v7141_v53  ;;  %v6351_v6 = vadd.f32 %v6350_v2, %v6349_v34  ;;  %v785_v53 = vld [vmem:[%s10407_s0 + $0x7c0] sm:$0xff] }
 0x262   : > { %v2715_v36 = vpack.c.bf16 %v2572_v14, %v2571_v30  ;;  %v7150_v14 = vld [vmem:[%s7590_s16 + $0x250] ss:$68 sps:$4 sm:$0xff]  }
 0x263   : > { %v2291_v42 = vpop.permute.xlu1 %2290  ;;  %v2286_v22 = vpop.permute.xlu0 %2285  ;;  %v9589_v51 = vadd.f32 %v6351_v6, %v9408_v1  ;;  %v7151_v6 = vld [vmem:[%s7590_s16 + $0x3e4] ss:$68 sps:$4 sm:$0xff]  }
 0x264   : > { %v2590_v33 = vmul.f32 %v2291_v42, %v784_v17  ;;  %v2589_v59 = vmul.f32 %v2286_v22, %v783_v58  ;;  %6703 = vmatpush3.bf16.msra.mxu1 %v2715_v36  ;;  %v6386_v20 = vpop.f32.mrb[64].mxu1  ;;  %v6352_v57 = vpop.f32.mrb[56].mxu0  ;;  %v770_v42 = vld [vmem:[%s10407_s0 + $0x748] sm:$0xff]  ;;  %v769_v22 = vld [vmem:[%s10407_s0 + $0x740] sm:$0xff] }
 0x265   : > { %v6387_v60 = vpop.f32.mrb[65].mxu1  ;;  %v6353_v40 = vpop.f32.mrb[57].mxu0 }
 0x266   : > { %v2724_v41 = vpack.c.bf16 %v2590_v33, %v2589_v59  ;;  %v6388_v1 = vadd.f32 %v6387_v60, %v6386_v20  ;;  %v6389_v31 = vpop.f32.mrb[66].mxu1  ;;  %v6354_v12 = vadd.f32 %v6353_v40, %v6352_v57  ;;  %v6355_v18 = vpop.f32.mrb[58].mxu0 }
 0x267   : > { %v2211_v19 = vpop.permute.xlu1 %2210  ;;  %v2206_v63 = vpop.permute.xlu0 %2205  ;;  %4377 = vmatmul.mubr.bf16.gmra.mrb[128].mxu1 %v7143_v23  ;;  %4482 = vmatmul.mubr.bf16.gmra.mrb[124].mxu0 %v7144_v44  ;;  %v7153_v23 = vld [vmem:[%s7590_s16 + $0x2dc] ss:$68 sps:$4 sm:$0xff]  }
 0x268   : > { %v2574_v61 = vmul.f32 %v2211_v19, %v768_v48  ;;  %v2573_v10 = vmul.f32 %v2206_v63, %v767_v29  ;;  %6704 = vmatprep.subr.bf16.mxu1 %v2724_v41  ;;  %4384 = vmatprep.mubr.bf16.mxu1 %v7145_v24  ;;  %v9600_v13 = vadd.f32 %v6388_v1, %v9417_v5  ;;  %v6390_v21 = vpop.f32.mrb[67].mxu1  ;;  %v6356_v46 = vpop.f32.mrb[59].mxu0  ;;  %v788_v1 = vld [vmem:[%s10407_s0 + $0x7d8] sm:$0xff] }
 0x269   : > { %4489 = vmatprep.mubr.bf16.mxu0 %v7147_v8  ;;  %v6391_v55 = vadd.f32 %v6390_v21, %v6389_v31  ;;  %v9609_v56 = vadd.f32 %v6354_v12, %v9420_v62  ;;  %v6357_v32 = vadd.f32 %v6356_v46, %v6355_v18  ;;  %v787_v31 = vld [vmem:[%s10407_s0 + $0x7d0] sm:$0xff]  ;;  %v7156_v21 = vld [vmem:[%s7590_s16 + $0x2d8] ss:$68 sps:$4 sm:$0xff]  }
 0x26a   : > { %v2716_v5 = vpack.c.bf16 %v2574_v61, %v2573_v10  ;;  %v7155_v10 = vld [vmem:[%s7590_s16 + $0x3e0] ss:$68 sps:$4 sm:$0xff]  }
 0x26b   : > { %v2301_v34 = vpop.permute.xlu1 %2300  ;;  %v2296_v50 = vpop.permute.xlu0 %2295  ;;  %v9614_v30 = vadd.f32 %v6391_v55, %v9429_v26  ;;  %v9617_v2 = vadd.f32 %v6357_v32, %v9432_v35  ;;  %v7157_v32 = vld [vmem:[%s7590_s16 + $0x46c] ss:$68 sps:$4 sm:$0xff]  }
 0x26c   : > { %v2592_v17 = vmul.f32 %v2301_v34, %v786_v38  ;;  %v2591_v58 = vmul.f32 %v2296_v50, %v785_v53  ;;  %6705 = vmatpush3.bf16.msra.mxu1 %v2716_v5  ;;  %v6392_v36 = vpop.f32.mrb[68].mxu1  ;;  %v6358_v62 = vpop.f32.mrb[60].mxu0  ;;  %v772_v34 = vld [vmem:[%s10407_s0 + $0x758] sm:$0xff]  ;;  %v771_v50 = vld [vmem:[%s10407_s0 + $0x750] sm:$0xff] }
 0x26d   : > { %v6393_v26 = vpop.f32.mrb[69].mxu1  ;;  %v6359_v44 = vpop.f32.mrb[61].mxu0 }
 0x26e   : > { %v2725_v33 = vpack.c.bf16 %v2592_v17, %v2591_v58  ;;  %v6394_v35 = vadd.f32 %v6393_v26, %v6392_v36  ;;  %v6395_v59 = vpop.f32.mrb[70].mxu1  ;;  %v6360_v24 = vadd.f32 %v6359_v44, %v6358_v62  ;;  %v6361_v20 = vpop.f32.mrb[62].mxu0 }
 0x26f   : > { %v2221_v57 = vpop.permute.xlu1 %2220  ;;  %v2216_v48 = vpop.permute.xlu0 %2215  ;;  %4385 = vmatmul.mubr.bf16.gmra.mrb[132].mxu1 %v7149_v3  ;;  %4490 = vmatmul.mubr.bf16.gmra.mrb[128].mxu0 %v7150_v14  ;;  %v7159_v3 = vld [vmem:[%s7590_s16 + $0x364] ss:$68 sps:$4 sm:$0xff]  }
 0x270   : > { %v2576_v29 = vmul.f32 %v2221_v57, %v770_v42  ;;  %v2575_v8 = vmul.f32 %v2216_v48, %v769_v22  ;;  %6706 = vmatprep.subr.bf16.mxu1 %v2725_v33  ;;  %4392 = vmatprep.mubr.bf16.mxu1 %v7151_v6  ;;  %v9628_v60 = vadd.f32 %v6394_v35, %v9441_v7  ;;  %v6396_v40 = vpop.f32.mrb[71].mxu1  ;;  %v6362_v41 = vpop.f32.mrb[63].mxu0  ;;  %v790_v35 = vld [vmem:[%s10407_s0 + $0x7e8] sm:$0xff] }
 0x271   : > { %4497 = vmatprep.mubr.bf16.mxu0 %v7153_v23  ;;  %v6397_v12 = vadd.f32 %v6396_v40, %v6395_v59  ;;  %v9637_v18 = vadd.f32 %v6360_v24, %v9444_v43  ;;  %v6363_v19 = vadd.f32 %v6362_v41, %v6361_v20  ;;  %v789_v59 = vld [vmem:[%s10407_s0 + $0x7e0] sm:$0xff] }
 0x272   : > { %v2717_v7 = vpack.c.bf16 %v2576_v29, %v2575_v8  ;;  %v7161_v8 = vld [vmem:[%s7590_s16 + $0x468] ss:$68 sps:$4 sm:$0xff]   ;;  %v7162_v40 = vld [vmem:[%s7590_s16 + $0x360] ss:$68 sps:$4 sm:$0xff]  }
 0x273   : > { %v2311_v63 = vpop.permute.xlu1 %2310  ;;  %v2306_v61 = vpop.permute.xlu0 %2305  ;;  %v9642_v46 = vadd.f32 %v6397_v12, %v9453_v45  ;;  %v9645_v38 = vadd.f32 %v6363_v19, %v9456_v4  ;;  %v7163_v19 = vld [vmem:[%s7590_s16 + $0x4f4] ss:$68 sps:$4 sm:$0xff]  }
 0x274   : > { %v2594_v53 = vmul.f32 %v2311_v63, %v788_v1  ;;  %v2593_v55 = vmul.f32 %v2306_v61, %v787_v31  ;;  %6707 = vmatpush3.bf16.msra.mxu1 %v2717_v7  ;;  %v6398_v5 = vpop.f32.mrb[72].mxu1  ;;  %v6364_v43 = vpop.f32.mrb[64].mxu0  ;;  %v773_v63 = vld [vmem:[%s10407_s0 + $0x760] sm:$0xff]  ;;  %v7165_v61 = vld [vmem:[%s7590_s16 + $0x3ec] ss:$68 sps:$4 sm:$0xff]  }
 0x275   : > { %v6399_v45 = vpop.f32.mrb[73].mxu1  ;;  %v6365_v14 = vpop.f32.mrb[65].mxu0 }
 0x276   : > { %v2726_v17 = vpack.c.bf16 %v2594_v53, %v2593_v55  ;;  %v6400_v4 = vadd.f32 %v6399_v45, %v6398_v5  ;;  %v6401_v58 = vpop.f32.mrb[74].mxu1  ;;  %v6366_v6 = vadd.f32 %v6365_v14, %v6364_v43  ;;  %v6367_v36 = vpop.f32.mrb[66].mxu0 }
 0x277   : > { %v2231_v62 = vpop.permute.xlu1 %2230  ;;  %v2226_v42 = vpop.permute.xlu0 %2225  ;;  %4393 = vmatmul.mubr.bf16.gmra.mrb[136].mxu1 %v7155_v10  ;;  %4498 = vmatmul.mubr.bf16.gmra.mrb[132].mxu0 %v7156_v21 }
 0x278   : > { %v2578_v22 = vmul.f32 %v2231_v62, %v772_v34  ;;  %v2577_v23 = vmul.f32 %v2226_v42, %v771_v50  ;;  %6708 = vmatprep.subr.bf16.mxu1 %v2726_v17  ;;  %4400 = vmatprep.mubr.bf16.mxu1 %v7157_v32  ;;  %v9656_v26 = vadd.f32 %v6400_v4, %v9465_v25  ;;  %v6402_v44 = vpop.f32.mrb[75].mxu1  ;;  %v6368_v33 = vpop.f32.mrb[67].mxu0  ;;  %v792_v50 = vld [vmem:[%s10407_s0 + $0x7f8] sm:$0xff] }
 0x279   : > { %4505 = vmatprep.mubr.bf16.mxu0 %v7159_v3  ;;  %v6403_v24 = vadd.f32 %v6402_v44, %v6401_v58  ;;  %v9665_v20 = vadd.f32 %v6366_v6, %v9468_v28  ;;  %v6369_v57 = vadd.f32 %v6368_v33, %v6367_v36  ;;  %v774_v28 = vld [vmem:[%s10407_s0 + $0x768] sm:$0xff]  ;;  %v791_v3 = vld [vmem:[%s10407_s0 + $0x7f0] sm:$0xff] }
 0x27a   : > { %v2718_v25 = vpack.c.bf16 %v2578_v22, %v2577_v23  ;;  %v7167_v58 = vld [vmem:[%s7590_s16 + $0x4f0] ss:$68 sps:$4 sm:$0xff]   ;;  %v7168_v6 = vld [vmem:[%s7590_s16 + $0x3e8] ss:$68 sps:$4 sm:$0xff]   ;;  %v7169_v22 = vld [vmem:[%s7590_s16 + $0x57c] ss:$68 sps:$4 sm:$0xff]  }
 0x27b   : > { %v2321_v48 = vpop.permute.xlu1 %2320  ;;  %v2316_v29 = vpop.permute.xlu0 %2315  ;;  %v9670_v41 = vadd.f32 %v6403_v24, %v9478_v49  ;;  %v9673_v1 = vadd.f32 %v6369_v57, %v9481_v16  ;;  %v776_v23 = vld [vmem:[%s10407_s0 + $0x778] sm:$0xff]  ;;  %v775_v44 = vld [vmem:[%s10407_s0 + $0x770] sm:$0xff] }
 0x27c   : > { %v2596_v31 = vmul.f32 %v2321_v48, %v790_v35  ;;  %v2595_v12 = vmul.f32 %v2316_v29, %v789_v59  ;;  %6709 = vmatpush3.bf16.msra.mxu1 %v2718_v25  ;;  %v6404_v7 = vpop.f32.mrb[76].mxu1  ;;  %v7171_v35 = vld [vmem:[%s7590_s16 + $0x474] ss:$68 sps:$4 sm:$0xff]  }
 0x27d   : > { %v6405_v10 = vpop.f32.mrb[77].mxu1 }
 0x27e   : > { %v2727_v49 = vpack.c.bf16 %v2596_v31, %v2595_v12  ;;  %v6406_v21 = vadd.f32 %v6405_v10, %v6404_v7  ;;  %v6407_v53 = vpop.f32.mrb[78].mxu1  ;;  %v794_v31 = vld [vmem:[%s10407_s0 + $0x808] sm:$0xff]  ;;  %v793_v12 = vld [vmem:[%s10407_s0 + $0x800] sm:$0xff]  ;;  %v7174_v10 = vld [vmem:[%s7590_s16 + $0x470] ss:$68 sps:$4 sm:$0xff]  }
 0x27f   : > { %v2241_v16 = vpop.permute.xlu1 %2240  ;;  %v2236_v55 = vpop.permute.xlu0 %2235  ;;  %4401 = vmatmul.mubr.bf16.gmra.mrb[140].mxu1 %v7161_v8  ;;  %4506 = vmatmul.mubr.bf16.gmra.mrb[136].mxu0 %v7162_v40 }
 0x280   : > { %v2580_v32 = vmul.f32 %v2241_v16, %v774_v28  ;;  %v2579_v5 = vmul.f32 %v2236_v55, %v773_v63  ;;  %6710 = vmatprep.subr.bf16.mxu1 %v2727_v49  ;;  %4408 = vmatprep.mubr.bf16.mxu1 %v7163_v19  ;;  %v9684_v43 = vadd.f32 %v6406_v21, %v9491_v9  ;;  %v6408_v34 = vpop.f32.mrb[79].mxu1  ;;  %v7175_v16 = vld [vmem:[%s7590_s16 + $0x4fc] ss:$68 sps:$4 sm:$0xff]  }
 0x281   : > { %4513 = vmatprep.mubr.bf16.mxu0 %v7165_v61  ;;  %v6409_v45 = vadd.f32 %v6408_v34, %v6407_v53  ;;  %v7173_v61 = vld [vmem:[%s7590_s16 + $0x578] ss:$68 sps:$4 sm:$0xff]  }
 0x282   : > { %v2719_v14 = vpack.c.bf16 %v2580_v32, %v2579_v5  ;;  %v7179_v32 = vld [vmem:[%s7590_s16 + $0x3c] ss:$68 sps:$4 sm:$0xff]  }
 0x283   : > { %v2331_v17 = vpop.permute.xlu1 %2330  ;;  %v2326_v4 = vpop.permute.xlu0 %2325  ;;  %v9695_v9 = vadd.f32 %v6409_v45, %v9501_v52 }
 0x284   : > { %v2598_v36 = vmul.f32 %v2331_v17, %v792_v50  ;;  %v2597_v62 = vmul.f32 %v2326_v4, %v791_v3  ;;  %6711 = vmatpush3.bf16.msra.mxu1 %v2719_v14  ;;  %v6410_v42 = vpop.f32.mrb[80].mxu1  ;;  %v7177_v17 = vld [vmem:[%s7590_s16 + $0x38] ss:$68 sps:$4 sm:$0xff]  }
 0x285   : > { %v6411_v33 = vpop.f32.mrb[81].mxu1  ;;  %v7180_v4 = vld [vmem:[%s7590_s16 + $0x4f8] ss:$68 sps:$4 sm:$0xff]  }
 0x286   : > { %v2728_v59 = vpack.c.bf16 %v2598_v36, %v2597_v62  ;;  %v6412_v24 = vadd.f32 %v6411_v33, %v6410_v42  ;;  %v6413_v57 = vpop.f32.mrb[82].mxu1  ;;  %v7183_v36 = vld [vmem:[%s7590_s16 + $0xc4] ss:$68 sps:$4 sm:$0xff]  }
 0x287   : > { %v2251_v52 = vpop.permute.xlu1 %2250  ;;  %v2246_v25 = vpop.permute.xlu0 %2245  ;;  %4409 = vmatmul.mubr.bf16.gmra.mrb[144].mxu1 %v7167_v58  ;;  %4514 = vmatmul.mubr.bf16.gmra.mrb[140].mxu0 %v7168_v6  ;;  %v7181_v6 = vld [vmem:[%s7590_s16 + $0x584] ss:$68 sps:$4 sm:$0xff]  }
 0x288   : > { %v2582_v48 = vmul.f32 %v2251_v52, %v776_v23  ;;  %v2581_v29 = vmul.f32 %v2246_v25, %v775_v44  ;;  %6712 = vmatprep.subr.bf16.mxu1 %v2728_v59  ;;  %v9706_v8 = vadd.f32 %v6412_v24, %v9511_v27  ;;  %v6414_v40 = vpop.f32.mrb[83].mxu1  ;;  %4416 = vmatprep.mubr.bf16.mxu1 %v7169_v22  ;;  %v7185_v33 = vld [vmem:[%s7590_s16 + $0x580] ss:$68 sps:$4 sm:$0xff]   ;;  %v7187_v24 = vld [vmem:[%s7590_s16 + $0x14c] ss:$68 sps:$4 sm:$0xff]  }
 0x289   : > { %v6415_v19 = vadd.f32 %v6414_v40, %v6413_v57  ;;  %4521 = vmatprep.mubr.bf16.mxu0 %v7171_v35  ;;  %v7186_v35 = vld [vmem:[%s7590_s16 + $0xc0] ss:$68 sps:$4 sm:$0xff]   ;;  %v7189_v40 = vld [vmem:[%s7590_s16 + $0x148] ss:$68 sps:$4 sm:$0xff]  }
 0x28a   : > { %v2720_v7 = vpack.c.bf16 %v2582_v48, %v2581_v29 }
 0x28b   : > { %v2341_v28 = vpop.permute.xlu1 %2340  ;;  %v2336_v63 = vpop.permute.xlu0 %2335  ;;  %v9715_v27 = vadd.f32 %v6415_v19, %v9522_v47 }
 0x28c   : > { %v2600_v49 = vmul.f32 %v2341_v28, %v794_v31  ;;  %v2599_v21 = vmul.f32 %v2336_v63, %v793_v12  ;;  %6713 = vmatpush3.bf16.msra.mxu1 %v2720_v7  ;;  %v6416_v53 = vpop.f32.mrb[84].mxu1  ;;  %v7190_v31 = vld [vmem:[%s7590_s16 + $0x40] ss:$68 sps:$4 sm:$0xff]   ;;  %v7191_v7 = vld [vmem:[%s7590_s16 + $0x1d4] ss:$68 sps:$4 sm:$0xff]  }
 0x28d   : > { %v6417_v55 = vpop.f32.mrb[85].mxu1 }
 0x28e   : > { %v2729_v5 = vpack.c.bf16 %v2600_v49, %v2599_v21  ;;  %v6418_v34 = vadd.f32 %v6417_v55, %v6416_v53  ;;  %v6419_v50 = vpop.f32.mrb[86].mxu1 }
 0x28f   : > { %4417 = vmatmul.mubr.bf16.gmra.mrb[148].mxu1 %v7173_v61  ;;  %4522 = vmatmul.mubr.bf16.gmra.mrb[144].mxu0 %v7174_v10  ;;  %v6420_v47 = vpop.f32.mrb[87].mxu1 }
 0x290   : > { %v9722_v3 = vadd.f32 %v6418_v34, %v9534_v37  ;;  %6793 = vmatpush3.bf16.msra.mxu0 %v2729_v5  ;;  %v6421_v45 = vadd.f32 %v6420_v47, %v6419_v50  ;;  %4529 = vmatprep.mubr.bf16.mxu0 %v7175_v16  ;;  %v7193_v50 = vld [vmem:[%s7590_s16 + $0x1d0] ss:$68 sps:$4 sm:$0xff]   ;;  %v7194_v47 = vld [vmem:[%s7590_s16 + $0xc8] ss:$68 sps:$4 sm:$0xff]  }
 0x291   : > { %4578 = vmatprep.mubr.bf16.mxu1 %v7179_v32 }
 0x292   : > { %v9725_v14 = vadd.f32 %v6421_v45, %v9545_v0 }
 0x294   : > { %v6422_v58 = vpop.f32.mrb[88].mxu1 }
 0x295   : > { %v6423_v62 = vpop.f32.mrb[89].mxu1 }
 0x296   : > { %v6424_v42 = vadd.f32 %v6423_v62, %v6422_v58  ;;  %v6425_v22 = vpop.f32.mrb[90].mxu1 }
 0x297   : > { %v6426_v37 = vpop.f32.mrb[91].mxu1  ;;  %4530 = vmatmul.mubr.bf16.gmra.mrb[148].mxu0 %v7180_v4  ;;  %4579 = vmatmul.mubr.bf16.vlgmr.msra.gmra.mrb[152].mxu1 %v7177_v17  ;;  %v7195_v17 = vld [vmem:[%s7590_s16 + $0x25c] ss:$68 sps:$4 sm:$0xff]  }
 0x298   : > { %v9732_v23 = vadd.f32 %v6424_v42, %v9556_v15  ;;  %v6427_v44 = vadd.f32 %v6426_v37, %v6425_v22  ;;  %4537 = vmatprep.mubr.bf16.mxu0 %v7181_v6  ;;  %4586 = vmatprep.mubr.bf16.mxu1 %v7183_v36 }
 0x29a   : > { %v9735_v0 = vadd.f32 %v6427_v44, %v9567_v11 }
 0x29c   : > { %v6428_v59 = vpop.f32.mrb[92].mxu1 }
 0x29d   : > { %v6429_v57 = vpop.f32.mrb[93].mxu1 }
 0x29e   : > { %v6430_v52 = vadd.f32 %v6429_v57, %v6428_v59  ;;  %v6431_v25 = vpop.f32.mrb[94].mxu1  ;;  %v7197_v59 = vld [vmem:[%s7590_s16 + $0x258] ss:$68 sps:$4 sm:$0xff]  }
 0x29f   : > { %v6432_v48 = vpop.f32.mrb[95].mxu1  ;;  %4538 = vmatmul.mubr.bf16.gmra.mrb[152].mxu0 %v7185_v33  ;;  %4587 = vmatmul.mubr.bf16.gmra.mrb[156].mxu1 %v7186_v35 }
 0x2a0   : > { %v9741_v15 = vadd.f32 %v6430_v52, %v9578_v54  ;;  %v6433_v29 = vadd.f32 %v6432_v48, %v6431_v25  ;;  %4594 = vmatprep.mubr.bf16.mxu1 %v7187_v24  ;;  %6794 = vmatprep.mubr.msk.bf16.mxu0 %vm7363_vm0, %v7362_v39  ;;  %v7198_v24 = vld [vmem:[%s7590_s16 + $0x150] ss:$68 sps:$4 sm:$0xff]   ;;  %v7199_v52 = vld [vmem:[%s7590_s16 + $0x2e4] ss:$68 sps:$4 sm:$0xff]  }
 0x2a2   : > { %v9746_v11 = vadd.f32 %v6433_v29, %v9589_v51 }
 0x2a4   : > { %v6434_v12 = vpop.f32.mrb[96].mxu1  ;;  %v6468_v19 = vpop.f32.mrb[68].mxu0 }
 0x2a5   : > { %v6435_v28 = vpop.f32.mrb[97].mxu1  ;;  %v6469_v63 = vpop.f32.mrb[69].mxu0 }
 0x2a6   : > { %v6436_v61 = vadd.f32 %v6435_v28, %v6434_v12  ;;  %v6470_v54 = vadd.f32 %v6469_v63, %v6468_v19  ;;  %v6437_v10 = vpop.f32.mrb[98].mxu1  ;;  %v6471_v49 = vpop.f32.mrb[70].mxu0 }
 0x2a7   : > { %v6438_v21 = vpop.f32.mrb[99].mxu1  ;;  %v6472_v53 = vpop.f32.mrb[71].mxu0  ;;  %4595 = vmatmul.mubr.bf16.gmra.mrb[160].mxu1 %v7189_v40  ;;  %6795 = vmatmul.mubr.msk.bf16.vlgmr.msra.gmra.mrb[156].mxu0 %vm3665_vm1, %v7190_v31 }
 0x2a8   : > { %v9753_v51 = vadd.f32 %v6436_v61, %v9609_v56  ;;  %v9756_v16 = vadd.f32 %v6470_v54, %v9600_v13  ;;  %v6439_v55 = vadd.f32 %v6438_v21, %v6437_v10  ;;  %v6473_v32 = vadd.f32 %v6472_v53, %v6471_v49  ;;  %4602 = vmatprep.mubr.bf16.mxu1 %v7191_v7  ;;  %v7201_v54 = vld [vmem:[%s7590_s16 + $0x2e0] ss:$68 sps:$4 sm:$0xff]  }
 0x2a9   : > { %6798 = vmatprep.mubr.msk.bf16.mxu0 %vm7363_vm0, %v7362_v39 }
 0x2aa   : > { %v9761_v5 = vadd.f32 %v6439_v55, %v9617_v2  ;;  %v9764_v34 = vadd.f32 %v6473_v32, %v9614_v30 }
 0x2ac   : > { %v6440_v45 = vpop.f32.mrb[100].mxu1  ;;  %v6474_v56 = vpop.f32.mrb[72].mxu0 }
 0x2ad   : > { %v6441_v4 = vpop.f32.mrb[101].mxu1  ;;  %v6475_v13 = vpop.f32.mrb[73].mxu0 }
 0x2ae   : > { %v6442_v58 = vadd.f32 %v6441_v4, %v6440_v45  ;;  %v6476_v6 = vadd.f32 %v6475_v13, %v6474_v56  ;;  %v6443_v36 = vpop.f32.mrb[102].mxu1  ;;  %v6477_v62 = vpop.f32.mrb[74].mxu0  ;;  %v7207_v56 = vld [vmem:[%s7590_s16 + $0x3f4] ss:$68 sps:$4 sm:$0xff]  }
 0x2af   : > { %v6444_v42 = vpop.f32.mrb[103].mxu1  ;;  %v6478_v2 = vpop.f32.mrb[75].mxu0  ;;  %4603 = vmatmul.mubr.bf16.gmra.mrb[164].mxu1 %v7193_v50  ;;  %6799 = vmatmul.mubr.msk.bf16.gmra.mrb[160].mxu0 %vm3665_vm1, %v7194_v47  ;;  %v7205_v50 = vld [vmem:[%s7590_s16 + $0x368] ss:$68 sps:$4 sm:$0xff]   ;;  %v7206_v47 = vld [vmem:[%s7590_s16 + $0x260] ss:$68 sps:$4 sm:$0xff]  }
 0x2b0   : > { %v9771_v30 = vadd.f32 %v6442_v58, %v9637_v18  ;;  %v9774_v22 = vadd.f32 %v6476_v6, %v9628_v60  ;;  %v6445_v37 = vadd.f32 %v6444_v42, %v6443_v36  ;;  %v6479_v44 = vadd.f32 %v6478_v2, %v6477_v62  ;;  %4610 = vmatprep.mubr.bf16.mxu1 %v7195_v17  ;;  %v7209_v36 = vld [vmem:[%s7590_s16 + $0x3f0] ss:$68 sps:$4 sm:$0xff]   ;;  %v7210_v62 = vld [vmem:[%s7590_s16 + $0x2e8] ss:$68 sps:$4 sm:$0xff]   ;;  %v7211_v2 = vld [vmem:[%s7590_s16 + $0x47c] ss:$68 sps:$4 sm:$0xff]  }
 0x2b1   : > { %6802 = vmatprep.mubr.msk.bf16.mxu0 %vm7363_vm0, %v7362_v39 }
 0x2b2   : > { %v9779_v33 = vadd.f32 %v6445_v37, %v9645_v38  ;;  %v9782_v35 = vadd.f32 %v6479_v44, %v9642_v46 }
 0x2b4   : > { %v6446_v57 = vpop.f32.mrb[104].mxu1  ;;  %v6480_v18 = vpop.f32.mrb[76].mxu0 }
 0x2b5   : > { %v6447_v25 = vpop.f32.mrb[105].mxu1  ;;  %v6481_v60 = vpop.f32.mrb[77].mxu0 }
 0x2b6   : > { %v6448_v48 = vadd.f32 %v6447_v25, %v6446_v57  ;;  %v6482_v29 = vadd.f32 %v6481_v60, %v6480_v18  ;;  %v6449_v40 = vpop.f32.mrb[106].mxu1  ;;  %v6483_v31 = vpop.f32.mrb[78].mxu0  ;;  %v7213_v18 = vld [vmem:[%s7590_s16 + $0x478] ss:$68 sps:$4 sm:$0xff]   ;;  %v7215_v60 = vld [vmem:[%s7590_s16 + $0x504] ss:$68 sps:$4 sm:$0xff]  }
 0x2b7   : > { %v6450_v12 = vpop.f32.mrb[107].mxu1  ;;  %v6484_v38 = vpop.f32.mrb[79].mxu0  ;;  %4611 = vmatmul.mubr.bf16.gmra.mrb[168].mxu1 %v7197_v59  ;;  %6803 = vmatmul.mubr.msk.bf16.gmra.mrb[164].mxu0 %vm3665_vm1, %v7198_v24 }
 0x2b8   : > { %v9789_v46 = vadd.f32 %v6448_v48, %v9665_v20  ;;  %v9792_v19 = vadd.f32 %v6482_v29, %v9656_v26  ;;  %v6451_v7 = vadd.f32 %v6450_v12, %v6449_v40  ;;  %v6485_v28 = vadd.f32 %v6484_v38, %v6483_v31  ;;  %4618 = vmatprep.mubr.bf16.mxu1 %v7199_v52  ;;  %v7202_v20 = vld [vmem:[%s7590_s16 + $0x1d8] ss:$68 sps:$4 sm:$0xff]   ;;  %v7203_v26 = vld [vmem:[%s7590_s16 + $0x36c] ss:$68 sps:$4 sm:$0xff]   ;;  %v7217_v38 = vld [vmem:[%s7590_s16 + $0x500] ss:$68 sps:$4 sm:$0xff]  }
 0x2b9   : > { %6806 = vmatprep.mubr.msk.bf16.mxu0 %vm7363_vm0, %v7362_v39  ;;  %v7214_v52 = vld [vmem:[%s7590_s16 + $0x370] ss:$68 sps:$4 sm:$0xff]  }
 0x2ba   : > { %v9797_v63 = vadd.f32 %v6451_v7, %v9673_v1  ;;  %v9800_v61 = vadd.f32 %v6485_v28, %v9670_v41  ;;  %v7218_v7 = vld [vmem:[%s7590_s16 + $0x3f8] ss:$68 sps:$4 sm:$0xff]  }
 0x2bc   : > { %v6486_v10 = vpop.f32.mrb[80].mxu0 }
 0x2bd   : > { %v6487_v49 = vpop.f32.mrb[81].mxu0 }
 0x2be   : > { %v6488_v21 = vadd.f32 %v6487_v49, %v6486_v10  ;;  %v6489_v53 = vpop.f32.mrb[82].mxu0 }
 0x2bf   : > { %v6490_v55 = vpop.f32.mrb[83].mxu0  ;;  %4619 = vmatmul.mubr.bf16.gmra.mrb[172].mxu1 %v7201_v54  ;;  %6807 = vmatmul.mubr.msk.bf16.gmra.mrb[168].mxu0 %vm3665_vm1, %v7202_v20  ;;  %v7219_v54 = vld [vmem:[%s7590_s16 + $0x58c] ss:$68 sps:$4 sm:$0xff]  }
 0x2c0   : > { %v9807_v1 = vadd.f32 %v6488_v21, %v9684_v43  ;;  %v6491_v32 = vadd.f32 %v6490_v55, %v6489_v53  ;;  %4626 = vmatprep.mubr.bf16.mxu1 %v7203_v26  ;;  %6810 = vmatprep.mubr.msk.bf16.mxu0 %vm7363_vm0, %v7362_v39  ;;  %v7221_v53 = vld [vmem:[%s7590_s16 + $0x588] ss:$68 sps:$4 sm:$0xff]   ;;  %v7222_v55 = vld [vmem:[%s7590_s16 + $0x480] ss:$68 sps:$4 sm:$0xff]  }
 0x2c2   : > { %v9812_v41 = vadd.f32 %v6491_v32, %v9695_v9 }
 0x2c4   : > { %v6492_v45 = vpop.f32.mrb[84].mxu0 }
 0x2c5   : > { %v6493_v17 = vpop.f32.mrb[85].mxu0 }
 0x2c6   : > { %v6494_v4 = vadd.f32 %v6493_v17, %v6492_v45  ;;  %v6495_v13 = vpop.f32.mrb[86].mxu0 }
 0x2c7   : > { %v6496_v43 = vpop.f32.mrb[87].mxu0  ;;  %4627 = vmatmul.mubr.bf16.gmra.mrb[176].mxu1 %v7205_v50  ;;  %6811 = vmatmul.mubr.msk.bf16.gmra.mrb[172].mxu0 %vm3665_vm1, %v7206_v47 }
 0x2c8   : > { %v9819_v58 = vadd.f32 %v6494_v4, %v9706_v8  ;;  %v6497_v6 = vadd.f32 %v6496_v43, %v6495_v13  ;;  %4634 = vmatprep.mubr.bf16.mxu1 %v7207_v56  ;;  %6814 = vmatprep.mubr.msk.bf16.mxu0 %vm7363_vm0, %v7362_v39  ;;  %v7223_v4 = vld [vmem:[%s7590_s16 + $0x508] ss:$68 sps:$4 sm:$0xff]  }
 0x2ca   : > { %v9824_v9 = vadd.f32 %v6497_v6, %v9715_v27 }
 0x2cc   : > { %v6498_v42 = vpop.f32.mrb[88].mxu0 }
 0x2cd   : > { %v6499_v37 = vpop.f32.mrb[89].mxu0 }
 0x2ce   : > { %v6500_v44 = vadd.f32 %v6499_v37, %v6498_v42  ;;  %v6501_v59 = vpop.f32.mrb[90].mxu0 }
 0x2cf   : > { %v6502_v8 = vpop.f32.mrb[91].mxu0  ;;  %4635 = vmatmul.mubr.bf16.gmra.mrb[180].mxu1 %v7209_v36  ;;  %6815 = vmatmul.mubr.msk.bf16.gmra.mrb[176].mxu0 %vm3665_vm1, %v7210_v62 }
 0x2d0   : > { %v9831_v24 = vadd.f32 %v6500_v44, %v9722_v3  ;;  %v6503_v57 = vadd.f32 %v6502_v8, %v6501_v59  ;;  %4642 = vmatprep.mubr.bf16.mxu1 %v7211_v2  ;;  %6818 = vmatprep.mubr.msk.bf16.mxu0 %vm7363_vm0, %v7362_v39 }
 0x2d2   : > { %v9836_v27 = vadd.f32 %v6503_v57, %v9725_v14 }
 0x2d4   : > { %v6504_v25 = vpop.f32.mrb[92].mxu0 }
 0x2d5   : > { %v6505_v48 = vpop.f32.mrb[93].mxu0 }
 0x2d6   : > { %v6506_v29 = vadd.f32 %v6505_v48, %v6504_v25  ;;  %v6507_v40 = vpop.f32.mrb[94].mxu0 }
 0x2d7   : > { %v6508_v3 = vpop.f32.mrb[95].mxu0  ;;  %4643 = vmatmul.mubr.bf16.gmra.mrb[184].mxu1 %v7213_v18  ;;  %6819 = vmatmul.mubr.msk.bf16.gmra.mrb[180].mxu0 %vm3665_vm1, %v7214_v52 }
 0x2d8   : > { %v9843_v31 = vadd.f32 %v6506_v29, %v9732_v23  ;;  %v6509_v12 = vadd.f32 %v6508_v3, %v6507_v40  ;;  %4650 = vmatprep.mubr.bf16.mxu1 %v7215_v60  ;;  %6822 = vmatprep.mubr.msk.bf16.mxu0 %vm7363_vm0, %v7362_v39 }
 0x2da   : > { %v9848_v14 = vadd.f32 %v6509_v12, %v9735_v0 }
 0x2dc   : > { %v6510_v28 = vpop.f32.mrb[96].mxu0 }
 0x2dd   : > { %v6511_v20 = vpop.f32.mrb[97].mxu0 }
 0x2de   : > { %v6512_v10 = vadd.f32 %v6511_v20, %v6510_v28  ;;  %v6513_v26 = vpop.f32.mrb[98].mxu0 }
 0x2df   : > { %v6514_v49 = vpop.f32.mrb[99].mxu0  ;;  %4651 = vmatmul.mubr.bf16.gmra.mrb[188].mxu1 %v7217_v38  ;;  %6823 = vmatmul.mubr.msk.bf16.gmra.mrb[184].mxu0 %vm3665_vm1, %v7218_v7 }
 0x2e0   : > { %v9855_v23 = vadd.f32 %v6512_v10, %v9741_v15  ;;  %v6515_v21 = vadd.f32 %v6514_v49, %v6513_v26  ;;  %4658 = vmatprep.mubr.bf16.mxu1 %v7219_v54  ;;  %6826 = vmatprep.mubr.msk.bf16.mxu0 %vm7363_vm0, %v7362_v39 }
 0x2e2   : > { %v9860_v0 = vadd.f32 %v6515_v21, %v9746_v11 }
 0x2e4   : > { %v6516_v32 = vpop.f32.mrb[100].mxu0 }
 0x2e5   : > { %v6517_v50 = vpop.f32.mrb[101].mxu0 }
 0x2e6   : > { %v6518_v47 = vadd.f32 %v6517_v50, %v6516_v32  ;;  %v6519_v45 = vpop.f32.mrb[102].mxu0 }
 0x2e7   : > { %v6520_v56 = vpop.f32.mrb[103].mxu0  ;;  %4659 = vmatmul.mubr.bf16.gmra.mrb[192].mxu1 %v7221_v53  ;;  %6827 = vmatmul.mubr.msk.bf16.gmra.mrb[188].mxu0 %vm3665_vm1, %v7222_v55 }
 0x2e8   : > { %v9866_v15 = vadd.f32 %v6518_v47, %v9753_v51  ;;  %v6521_v17 = vadd.f32 %v6520_v56, %v6519_v45  ;;  %6830 = vmatprep.mubr.msk.bf16.mxu0 %vm7363_vm0, %v7362_v39 }
 0x2ea   : > { %v9871_v11 = vadd.f32 %v6521_v17, %v9761_v5  ;;  %v7224_v5 = vld [vmem:[%s7590_s16 + $0x590] ss:$68 sps:$4 sm:$0xff]   ;;  %s285_s16 = sand.u32 1, %s7319_s18  }
 0x2eb   : > { %s6854_s17 = smul.u32 176, %s285_s16 }
 0x2ec   : > { %v6522_v13 = vpop.f32.mrb[104].mxu0 }
 0x2ed   : > { %v6523_v43 = vpop.f32.mrb[105].mxu0  ;;  %s9962_s18 = scalar_lea.vmem [#allocation2], %s6854_s17  }
 0x2ee   : > { %v6524_v6 = vadd.f32 %v6523_v43, %v6522_v13  ;;  %v6525_v36 = vpop.f32.mrb[106].mxu0 }
 0x2ef   : > { %v6526_v62 = vpop.f32.mrb[107].mxu0  ;;  %6831 = vmatmul.mubr.msk.bf16.gmra.mrb[192].mxu0 %vm3665_vm1, %v7223_v4 }
 0x2f0   : > { %v9876_v42 = vadd.f32 %v6524_v6, %v9771_v30  ;;  %v6527_v51 = vadd.f32 %v6526_v62, %v6525_v36  ;;  %6834 = vmatprep.mubr.msk.bf16.mxu0 %vm7363_vm0, %v7362_v39 }
 0x2f2   : > { %v9881_v2 = vadd.f32 %v6527_v51, %v9779_v33 }
 0x2f4   : > { %v6528_v37 = vpop.f32.mrb[108].mxu0 }
 0x2f5   : > { %v6529_v44 = vpop.f32.mrb[109].mxu0 }
 0x2f6   : > { %v6530_v59 = vadd.f32 %v6529_v44, %v6528_v37  ;;  %v6531_v8 = vpop.f32.mrb[110].mxu0 }
 0x2f7   : > { %v6532_v57 = vpop.f32.mrb[111].mxu0  ;;  %6835 = vmatmul.mubr.msk.bf16.gmra.mrb[196].mxu0 %vm3665_vm1, %v7224_v5 }
 0x2f8   : > { %v9886_v18 = vadd.f32 %v6530_v59, %v9789_v46  ;;  %v6533_v30 = vadd.f32 %v6532_v57, %v6531_v8 }
 0x2fa   : > { %v9889_v52 = vadd.f32 %v6533_v30, %v9797_v63 }
 0x312   : > { %v6550_v25 = vpop.f32.mrb[108].mxu1 }
 0x313   : > { %v6551_v39 = vpop.f32.mrb[109].mxu1 }
 0x314   : > { %v6552_v60 = vadd.f32 %v6551_v39, %v6550_v25  ;;  %v6553_v33 = vpop.f32.mrb[110].mxu1 }
 0x315   : > { %v6554_v48 = vpop.f32.mrb[111].mxu1 }
 0x316   : > { %v4339_v29 = vadd.f32 %v6552_v60, %v9756_v16  ;;  %v6555_v40 = vadd.f32 %v6554_v48, %v6553_v33 }
 0x318   : > { %v4342_v3 = vadd.f32 %v6555_v40, %v9764_v34 }
 0x31a   : > { %v6556_v12 = vpop.f32.mrb[112].mxu1 }
 0x31b   : > { %v6557_v38 = vpop.f32.mrb[113].mxu1 }
 0x31c   : > { %v6558_v7 = vadd.f32 %v6557_v38, %v6556_v12  ;;  %v6559_v28 = vpop.f32.mrb[114].mxu1 }
 0x31d   : > { %v6560_v46 = vpop.f32.mrb[115].mxu1 }
 0x31e   : > { %v4347_v54 = vadd.f32 %v6558_v7, %v9774_v22  ;;  %v6561_v20 = vadd.f32 %v6560_v46, %v6559_v28 }
 0x320   : > { %v4350_v63 = vadd.f32 %v6561_v20, %v9782_v35 }
 0x322   : > { %v6562_v10 = vpop.f32.mrb[116].mxu1  ;;  %v6632_v26 = vpop.f32.mrb[112].mxu0 }
 0x323   : > { %v6563_v49 = vpop.f32.mrb[117].mxu1  ;;  %v6633_v21 = vpop.f32.mrb[113].mxu0 }
 0x324   : > { %v6564_v53 = vadd.f32 %v6563_v49, %v6562_v10  ;;  %v6634_v55 = vadd.f32 %v6633_v21, %v6632_v26  ;;  %v6565_v16 = vpop.f32.mrb[118].mxu1  ;;  %v6635_v32 = vpop.f32.mrb[114].mxu0 }
 0x325   : > { %v6566_v50 = vpop.f32.mrb[119].mxu1  ;;  %v6636_v34 = vpop.f32.mrb[115].mxu0 }
 0x326   : > { %v4355_v47 = vadd.f32 %v6564_v53, %v9792_v19  ;;  %v9896_v45 = vadd.f32 %v6634_v55, %v4339_v29  ;;  %v6567_v56 = vadd.f32 %v6566_v50, %v6565_v16  ;;  %v6637_v17 = vadd.f32 %v6636_v34, %v6635_v32 }
 0x328   : > { %v4358_v22 = vadd.f32 %v6567_v56, %v9800_v61  ;;  %v9899_v4 = vadd.f32 %v6637_v17, %v4342_v3 }
 0x32a   : > { %v6568_v35 = vpop.f32.mrb[120].mxu1  ;;  %v6638_v13 = vpop.f32.mrb[116].mxu0 }
 0x32b   : > { %v6569_v43 = vpop.f32.mrb[121].mxu1  ;;  %v6639_v6 = vpop.f32.mrb[117].mxu0 }
 0x32c   : > { %v6570_v36 = vadd.f32 %v6569_v43, %v6568_v35  ;;  %v6640_v62 = vadd.f32 %v6639_v6, %v6638_v13  ;;  %v6571_v51 = vpop.f32.mrb[122].mxu1  ;;  %v6641_v5 = vpop.f32.mrb[118].mxu0 }
 0x32d   : > { %v6572_v37 = vpop.f32.mrb[123].mxu1  ;;  %v6642_v44 = vpop.f32.mrb[119].mxu0 }
 0x32e   : > { %v4363_v19 = vadd.f32 %v6570_v36, %v9807_v1  ;;  %v9902_v59 = vadd.f32 %v6640_v62, %v4347_v54  ;;  %v6573_v8 = vadd.f32 %v6572_v37, %v6571_v51  ;;  %v6643_v57 = vadd.f32 %v6642_v44, %v6641_v5 }
 0x330   : > { %v4366_v61 = vadd.f32 %v6573_v8, %v9812_v41  ;;  %v9905_v30 = vadd.f32 %v6643_v57, %v4350_v63 }
 0x332   : > { %v6574_v25 = vpop.f32.mrb[124].mxu1  ;;  %v6644_v39 = vpop.f32.mrb[120].mxu0 }
 0x333   : > { %v6575_v60 = vpop.f32.mrb[125].mxu1  ;;  %v6645_v33 = vpop.f32.mrb[121].mxu0 }
 0x334   : > { %v6576_v48 = vadd.f32 %v6575_v60, %v6574_v25  ;;  %v6646_v29 = vadd.f32 %v6645_v33, %v6644_v39  ;;  %v6577_v40 = vpop.f32.mrb[126].mxu1  ;;  %v6647_v3 = vpop.f32.mrb[122].mxu0 }
 0x335   : > { %v6578_v12 = vpop.f32.mrb[127].mxu1  ;;  %v6648_v38 = vpop.f32.mrb[123].mxu0 }
 0x336   : > { %v4371_v1 = vadd.f32 %v6576_v48, %v9819_v58  ;;  %v9908_v7 = vadd.f32 %v6646_v29, %v4355_v47  ;;  %v6579_v28 = vadd.f32 %v6578_v12, %v6577_v40  ;;  %v6649_v46 = vadd.f32 %v6648_v38, %v6647_v3 }
 0x338   : > { %v4374_v41 = vadd.f32 %v6579_v28, %v9824_v9  ;;  %v9911_v54 = vadd.f32 %v6649_v46, %v4358_v22 }
 0x33a   : > { %v6580_v20 = vpop.f32.mrb[128].mxu1  ;;  %v6650_v63 = vpop.f32.mrb[124].mxu0 }
 0x33b   : > { %v6581_v10 = vpop.f32.mrb[129].mxu1  ;;  %v6651_v26 = vpop.f32.mrb[125].mxu0 }
 0x33c   : > { %v6582_v49 = vadd.f32 %v6581_v10, %v6580_v20  ;;  %v6652_v21 = vadd.f32 %v6651_v26, %v6650_v63  ;;  %v6583_v53 = vpop.f32.mrb[130].mxu1  ;;  %v6653_v55 = vpop.f32.mrb[126].mxu0 }
 0x33d   : > { %v6584_v16 = vpop.f32.mrb[131].mxu1  ;;  %v6654_v32 = vpop.f32.mrb[127].mxu0 }
 0x33e   : > { %v4379_v58 = vadd.f32 %v6582_v49, %v9831_v24  ;;  %v9914_v50 = vadd.f32 %v6652_v21, %v4363_v19  ;;  %v6585_v34 = vadd.f32 %v6584_v16, %v6583_v53  ;;  %v6655_v47 = vadd.f32 %v6654_v32, %v6653_v55 }
 0x340   : > { %v4382_v9 = vadd.f32 %v6585_v34, %v9836_v27  ;;  %v9917_v56 = vadd.f32 %v6655_v47, %v4366_v61 }
 0x342   : > { %v6586_v17 = vpop.f32.mrb[132].mxu1  ;;  %v6656_v22 = vpop.f32.mrb[128].mxu0 }
 0x343   : > { %v6587_v35 = vpop.f32.mrb[133].mxu1  ;;  %v6657_v13 = vpop.f32.mrb[129].mxu0 }
 0x344   : > { %v6588_v43 = vadd.f32 %v6587_v35, %v6586_v17  ;;  %v6658_v6 = vadd.f32 %v6657_v13, %v6656_v22  ;;  %v6589_v36 = vpop.f32.mrb[134].mxu1  ;;  %v6659_v62 = vpop.f32.mrb[130].mxu0 }
 0x345   : > { %v6590_v51 = vpop.f32.mrb[135].mxu1  ;;  %v6660_v5 = vpop.f32.mrb[131].mxu0 }
 0x346   : > { %v4387_v24 = vadd.f32 %v6588_v43, %v9843_v31  ;;  %v9920_v37 = vadd.f32 %v6658_v6, %v4371_v1  ;;  %v6591_v44 = vadd.f32 %v6590_v51, %v6589_v36  ;;  %v6661_v19 = vadd.f32 %v6660_v5, %v6659_v62 }
 0x348   : > { %v4390_v27 = vadd.f32 %v6591_v44, %v9848_v14  ;;  %v9923_v8 = vadd.f32 %v6661_v19, %v4374_v41 }
 0x34a   : > { %v6592_v57 = vpop.f32.mrb[136].mxu1  ;;  %v6662_v61 = vpop.f32.mrb[132].mxu0 }
 0x34b   : > { %v6593_v25 = vpop.f32.mrb[137].mxu1  ;;  %v6663_v39 = vpop.f32.mrb[133].mxu0 }
 0x34c   : > { %v6594_v60 = vadd.f32 %v6593_v25, %v6592_v57  ;;  %v6664_v33 = vadd.f32 %v6663_v39, %v6662_v61  ;;  %v6595_v48 = vpop.f32.mrb[138].mxu1  ;;  %v6665_v29 = vpop.f32.mrb[134].mxu0 }
 0x34d   : > { %v6596_v40 = vpop.f32.mrb[139].mxu1  ;;  %v6666_v3 = vpop.f32.mrb[135].mxu0 }
 0x34e   : > { %v4395_v31 = vadd.f32 %v6594_v60, %v9855_v23  ;;  %v9926_v12 = vadd.f32 %v6664_v33, %v4379_v58  ;;  %v6597_v38 = vadd.f32 %v6596_v40, %v6595_v48  ;;  %v6667_v1 = vadd.f32 %v6666_v3, %v6665_v29 }
 0x350   : > { %v4398_v14 = vadd.f32 %v6597_v38, %v9860_v0  ;;  %v9929_v28 = vadd.f32 %v6667_v1, %v4382_v9 }
 0x352   : > { %v6598_v46 = vpop.f32.mrb[140].mxu1  ;;  %v6668_v41 = vpop.f32.mrb[136].mxu0 }
 0x353   : > { %v6599_v20 = vpop.f32.mrb[141].mxu1  ;;  %v6669_v63 = vpop.f32.mrb[137].mxu0 }
 0x354   : > { %v6600_v10 = vadd.f32 %v6599_v20, %v6598_v46  ;;  %v6670_v26 = vadd.f32 %v6669_v63, %v6668_v41  ;;  %v6601_v49 = vpop.f32.mrb[142].mxu1  ;;  %v6671_v21 = vpop.f32.mrb[138].mxu0 }
 0x355   : > { %v6602_v53 = vpop.f32.mrb[143].mxu1  ;;  %v6672_v55 = vpop.f32.mrb[139].mxu0 }
 0x356   : > { %v4403_v23 = vadd.f32 %v6600_v10, %v9866_v15  ;;  %v9932_v16 = vadd.f32 %v6670_v26, %v4387_v24  ;;  %v6603_v32 = vadd.f32 %v6602_v53, %v6601_v49  ;;  %v6673_v58 = vadd.f32 %v6672_v55, %v6671_v21 }
 0x358   : > { %v4406_v0 = vadd.f32 %v6603_v32, %v9871_v11  ;;  %v9935_v34 = vadd.f32 %v6673_v58, %v4390_v27 }
 0x35a   : > { %v6604_v47 = vpop.f32.mrb[144].mxu1  ;;  %v6674_v9 = vpop.f32.mrb[140].mxu0 }
 0x35b   : > { %v6605_v17 = vpop.f32.mrb[145].mxu1  ;;  %v6675_v22 = vpop.f32.mrb[141].mxu0 }
 0x35c   : > { %v6606_v35 = vadd.f32 %v6605_v17, %v6604_v47  ;;  %v6676_v13 = vadd.f32 %v6675_v22, %v6674_v9  ;;  %v6607_v43 = vpop.f32.mrb[146].mxu1  ;;  %v6677_v6 = vpop.f32.mrb[142].mxu0 }
 0x35d   : > { %v6608_v36 = vpop.f32.mrb[147].mxu1  ;;  %v6678_v62 = vpop.f32.mrb[143].mxu0 }
 0x35e   : > { %v4411_v15 = vadd.f32 %v6606_v35, %v9876_v42  ;;  %v9938_v51 = vadd.f32 %v6676_v13, %v4395_v31  ;;  %v6609_v5 = vadd.f32 %v6608_v36, %v6607_v43  ;;  %v6679_v24 = vadd.f32 %v6678_v62, %v6677_v6 }
 0x360   : > { %v4414_v11 = vadd.f32 %v6609_v5, %v9881_v2  ;;  %v9941_v44 = vadd.f32 %v6679_v24, %v4398_v14 }
 0x362   : > { %v6610_v19 = vpop.f32.mrb[148].mxu1  ;;  %v6680_v27 = vpop.f32.mrb[144].mxu0 }
 0x363   : > { %v6611_v57 = vpop.f32.mrb[149].mxu1  ;;  %v6681_v61 = vpop.f32.mrb[145].mxu0 }
 0x364   : > { %v6612_v25 = vadd.f32 %v6611_v57, %v6610_v19  ;;  %v6682_v39 = vadd.f32 %v6681_v61, %v6680_v27  ;;  %v6613_v60 = vpop.f32.mrb[150].mxu1  ;;  %v6683_v33 = vpop.f32.mrb[146].mxu0 }
 0x365   : > { %v6614_v48 = vpop.f32.mrb[151].mxu1  ;;  %v6684_v29 = vpop.f32.mrb[147].mxu0 }
 0x366   : > { %v4419_v42 = vadd.f32 %v6612_v25, %v9886_v18  ;;  %v9944_v40 = vadd.f32 %v6682_v39, %v4403_v23  ;;  %v6615_v3 = vadd.f32 %v6614_v48, %v6613_v60  ;;  %v6685_v31 = vadd.f32 %v6684_v29, %v6683_v33 }
 0x368   : > { %v4422_v2 = vadd.f32 %v6615_v3, %v9889_v52  ;;  %v9947_v38 = vadd.f32 %v6685_v31, %v4406_v0 }
 0x36a   : > { %v6686_v1 = vpop.f32.mrb[148].mxu0  ;;  %v6714_v14 = vpop.f32.mrb[152].mxu1 }
 0x36b   : > { %v6687_v46 = vpop.f32.mrb[149].mxu0  ;;  %v6715_v41 = vpop.f32.mrb[153].mxu1 }
 0x36c   : > { %v6688_v20 = vadd.f32 %v6687_v46, %v6686_v1  ;;  %v6716_v63 = vadd.f32 %v6715_v41, %v6714_v14  ;;  %v6689_v10 = vpop.f32.mrb[150].mxu0  ;;  %v6717_v26 = vpop.f32.mrb[154].mxu1 }
 0x36d   : > { %v6690_v49 = vpop.f32.mrb[151].mxu0  ;;  %v6718_v21 = vpop.f32.mrb[155].mxu1 }
 0x36e   : > { %v9949_v18 = vadd.f32 %v6688_v20, %v4411_v15  ;;  %v6691_v53 = vadd.f32 %v6690_v49, %v6689_v10  ;;  %v6719_v55 = vadd.f32 %v6718_v21, %v6717_v26  ;;  %v4581_v23 = vadd.f32 %v6716_v63, %v9896_v45 }
 0x370   : > { %v9952_v52 = vadd.f32 %v6691_v53, %v4414_v11  ;;  %v4584_v32 = vadd.f32 %v6719_v55, %v9899_v4 }
 0x372   : > { %v6692_v58 = vpop.f32.mrb[152].mxu0  ;;  %v6720_v0 = vpop.f32.mrb[156].mxu1 }
 0x373   : > { %v6693_v47 = vpop.f32.mrb[153].mxu0  ;;  %v6721_v9 = vpop.f32.mrb[157].mxu1 }
 0x374   : > { %v6694_v17 = vadd.f32 %v6693_v47, %v6692_v58  ;;  %v6722_v22 = vadd.f32 %v6721_v9, %v6720_v0  ;;  %v6695_v35 = vpop.f32.mrb[154].mxu0  ;;  %v6723_v13 = vpop.f32.mrb[158].mxu1 }
 0x375   : > { %v6696_v43 = vpop.f32.mrb[155].mxu0  ;;  %v6724_v6 = vpop.f32.mrb[159].mxu1 }
 0x376   : > { %v9956_v36 = vadd.f32 %v6694_v17, %v4419_v42  ;;  %v6697_v62 = vadd.f32 %v6696_v43, %v6695_v35  ;;  %v6725_v15 = vadd.f32 %v6724_v6, %v6723_v13  ;;  %v4589_v45 = vadd.f32 %v6722_v22, %v9902_v59 }
 0x378   : > { %v9959_v5 = vadd.f32 %v6697_v62, %v4422_v2  ;;  %v4592_v4 = vadd.f32 %v6725_v15, %v9905_v30 }
 0x37a   : > { %v6726_v24 = vpop.f32.mrb[160].mxu1  ;;  %v4701_v11 = vpop.f32.mrb[156].mxu0 }
 0x37b   : > { %v4702_v19 = vadd.f32 %v4701_v11, %v4581_v23  ;;  %v6727_v27 = vpop.f32.mrb[161].mxu1  ;;  %v6796_v57 = vpop.f32.mrb[157].mxu0 }
 0x37c   : > { %v6728_v61 = vadd.f32 %v6727_v27, %v6726_v24  ;;  %v6729_v25 = vpop.f32.mrb[162].mxu1  ;;  %v4704_v39 = vpop.f32.mrb[158].mxu0 }
 0x37d   : > { %4789 = vst.msk [vmem:[%s9962_s18] sm:$0xff] %vm4788_vm2, %v4702_v19  ;;  %v4705_v59 = vadd.f32 %v4704_v39, %v4584_v32  ;;  %v6730_v60 = vpop.f32.mrb[163].mxu1  ;;  %v4811_v33 = vsel %vm4788_vm2, %v4702_v19, 0.0  ;;  %v6797_v30 = vpop.f32.mrb[159].mxu0  ;;  %v4899_v31 = vmul.f32 %v4702_v19, %v4702_v19 }
 0x37e   : > { %v6731_v48 = vadd.f32 %v6730_v60, %v6729_v25  ;;  %4812 = vadd.xlane.f32.xlu0 %v4811_v33  ;;  %v4597_v29 = vadd.f32 %v6728_v61, %v9908_v7 }
 0x37f   : > { %4790 = vst.msk [vmem:[%s9962_s18 + $0x8] sm:$0xff] %vm4788_vm2, %v4705_v59  ;;  %v4814_v42 = vsel %vm4788_vm2, %v4705_v59, 0.0  ;;  %v4900_v3 = vmul.f32 %v4705_v59, %v4705_v59  ;;  %v4921_v7 = vsel %vm4788_vm2, %v4899_v31, 0.0 }
 0x380   : > { %4815 = vadd.xlane.f32.xlu1 %v4814_v42  ;;  %v4600_v2 = vadd.f32 %v6731_v48, %v9911_v54 }
 0x381   : > { %v4924_v1 = vsel %vm4788_vm2, %v4900_v3, 0.0 }
 0x382   : > { %v6732_v14 = vpop.f32.mrb[164].mxu1  ;;  %v4709_v46 = vpop.f32.mrb[160].mxu0  ;;  %4925 = vadd.xlane.f32.xlu0 %v4924_v1 }
 0x383   : > { %v4710_v41 = vadd.f32 %v4709_v46, %v4589_v45  ;;  %v6733_v20 = vpop.f32.mrb[165].mxu1  ;;  %v6800_v63 = vpop.f32.mrb[161].mxu0 }
 0x384   : > { %v6734_v10 = vadd.f32 %v6733_v20, %v6732_v14  ;;  %v6735_v26 = vpop.f32.mrb[166].mxu1  ;;  %v4712_v49 = vpop.f32.mrb[162].mxu0  ;;  %4922 = vadd.xlane.f32.xlu1 %v4921_v7 }
 0x385   : > { %4791 = vst.msk [vmem:[%s9962_s18 + $0x10] sm:$0xff] %vm4788_vm2, %v4710_v41  ;;  %v4713_v21 = vadd.f32 %v4712_v49, %v4592_v4  ;;  %v6736_v53 = vpop.f32.mrb[167].mxu1  ;;  %v4817_v54 = vsel %vm4788_vm2, %v4710_v41, 0.0  ;;  %v4901_v55 = vmul.f32 %v4710_v41, %v4710_v41  ;;  %v6801_v23 = vpop.f32.mrb[163].mxu0 }
 0x386   : > { %v6737_v32 = vadd.f32 %v6736_v53, %v6735_v26  ;;  %4818 = vadd.xlane.f32.xlu0 %v4817_v54  ;;  %v4605_v58 = vadd.f32 %v6734_v10, %v9914_v50 }
 0x387   : > { %4792 = vst.msk [vmem:[%s9962_s18 + $0x18] sm:$0xff] %vm4788_vm2, %v4713_v21  ;;  %v4927_v0 = vsel %vm4788_vm2, %v4901_v55, 0.0  ;;  %v4820_v9 = vsel %vm4788_vm2, %v4713_v21, 0.0  ;;  %v4902_v17 = vmul.f32 %v4713_v21, %v4713_v21 }
 0x388   : > { %4928 = vadd.xlane.f32.xlu1 %v4927_v0  ;;  %v4608_v47 = vadd.f32 %v6737_v32, %v9917_v56 }
 0x389   : > { %v4930_v56 = vsel %vm4788_vm2, %v4902_v17, 0.0 }
 0x38a   : > { %v6738_v22 = vpop.f32.mrb[168].mxu1  ;;  %v4717_v35 = vpop.f32.mrb[164].mxu0  ;;  %4821 = vadd.xlane.f32.xlu0 %v4820_v9 }
 0x38b   : > { %v4718_v13 = vadd.f32 %v4717_v35, %v4597_v29  ;;  %v6739_v43 = vpop.f32.mrb[169].mxu1  ;;  %v6804_v6 = vpop.f32.mrb[165].mxu0 }
 0x38c   : > { %v6740_v62 = vadd.f32 %v6739_v43, %v6738_v22  ;;  %v6741_v50 = vpop.f32.mrb[170].mxu1  ;;  %v4720_v15 = vpop.f32.mrb[166].mxu0 }
 0x38d   : > { %4793 = vst.msk [vmem:[%s9962_s18 + $0x20] sm:$0xff] %vm4788_vm2, %v4718_v13  ;;  %v4721_v45 = vadd.f32 %v4720_v15, %v4600_v2  ;;  %v6742_v4 = vpop.f32.mrb[171].mxu1  ;;  %v4823_v24 = vsel %vm4788_vm2, %v4718_v13, 0.0  ;;  %v6805_v11 = vpop.f32.mrb[167].mxu0  ;;  %v4903_v19 = vmul.f32 %v4718_v13, %v4718_v13 }
 0x38e   : > { %v6743_v27 = vadd.f32 %v6742_v4, %v6741_v50  ;;  %4824 = vadd.xlane.f32.xlu1 %v4823_v24  ;;  %4931 = vadd.xlane.f32.xlu0 %v4930_v56  ;;  %v4613_v57 = vadd.f32 %v6740_v62, %v9920_v37 }
 0x38f   : > { %4794 = vst.msk [vmem:[%s9962_s18 + $0x28] sm:$0xff] %vm4788_vm2, %v4721_v45  ;;  %v4933_v25 = vsel %vm4788_vm2, %v4903_v19, 0.0  ;;  %v4826_v39 = vsel %vm4788_vm2, %v4721_v45, 0.0  ;;  %v4904_v59 = vmul.f32 %v4721_v45, %v4721_v45 }
 0x390   : > { %v4616_v61 = vadd.f32 %v6743_v27, %v9923_v8 }
 0x391   : > { %v4936_v1 = vsel %vm4788_vm2, %v4904_v59, 0.0 }
 0x392   : > { %v6744_v60 = vpop.f32.mrb[172].mxu1  ;;  %v4725_v33 = vpop.f32.mrb[168].mxu0  ;;  %4934 = vadd.xlane.f32.xlu1 %v4933_v25  ;;  %4827 = vadd.xlane.f32.xlu0 %v4826_v39 }
 0x393   : > { %v4726_v30 = vadd.f32 %v4725_v33, %v4605_v58  ;;  %v6745_v48 = vpop.f32.mrb[173].mxu1  ;;  %v6808_v29 = vpop.f32.mrb[169].mxu0 }
 0x394   : > { %v6746_v42 = vadd.f32 %v6745_v48, %v6744_v60  ;;  %v6747_v37 = vpop.f32.mrb[174].mxu1  ;;  %v4728_v3 = vpop.f32.mrb[170].mxu0 }
 0x395   : > { %4795 = vst.msk [vmem:[%s9962_s18 + $0x30] sm:$0xff] %vm4788_vm2, %v4726_v30  ;;  %v4729_v31 = vadd.f32 %v4728_v3, %v4608_v47  ;;  %v6748_v8 = vpop.f32.mrb[175].mxu1  ;;  %v4829_v2 = vsel %vm4788_vm2, %v4726_v30, 0.0  ;;  %v6809_v14 = vpop.f32.mrb[171].mxu0  ;;  %v4905_v46 = vmul.f32 %v4726_v30, %v4726_v30 }
 0x396   : > { %v6749_v41 = vadd.f32 %v6748_v8, %v6747_v37  ;;  %4830 = vadd.xlane.f32.xlu1 %v4829_v2  ;;  %4937 = vadd.xlane.f32.xlu0 %v4936_v1  ;;  %v4621_v20 = vadd.f32 %v6746_v42, %v9926_v12 }
 0x397   : > { %4796 = vst.msk [vmem:[%s9962_s18 + $0x38] sm:$0xff] %vm4788_vm2, %v4729_v31  ;;  %v4939_v7 = vsel %vm4788_vm2, %v4905_v46, 0.0  ;;  %v4832_v10 = vsel %vm4788_vm2, %v4729_v31, 0.0  ;;  %v4906_v26 = vmul.f32 %v4729_v31, %v4729_v31 }
 0x398   : > { %v4624_v63 = vadd.f32 %v6749_v41, %v9929_v28 }
 0x399   : > { %v4942_v47 = vsel %vm4788_vm2, %v4906_v26, 0.0 }
 0x39a   : > { %v6750_v49 = vpop.f32.mrb[176].mxu1  ;;  %v4733_v21 = vpop.f32.mrb[172].mxu0  ;;  %4940 = vadd.xlane.f32.xlu1 %v4939_v7  ;;  %4833 = vadd.xlane.f32.xlu0 %v4832_v10 }
 0x39b   : > { %v4734_v53 = vadd.f32 %v4733_v21, %v4613_v57  ;;  %v6751_v54 = vpop.f32.mrb[177].mxu1  ;;  %v6812_v55 = vpop.f32.mrb[173].mxu0 }
 0x39c   : > { %v6752_v23 = vadd.f32 %v6751_v54, %v6750_v49  ;;  %v6753_v12 = vpop.f32.mrb[178].mxu1  ;;  %v4736_v32 = vpop.f32.mrb[174].mxu0 }
 0x39d   : > { %4797 = vst.msk [vmem:[%s9962_s18 + $0x40] sm:$0xff] %vm4788_vm2, %v4734_v53  ;;  %v4737_v58 = vadd.f32 %v4736_v32, %v4616_v61  ;;  %v6754_v28 = vpop.f32.mrb[179].mxu1  ;;  %v4835_v0 = vsel %vm4788_vm2, %v4734_v53, 0.0  ;;  %v6813_v9 = vpop.f32.mrb[175].mxu0  ;;  %v4907_v17 = vmul.f32 %v4734_v53, %v4734_v53 }
 0x39e   : > { %v6755_v22 = vadd.f32 %v6754_v28, %v6753_v12  ;;  %4836 = vadd.xlane.f32.xlu1 %v4835_v0  ;;  %4943 = vadd.xlane.f32.xlu0 %v4942_v47  ;;  %v4629_v35 = vadd.f32 %v6752_v23, %v9932_v16 }
 0x39f   : > { %4798 = vst.msk [vmem:[%s9962_s18 + $0x48] sm:$0xff] %vm4788_vm2, %v4737_v58  ;;  %v4945_v43 = vsel %vm4788_vm2, %v4907_v17, 0.0  ;;  %v4838_v6 = vsel %vm4788_vm2, %v4737_v58, 0.0  ;;  %v4908_v62 = vmul.f32 %v4737_v58, %v4737_v58 }
 0x3a0   : > { %v4632_v13 = vadd.f32 %v6755_v22, %v9935_v34 }
 0x3a1   : > { %v4948_v57 = vsel %vm4788_vm2, %v4908_v62, 0.0 }
 0x3a2   : > { %v6756_v50 = vpop.f32.mrb[180].mxu1  ;;  %v4741_v15 = vpop.f32.mrb[176].mxu0  ;;  %4946 = vadd.xlane.f32.xlu1 %v4945_v43  ;;  %4839 = vadd.xlane.f32.xlu0 %v4838_v6 }
 0x3a3   : > { %v4742_v45 = vadd.f32 %v4741_v15, %v4621_v20  ;;  %v6757_v4 = vpop.f32.mrb[181].mxu1  ;;  %v6816_v24 = vpop.f32.mrb[177].mxu0 }
 0x3a4   : > { %v6758_v56 = vadd.f32 %v6757_v4, %v6756_v50  ;;  %v6759_v16 = vpop.f32.mrb[182].mxu1  ;;  %v4744_v11 = vpop.f32.mrb[178].mxu0 }
 0x3a5   : > { %4799 = vst.msk [vmem:[%s9962_s18 + $0x50] sm:$0xff] %vm4788_vm2, %v4742_v45  ;;  %v4745_v19 = vadd.f32 %v4744_v11, %v4624_v63  ;;  %v6760_v34 = vpop.f32.mrb[183].mxu1  ;;  %v4841_v27 = vsel %vm4788_vm2, %v4742_v45, 0.0  ;;  %v6817_v61 = vpop.f32.mrb[179].mxu0  ;;  %v4909_v25 = vmul.f32 %v4742_v45, %v4742_v45 }
 0x3a6   : > { %v6761_v39 = vadd.f32 %v6760_v34, %v6759_v16  ;;  %4842 = vadd.xlane.f32.xlu1 %v4841_v27  ;;  %4949 = vadd.xlane.f32.xlu0 %v4948_v57  ;;  %v4637_v59 = vadd.f32 %v6758_v56, %v9938_v51 }
 0x3a7   : > { %4800 = vst.msk [vmem:[%s9962_s18 + $0x58] sm:$0xff] %vm4788_vm2, %v4745_v19  ;;  %v4951_v33 = vsel %vm4788_vm2, %v4909_v25, 0.0  ;;  %v4844_v30 = vsel %vm4788_vm2, %v4745_v19, 0.0  ;;  %v4910_v48 = vmul.f32 %v4745_v19, %v4745_v19 }
 0x3a8   : > { %v4640_v60 = vadd.f32 %v6761_v39, %v9941_v44 }
 0x3a9   : > { %v4954_v46 = vsel %vm4788_vm2, %v4910_v48, 0.0 }
 0x3aa   : > { %v6762_v29 = vpop.f32.mrb[184].mxu1  ;;  %v4749_v42 = vpop.f32.mrb[180].mxu0  ;;  %4952 = vadd.xlane.f32.xlu1 %v4951_v33  ;;  %4845 = vadd.xlane.f32.xlu0 %v4844_v30 }
 0x3ab   : > { %v4750_v37 = vadd.f32 %v4749_v42, %v4629_v35  ;;  %v6763_v3 = vpop.f32.mrb[185].mxu1  ;;  %v6820_v31 = vpop.f32.mrb[181].mxu0 }
 0x3ac   : > { %v6764_v8 = vadd.f32 %v6763_v3, %v6762_v29  ;;  %v6765_v51 = vpop.f32.mrb[186].mxu1  ;;  %v4752_v2 = vpop.f32.mrb[182].mxu0 }
 0x3ad   : > { %4801 = vst.msk [vmem:[%s9962_s18 + $0x60] sm:$0xff] %vm4788_vm2, %v4750_v37  ;;  %v4753_v1 = vadd.f32 %v4752_v2, %v4632_v13  ;;  %v6766_v44 = vpop.f32.mrb[187].mxu1  ;;  %v4847_v14 = vsel %vm4788_vm2, %v4750_v37, 0.0  ;;  %v6821_v41 = vpop.f32.mrb[183].mxu0  ;;  %v4911_v20 = vmul.f32 %v4750_v37, %v4750_v37 }
 0x3ae   : > { %v6767_v63 = vadd.f32 %v6766_v44, %v6765_v51  ;;  %4848 = vadd.xlane.f32.xlu1 %v4847_v14  ;;  %4955 = vadd.xlane.f32.xlu0 %v4954_v46  ;;  %v4645_v7 = vadd.f32 %v6764_v8, %v9944_v40 }
 0x3af   : > { %4802 = vst.msk [vmem:[%s9962_s18 + $0x68] sm:$0xff] %vm4788_vm2, %v4753_v1  ;;  %v4957_v26 = vsel %vm4788_vm2, %v4911_v20, 0.0  ;;  %v4850_v49 = vsel %vm4788_vm2, %v4753_v1, 0.0  ;;  %v4912_v21 = vmul.f32 %v4753_v1, %v4753_v1 }
 0x3b0   : > { %v4648_v10 = vadd.f32 %v6767_v63, %v9947_v38 }
 0x3b1   : > { %v4960_v47 = vsel %vm4788_vm2, %v4912_v21, 0.0 }
 0x3b2   : > { %v6768_v53 = vpop.f32.mrb[188].mxu1  ;;  %v4757_v54 = vpop.f32.mrb[184].mxu0  ;;  %4958 = vadd.xlane.f32.xlu1 %v4957_v26  ;;  %4851 = vadd.xlane.f32.xlu0 %v4850_v49 }
 0x3b3   : > { %v4758_v55 = vadd.f32 %v4757_v54, %v4637_v59  ;;  %v6769_v23 = vpop.f32.mrb[189].mxu1  ;;  %v6824_v12 = vpop.f32.mrb[185].mxu0 }
 0x3b4   : > { %v6770_v32 = vadd.f32 %v6769_v23, %v6768_v53  ;;  %v6771_v40 = vpop.f32.mrb[190].mxu1  ;;  %v4760_v58 = vpop.f32.mrb[186].mxu0 }
 0x3b5   : > { %4803 = vst.msk [vmem:[%s9962_s18 + $0x70] sm:$0xff] %vm4788_vm2, %v4758_v55  ;;  %v4761_v28 = vadd.f32 %v4760_v58, %v4640_v60  ;;  %v6772_v38 = vpop.f32.mrb[191].mxu1  ;;  %v4853_v0 = vsel %vm4788_vm2, %v4758_v55, 0.0  ;;  %v6825_v9 = vpop.f32.mrb[187].mxu0  ;;  %v4913_v17 = vmul.f32 %v4758_v55, %v4758_v55 }
 0x3b6   : > { %v6773_v22 = vadd.f32 %v6772_v38, %v6771_v40  ;;  %4854 = vadd.xlane.f32.xlu1 %v4853_v0  ;;  %4961 = vadd.xlane.f32.xlu0 %v4960_v47  ;;  %v4653_v35 = vadd.f32 %v6770_v32, %v9949_v18 }
 0x3b7   : > { %4804 = vst.msk [vmem:[%s9962_s18 + $0x78] sm:$0xff] %vm4788_vm2, %v4761_v28  ;;  %v4963_v43 = vsel %vm4788_vm2, %v4913_v17, 0.0  ;;  %v4856_v6 = vsel %vm4788_vm2, %v4761_v28, 0.0  ;;  %v4914_v62 = vmul.f32 %v4761_v28, %v4761_v28 }
 0x3b8   : > { %v4656_v13 = vadd.f32 %v6773_v22, %v9952_v52 }
 0x3b9   : > { %v4966_v34 = vsel %vm4788_vm2, %v4914_v62, 0.0 }
 0x3ba   : > { %v6774_v50 = vpop.f32.mrb[192].mxu1  ;;  %v4765_v15 = vpop.f32.mrb[188].mxu0  ;;  %4964 = vadd.xlane.f32.xlu1 %v4963_v43  ;;  %4857 = vadd.xlane.f32.xlu0 %v4856_v6 }
 0x3bb   : > { %v4766_v45 = vadd.f32 %v4765_v15, %v4645_v7  ;;  %v6775_v4 = vpop.f32.mrb[193].mxu1  ;;  %v6828_v24 = vpop.f32.mrb[189].mxu0 }
 0x3bc   : > { %v6776_v56 = vadd.f32 %v6775_v4, %v6774_v50  ;;  %v6777_v18 = vpop.f32.mrb[194].mxu1  ;;  %v4768_v16 = vpop.f32.mrb[190].mxu0 }
 0x3bd   : > { %4805 = vst.msk [vmem:[%s9962_s18 + $0x80] sm:$0xff] %vm4788_vm2, %v4766_v45  ;;  %v4769_v11 = vadd.f32 %v4768_v16, %v4648_v10  ;;  %v6778_v52 = vpop.f32.mrb[195].mxu1  ;;  %v4859_v19 = vsel %vm4788_vm2, %v4766_v45, 0.0  ;;  %v6829_v27 = vpop.f32.mrb[191].mxu0  ;;  %v4915_v57 = vmul.f32 %v4766_v45, %v4766_v45 }
 0x3be   : > { %v6779_v61 = vadd.f32 %v6778_v52, %v6777_v18  ;;  %4860 = vadd.xlane.f32.xlu1 %v4859_v19  ;;  %4967 = vadd.xlane.f32.xlu0 %v4966_v34  ;;  %v4661_v25 = vadd.f32 %v6776_v56, %v9956_v36 }
 0x3bf   : > { %4806 = vst.msk [vmem:[%s9962_s18 + $0x88] sm:$0xff] %vm4788_vm2, %v4769_v11  ;;  %v4969_v59 = vsel %vm4788_vm2, %v4915_v57, 0.0  ;;  %v4862_v60 = vsel %vm4788_vm2, %v4769_v11, 0.0  ;;  %v4916_v33 = vmul.f32 %v4769_v11, %v4769_v11 }
 0x3c0   : > { %v4664_v39 = vadd.f32 %v6779_v61, %v9959_v5 }
 0x3c1   : > { %v4972_v5 = vsel %vm4788_vm2, %v4916_v33, 0.0  ;;  %v5120_v33 = vld [vmem:[%s10088_s27 + $0x8] sm:$0xff] }
 0x3c2   : > { %v4773_v30 = vpop.f32.mrb[192].mxu0  ;;  %4970 = vadd.xlane.f32.xlu1 %v4969_v59  ;;  %4863 = vadd.xlane.f32.xlu0 %v4862_v60 }
 0x3c3   : > { %v4774_v48 = vadd.f32 %v4773_v30, %v4653_v35  ;;  %v6832_v29 = vpop.f32.mrb[193].mxu0 }
 0x3c4   : > { %v4776_v42 = vpop.f32.mrb[194].mxu0 }
 0x3c5   : > { %4807 = vst.msk [vmem:[%s9962_s18 + $0x90] sm:$0xff] %vm4788_vm2, %v4774_v48  ;;  %v4777_v37 = vadd.f32 %v4776_v42, %v4656_v13  ;;  %v4865_v36 = vsel %vm4788_vm2, %v4774_v48, 0.0  ;;  %v6833_v3 = vpop.f32.mrb[195].mxu0  ;;  %v4917_v31 = vmul.f32 %v4774_v48, %v4774_v48  ;;  %v5119_v42 = vld [vmem:[%s10088_s27] sm:$0xff] }
 0x3c6   : > { %4866 = vadd.xlane.f32.xlu1 %v4865_v36  ;;  %4973 = vadd.xlane.f32.xlu0 %v4972_v5 }
 0x3c7   : > { %4808 = vst.msk [vmem:[%s9962_s18 + $0x98] sm:$0xff] %vm4788_vm2, %v4777_v37  ;;  %v4975_v8 = vsel %vm4788_vm2, %v4917_v31, 0.0  ;;  %v4868_v51 = vsel %vm4788_vm2, %v4777_v37, 0.0  ;;  %v4918_v2 = vmul.f32 %v4777_v37, %v4777_v37 }
 0x3c9   : > { %v4978_v63 = vsel %vm4788_vm2, %v4918_v2, 0.0 }
 0x3ca   : > { %v4781_v1 = vpop.f32.mrb[196].mxu0  ;;  %4976 = vadd.xlane.f32.xlu1 %v4975_v8  ;;  %4869 = vadd.xlane.f32.xlu0 %v4868_v51 }
 0x3cb   : > { %v4782_v44 = vadd.f32 %v4781_v1, %v4661_v25  ;;  %v6836_v14 = vpop.f32.mrb[197].mxu0 }
 0x3cc   : > { %v4784_v46 = vpop.f32.mrb[198].mxu0 }
 0x3cd   : > { %4809 = vst.msk [vmem:[%s9962_s18 + $0xa0] sm:$0xff] %vm4788_vm2, %v4782_v44  ;;  %v4785_v41 = vadd.f32 %v4784_v46, %v4664_v39  ;;  %v4871_v20 = vsel %vm4788_vm2, %v4782_v44, 0.0  ;;  %v4919_v7 = vmul.f32 %v4782_v44, %v4782_v44  ;;  %v6837_v10 = vpop.f32.mrb[199].mxu0 }
 0x3ce   : > { %4872 = vadd.xlane.f32.xlu1 %v4871_v20  ;;  %4979 = vadd.xlane.f32.xlu0 %v4978_v63  ;;  %v5208_v20 = vld [vmem:[%s10101_s30 + $0x8] sm:$0xff]  ;;  %v5121_v63 = vld [vmem:[%s10088_s27 + $0x10] sm:$0xff] }
 0x3cf   : > { %4810 = vst.msk [vmem:[%s9962_s18 + $0xa8] sm:$0xff] %vm4788_vm2, %v4785_v41  ;;  %v4981_v26 = vsel %vm4788_vm2, %v4919_v7, 0.0  ;;  %v4874_v49 = vsel %vm4788_vm2, %v4785_v41, 0.0  ;;  %v4920_v21 = vmul.f32 %v4785_v41, %v4785_v41  ;;  %v5207_v41 = vld [vmem:[%s10101_s30] sm:$0xff] }
 0x3d1   : > { %v4984_v53 = vsel %vm4788_vm2, %v4920_v21, 0.0 }
 0x3d2   : > { %4982 = vadd.xlane.f32.xlu1 %v4981_v26  ;;  %4875 = vadd.xlane.f32.xlu0 %v4874_v49 }
 0x3d6   : > { %4985 = vadd.xlane.f32.xlu0 %v4984_v53 }
 0x40b   : > { %v4813_v54 = vpop.xlane.xlu0 %4812 }
 0x40c   : > { %v10070_v23 = vmul.f32 0.020408163, %v4813_v54 }
 0x40d   : > { %v4816_v55 = vpop.xlane.xlu1 %4815 }
 0x40e   : > { %v5010_v12 = vmul.f32 0.020408163, %v4816_v55  ;;  %v5053_v38 = vmul.f32 %v10070_v23, %v10070_v23 }
 0x40f   : > { %v4926_v32 = vpop.xlane.xlu0 %4925 }
 0x410   : > { %v5054_v40 = vmul.f32 %v5010_v12, %v5010_v12  ;;  %v5032_v58 = vmul.f32 0.020408163, %v4926_v32 }
 0x411   : > { %v4923_v28 = vpop.xlane.xlu1 %4922 }
 0x412   : > { %v5076_v0 = vsub.f32 %v5032_v58, %v5054_v40  ;;  %v5031_v47 = vmul.f32 0.020408163, %v4923_v28 }
 0x413   : > { %v4819_v9 = vpop.xlane.xlu0 %4818 }
 0x414   : > { %v5098_v17 = vmax.f32 %v5076_v0, 0.0  ;;  %v5075_v22 = vsub.f32 %v5031_v47, %v5053_v38  ;;  %v10074_v35 = vmul.f32 0.020408163, %v4819_v9  ;;  %v5209_v38 = vld [vmem:[%s10101_s30 + $0x10] sm:$0xff] }
 0x415   : > { %v4929_v13 = vpop.xlane.xlu1 %4928 }
 0x416   : > { %v5142_v43 = vadd.f32 1e-05, %v5098_v17  ;;  %v5097_v6 = vmax.f32 %v5075_v22, 0.0  ;;  %v5055_v62 = vmul.f32 %v10074_v35, %v10074_v35  ;;  %v5033_v50 = vmul.f32 0.020408163, %v4929_v13 }
 0x417   : > { %v4822_v15 = vpop.xlane.xlu0 %4821 }
 0x418   : > { %7225 = vrsqrt.f32 %v5142_v43  ;;  %v5141_v45 = vadd.f32 1e-05, %v5097_v6  ;;  %v5077_v4 = vsub.f32 %v5033_v50, %v5055_v62  ;;  %v10078_v24 = vmul.f32 0.020408163, %v4822_v15  ;;  %v5122_v43 = vld [vmem:[%s10088_s27 + $0x18] sm:$0xff] }
 0x41a   : > { %7227 = vrsqrt.f32 %v5141_v45  ;;  %v5099_v56 = vmax.f32 %v5077_v4, 0.0  ;;  %v5056_v52 = vmul.f32 %v10078_v24, %v10078_v24 }
 0x41b   : > { %v4825_v18 = vpop.xlane.xlu1 %4824  ;;  %v4932_v16 = vpop.xlane.xlu0 %4931 }
 0x41c   : > { %v5143_v11 = vadd.f32 1e-05, %v5099_v56  ;;  %v10083_v19 = vmul.f32 0.020408163, %v4825_v18  ;;  %v5034_v34 = vmul.f32 0.020408163, %v4932_v16 }
 0x41e   : > { %7229 = vrsqrt.f32 %v5143_v11  ;;  %v5078_v27 = vsub.f32 %v5034_v34, %v5056_v52  ;;  %v5057_v25 = vmul.f32 %v10083_v19, %v10083_v19  ;;  %v5123_v52 = vld [vmem:[%s10088_s27 + $0x20] sm:$0xff] }
 0x41f   : > { %v4935_v57 = vpop.xlane.xlu1 %4934  ;;  %v4828_v61 = vpop.xlane.xlu0 %4827 }
 0x420   : > { %v5100_v39 = vmax.f32 %v5078_v27, 0.0  ;;  %v5035_v59 = vmul.f32 0.020408163, %v4935_v57  ;;  %v10092_v60 = vmul.f32 0.020408163, %v4828_v61 }
 0x422   : > { %v7226_v30 = vpop.eup %7225  ;;  %v5144_v48 = vadd.f32 1e-05, %v5100_v39  ;;  %v5079_v29 = vsub.f32 %v5035_v59, %v5057_v25  ;;  %v5058_v37 = vmul.f32 %v10092_v60, %v10092_v60  ;;  %v5210_v25 = vld [vmem:[%s10101_s30 + $0x18] sm:$0xff] }
 0x423   : > { %v4831_v36 = vpop.xlane.xlu1 %4830  ;;  %v4938_v5 = vpop.xlane.xlu0 %4937  ;;  %v5186_v3 = vmul.f32 %v7226_v30, %v5120_v33 }
 0x424   : > { %v7228_v31 = vpop.eup %7227  ;;  %7231 = vrsqrt.f32 %v5144_v48  ;;  %v5101_v8 = vmax.f32 %v5079_v29, 0.0  ;;  %v10103_v51 = vmul.f32 0.020408163, %v4831_v36  ;;  %v5036_v2 = vmul.f32 0.020408163, %v4938_v5  ;;  %v5211_v48 = vld [vmem:[%s10101_s30 + $0x20] sm:$0xff] }
 0x425   : > { %5302 = vperm.xlu0 %6948, %v5186_v3   ;;  %v5185_v1 = vmul.f32 %v7228_v31, %v5119_v42  ;;  %v5230_v44 = vmul.f32 %v5186_v3, %v5010_v12  ;;  %v5124_v36 = vld [vmem:[%s10088_s27 + $0x28] sm:$0xff] }
 0x426   : > { %v5145_v14 = vadd.f32 1e-05, %v5101_v8  ;;  %v5080_v46 = vsub.f32 %v5036_v2, %v5058_v37  ;;  %v5059_v7 = vmul.f32 %v10103_v51, %v10103_v51 }
 0x427   : > { %v4941_v10 = vpop.xlane.xlu1 %4940  ;;  %5297 = vperm.xlu1 %6949, %v5185_v1   ;;  %v4834_v26 = vpop.xlane.xlu0 %4833  ;;  %v5229_v49 = vmul.f32 %v5185_v1, %v10070_v23  ;;  %v5252_v32 = vsub.f32 %v5208_v20, %v5230_v44 }
 0x428   : > { %v7230_v21 = vpop.eup %7229  ;;  %7233 = vrsqrt.f32 %v5145_v14  ;;  %v5102_v53 = vmax.f32 %v5080_v46, 0.0  ;;  %v5037_v54 = vmul.f32 0.020408163, %v4941_v10  ;;  %v10111_v55 = vmul.f32 0.020408163, %v4834_v26 }
 0x429   : > { %v5251_v12 = vsub.f32 %v5207_v41, %v5229_v49  ;;  %v5187_v40 = vmul.f32 %v7230_v21, %v5121_v63  ;;  %v5212_v21 = vld [vmem:[%s10101_s30 + $0x28] sm:$0xff] }
 0x42a   : > { %v5146_v58 = vadd.f32 1e-05, %v5102_v53  ;;  %v5081_v28 = vsub.f32 %v5037_v54, %v5059_v7  ;;  %v5060_v0 = vmul.f32 %v10111_v55, %v10111_v55  ;;  %v5125_v7 = vld [vmem:[%s10088_s27 + $0x30] sm:$0xff] }
 0x42b   : > { %v4837_v47 = vpop.xlane.xlu1 %4836  ;;  %5429 = vperm.xlu0 %6948, %v5251_v12   ;;  %5434 = vperm.xlu1 %6949, %v5252_v32   ;;  %v4944_v23 = vpop.xlane.xlu0 %4943  ;;  %v5231_v9 = vmul.f32 %v5187_v40, %v10074_v35 }
 0x42c   : > { %7235 = vrsqrt.f32 %v5146_v58  ;;  %v5103_v17 = vmax.f32 %v5081_v28, 0.0  ;;  %v10117_v22 = vmul.f32 0.020408163, %v4837_v47  ;;  %v5038_v13 = vmul.f32 0.020408163, %v4944_v23 }
 0x42d   : > { %v5253_v6 = vsub.f32 %v5209_v38, %v5231_v9 }
 0x42e   : > { %v7232_v62 = vpop.eup %7231  ;;  %v5147_v50 = vadd.f32 1e-05, %v5103_v17  ;;  %v5082_v15 = vsub.f32 %v5038_v13, %v5060_v0  ;;  %v5061_v45 = vmul.f32 %v10117_v22, %v10117_v22  ;;  %v5126_v0 = vld [vmem:[%s10088_s27 + $0x38] sm:$0xff] }
 0x42f   : > { %v4947_v4 = vpop.xlane.xlu1 %4946  ;;  %5307 = vperm.xlu1 %6949, %v5187_v40   ;;  %5439 = vperm.xlu0 %6948, %v5253_v6   ;;  %v4840_v56 = vpop.xlane.xlu0 %4839  ;;  %v5188_v35 = vmul.f32 %v7232_v62, %v5122_v43  ;;  %v5213_v40 = vld [vmem:[%s10101_s30 + $0x30] sm:$0xff] }
 0x430   : > { %7237 = vrsqrt.f32 %v5147_v50  ;;  %v5104_v18 = vmax.f32 %v5082_v15, 0.0  ;;  %v5039_v16 = vmul.f32 0.020408163, %v4947_v4  ;;  %v10122_v11 = vmul.f32 0.020408163, %v4840_v56  ;;  %v5127_v56 = vld [vmem:[%s10088_s27 + $0x40] sm:$0xff] }
 0x431   : > { %v5232_v34 = vmul.f32 %v5188_v35, %v10078_v24 }
 0x432   : > { %v7234_v27 = vpop.eup %7233  ;;  %v5148_v57 = vadd.f32 1e-05, %v5104_v18  ;;  %v5083_v61 = vsub.f32 %v5039_v16, %v5061_v45  ;;  %v5062_v39 = vmul.f32 %v10122_v11, %v10122_v11 }
 0x433   : > { %v4843_v59 = vpop.xlane.xlu1 %4842  ;;  %5312 = vperm.xlu1 %6949, %v5188_v35   ;;  %v4950_v33 = vpop.xlane.xlu0 %4949  ;;  %v5189_v30 = vmul.f32 %v7234_v27, %v5123_v52  ;;  %v5254_v24 = vsub.f32 %v5210_v25, %v5232_v34  ;;  %v5214_v52 = vld [vmem:[%s10101_s30 + $0x38] sm:$0xff]  ;;  %v5215_v25 = vld [vmem:[%s10101_s30 + $0x40] sm:$0xff] }
 0x434   : > { %7239 = vrsqrt.f32 %v5148_v57  ;;  %v5105_v29 = vmax.f32 %v5083_v61, 0.0  ;;  %v10130_v42 = vmul.f32 0.020408163, %v4843_v59  ;;  %v5040_v37 = vmul.f32 0.020408163, %v4950_v33 }
 0x435   : > { %5317 = vperm.xlu0 %6948, %v5189_v30   ;;  %v5233_v5 = vmul.f32 %v5189_v30, %v10083_v19  ;;  %v5128_v30 = vld [vmem:[%s10088_s27 + $0x48] sm:$0xff] }
 0x436   : > { %v7236_v3 = vpop.eup %7235  ;;  %v5149_v31 = vadd.f32 1e-05, %v5105_v29  ;;  %v5084_v8 = vsub.f32 %v5040_v37, %v5062_v39  ;;  %v5063_v2 = vmul.f32 %v10130_v42, %v10130_v42 }
 0x437   : > { %v4953_v1 = vpop.xlane.xlu1 %4952  ;;  %5444 = vperm.xlu1 %6949, %v5254_v24   ;;  %v4846_v44 = vpop.xlane.xlu0 %4845  ;;  %v5255_v14 = vsub.f32 %v5211_v48, %v5233_v5  ;;  %v5190_v46 = vmul.f32 %v7236_v3, %v5124_v36 }
 0x438   : > { %7241 = vrsqrt.f32 %v5149_v31  ;;  %v5106_v41 = vmax.f32 %v5084_v8, 0.0  ;;  %v5041_v20 = vmul.f32 0.020408163, %v4953_v1  ;;  %v10136_v63 = vmul.f32 0.020408163, %v4846_v44 }
 0x439   : > { %5449 = vperm.xlu0 %6948, %v5255_v14   ;;  %v5234_v19 = vmul.f32 %v5190_v46, %v10092_v60  ;;  %v5129_v14 = vld [vmem:[%s10088_s27 + $0x50] sm:$0xff] }
 0x43a   : > { %v7238_v10 = vpop.eup %7237  ;;  %v5150_v26 = vadd.f32 1e-05, %v5106_v41  ;;  %v5085_v49 = vsub.f32 %v5041_v20, %v5063_v2  ;;  %v5064_v53 = vmul.f32 %v10136_v63, %v10136_v63 }
 0x43b   : > { %v4849_v54 = vpop.xlane.xlu1 %4848  ;;  %5322 = vperm.xlu1 %6949, %v5190_v46   ;;  %v4956_v12 = vpop.xlane.xlu0 %4955  ;;  %v5191_v32 = vmul.f32 %v7238_v10, %v5125_v7  ;;  %v5256_v60 = vsub.f32 %v5212_v21, %v5234_v19  ;;  %v5216_v7 = vld [vmem:[%s10101_s30 + $0x48] sm:$0xff]  ;;  %v5217_v21 = vld [vmem:[%s10101_s30 + $0x50] sm:$0xff] }
 0x43c   : > { %7243 = vrsqrt.f32 %v5150_v26  ;;  %v5107_v58 = vmax.f32 %v5085_v49, 0.0  ;;  %v10144_v28 = vmul.f32 0.020408163, %v4849_v54  ;;  %v5042_v38 = vmul.f32 0.020408163, %v4956_v12 }
 0x43d   : > { %5327 = vperm.xlu0 %6948, %v5191_v32   ;;  %v5235_v47 = vmul.f32 %v5191_v32, %v10103_v51  ;;  %v5130_v32 = vld [vmem:[%s10088_s27 + $0x58] sm:$0xff] }
 0x43e   : > { %v7240_v23 = vpop.eup %7239  ;;  %v5151_v9 = vadd.f32 1e-05, %v5107_v58  ;;  %v5086_v17 = vsub.f32 %v5042_v38, %v5064_v53  ;;  %v5065_v13 = vmul.f32 %v10144_v28, %v10144_v28 }
 0x43f   : > { %v4959_v43 = vpop.xlane.xlu1 %4958  ;;  %5454 = vperm.xlu1 %6949, %v5256_v60   ;;  %v4852_v6 = vpop.xlane.xlu0 %4851  ;;  %v5257_v62 = vsub.f32 %v5213_v40, %v5235_v47  ;;  %v5192_v50 = vmul.f32 %v7240_v23, %v5126_v0 }
 0x440   : > { %7245 = vrsqrt.f32 %v5151_v9  ;;  %v5108_v15 = vmax.f32 %v5086_v17, 0.0  ;;  %v5043_v45 = vmul.f32 0.020408163, %v4959_v43  ;;  %v10150_v4 = vmul.f32 0.020408163, %v4852_v6 }
 0x441   : > { %5459 = vperm.xlu0 %6948, %v5257_v62   ;;  %v5236_v51 = vmul.f32 %v5192_v50, %v10111_v55  ;;  %v5131_v62 = vld [vmem:[%s10088_s27 + $0x60] sm:$0xff] }
 0x442   : > { %v7242_v35 = vpop.eup %7241  ;;  %v5152_v18 = vadd.f32 1e-05, %v5108_v15  ;;  %v5087_v16 = vsub.f32 %v5043_v45, %v5065_v13  ;;  %v5066_v34 = vmul.f32 %v10150_v4, %v10150_v4 }
 0x443   : > { %v4855_v27 = vpop.xlane.xlu1 %4854  ;;  %5332 = vperm.xlu1 %6949, %v5192_v50   ;;  %v4962_v57 = vpop.xlane.xlu0 %4961  ;;  %v5193_v61 = vmul.f32 %v7242_v35, %v5127_v56  ;;  %v5258_v55 = vsub.f32 %v5214_v52, %v5236_v51  ;;  %v5218_v56 = vld [vmem:[%s10101_s30 + $0x58] sm:$0xff]  ;;  %v5219_v52 = vld [vmem:[%s10101_s30 + $0x60] sm:$0xff] }
 0x444   : > { %7247 = vrsqrt.f32 %v5152_v18  ;;  %v5109_v39 = vmax.f32 %v5087_v16, 0.0  ;;  %v10158_v59 = vmul.f32 0.020408163, %v4855_v27  ;;  %v5044_v33 = vmul.f32 0.020408163, %v4962_v57 }
 0x445   : > { %5337 = vperm.xlu0 %6948, %v5193_v61   ;;  %v5237_v48 = vmul.f32 %v5193_v61, %v10117_v22  ;;  %v5132_v61 = vld [vmem:[%s10088_s27 + $0x68] sm:$0xff] }
 0x446   : > { %v7244_v29 = vpop.eup %7243  ;;  %v5153_v37 = vadd.f32 1e-05, %v5109_v39  ;;  %v5088_v36 = vsub.f32 %v5044_v33, %v5066_v34  ;;  %v5067_v24 = vmul.f32 %v10158_v59, %v10158_v59 }
 0x447   : > { %v4965_v5 = vpop.xlane.xlu1 %4964  ;;  %5464 = vperm.xlu1 %6949, %v5258_v55   ;;  %v4858_v3 = vpop.xlane.xlu0 %4857  ;;  %v5259_v31 = vsub.f32 %v5215_v25, %v5237_v48  ;;  %v5194_v8 = vmul.f32 %v7244_v29, %v5128_v30 }
 0x448   : > { %7249 = vrsqrt.f32 %v5153_v37  ;;  %v5110_v2 = vmax.f32 %v5088_v36, 0.0  ;;  %v5045_v1 = vmul.f32 0.020408163, %v4965_v5  ;;  %v10164_v44 = vmul.f32 0.020408163, %v4858_v3 }
 0x449   : > { %5469 = vperm.xlu0 %6948, %v5259_v31   ;;  %v5238_v22 = vmul.f32 %v5194_v8, %v10122_v11  ;;  %v5133_v31 = vld [vmem:[%s10088_s27 + $0x70] sm:$0xff] }
 0x44a   : > { %v7246_v46 = vpop.eup %7245  ;;  %v5154_v41 = vadd.f32 1e-05, %v5110_v2  ;;  %v5089_v20 = vsub.f32 %v5045_v1, %v5067_v24  ;;  %v5068_v19 = vmul.f32 %v10164_v44, %v10164_v44 }
 0x44b   : > { %v4861_v10 = vpop.xlane.xlu1 %4860  ;;  %5342 = vperm.xlu1 %6949, %v5194_v8   ;;  %v4968_v26 = vpop.xlane.xlu0 %4967  ;;  %v5195_v49 = vmul.f32 %v7246_v46, %v5129_v14  ;;  %v5260_v11 = vsub.f32 %v5216_v7, %v5238_v22  ;;  %v5220_v14 = vld [vmem:[%s10101_s30 + $0x68] sm:$0xff]  ;;  %v5221_v7 = vld [vmem:[%s10101_s30 + $0x70] sm:$0xff] }
 0x44c   : > { %7251 = vrsqrt.f32 %v5154_v41  ;;  %v5111_v53 = vmax.f32 %v5089_v20, 0.0  ;;  %v10172_v54 = vmul.f32 0.020408163, %v4861_v10  ;;  %v5046_v12 = vmul.f32 0.020408163, %v4968_v26 }
 0x44d   : > { %5347 = vperm.xlu0 %6948, %v5195_v49   ;;  %v5239_v40 = vmul.f32 %v5195_v49, %v10130_v42  ;;  %v5134_v49 = vld [vmem:[%s10088_s27 + $0x78] sm:$0xff] }
 0x44e   : > { %v7248_v58 = vpop.eup %7247  ;;  %v5155_v38 = vadd.f32 1e-05, %v5111_v53  ;;  %v5090_v0 = vsub.f32 %v5046_v12, %v5068_v19  ;;  %v5069_v60 = vmul.f32 %v10172_v54, %v10172_v54 }
 0x44f   : > { %v4971_v47 = vpop.xlane.xlu1 %4970  ;;  %5474 = vperm.xlu1 %6949, %v5260_v11   ;;  %v4864_v23 = vpop.xlane.xlu0 %4863  ;;  %v5261_v9 = vsub.f32 %v5217_v21, %v5239_v40  ;;  %v5196_v17 = vmul.f32 %v7248_v58, %v5130_v32 }
 0x450   : > { %7253 = vrsqrt.f32 %v5155_v38  ;;  %v5112_v13 = vmax.f32 %v5090_v0, 0.0  ;;  %v5047_v43 = vmul.f32 0.020408163, %v4971_v47  ;;  %v10178_v6 = vmul.f32 0.020408163, %v4864_v23 }
 0x451   : > { %5479 = vperm.xlu0 %6948, %v5261_v9   ;;  %v5240_v42 = vmul.f32 %v5196_v17, %v10136_v63 }
 0x452   : > { %v7250_v50 = vpop.eup %7249  ;;  %v5156_v15 = vadd.f32 1e-05, %v5112_v13  ;;  %v5091_v45 = vsub.f32 %v5047_v43, %v5069_v60  ;;  %v5070_v51 = vmul.f32 %v10178_v6, %v10178_v6 }
 0x453   : > { %v4867_v35 = vpop.xlane.xlu1 %4866  ;;  %5352 = vperm.xlu1 %6949, %v5196_v17   ;;  %v4974_v18 = vpop.xlane.xlu0 %4973  ;;  %v5197_v16 = vmul.f32 %v7250_v50, %v5131_v62  ;;  %v5262_v63 = vsub.f32 %v5218_v56, %v5240_v42  ;;  %v5222_v62 = vld [vmem:[%s10101_s30 + $0x78] sm:$0xff] }
 0x454   : > { %7255 = vrsqrt.f32 %v5156_v15  ;;  %v5113_v34 = vmax.f32 %v5091_v45, 0.0  ;;  %v10186_v27 = vmul.f32 0.020408163, %v4867_v35  ;;  %v5048_v57 = vmul.f32 0.020408163, %v4974_v18  ;;  %v5136_v35 = vld [vmem:[%s10088_s27 + $0x88] sm:$0xff] }
 0x455   : > { %5357 = vperm.xlu0 %6948, %v5197_v16   ;;  %v5241_v25 = vmul.f32 %v5197_v16, %v10144_v28 }
 0x456   : > { %v7252_v39 = vpop.eup %7251  ;;  %v5157_v33 = vadd.f32 1e-05, %v5113_v34  ;;  %v5092_v30 = vsub.f32 %v5048_v57, %v5070_v51  ;;  %v5071_v55 = vmul.f32 %v10186_v27, %v10186_v27  ;;  %v5223_v51 = vld [vmem:[%s10101_s30 + $0x80] sm:$0xff] }
 0x457   : > { %v4977_v48 = vpop.xlane.xlu1 %4976  ;;  %5484 = vperm.xlu1 %6949, %v5262_v63   ;;  %v4870_v29 = vpop.xlane.xlu0 %4869  ;;  %v5263_v37 = vsub.f32 %v5219_v52, %v5241_v25  ;;  %v5198_v36 = vmul.f32 %v7252_v39, %v5132_v61  ;;  %v5137_v25 = vld [vmem:[%s10088_s27 + $0x90] sm:$0xff] }
 0x458   : > { %7257 = vrsqrt.f32 %v5157_v33  ;;  %v5114_v24 = vmax.f32 %v5092_v30, 0.0  ;;  %v5049_v5 = vmul.f32 0.020408163, %v4977_v48  ;;  %v10192_v3 = vmul.f32 0.020408163, %v4870_v29  ;;  %v5225_v48 = vld [vmem:[%s10101_s30 + $0x90] sm:$0xff] }
 0x459   : > { %5489 = vperm.xlu0 %6948, %v5263_v37   ;;  %v5242_v28 = vmul.f32 %v5198_v36, %v10150_v4  ;;  %v5138_v29 = vld [vmem:[%s10088_s27 + $0x98] sm:$0xff] }
 0x45a   : > { %v7254_v8 = vpop.eup %7253  ;;  %v5158_v2 = vadd.f32 1e-05, %v5114_v24  ;;  %v5093_v1 = vsub.f32 %v5049_v5, %v5071_v55  ;;  %v5072_v22 = vmul.f32 %v10192_v3, %v10192_v3  ;;  %v5224_v55 = vld [vmem:[%s10101_s30 + $0x88] sm:$0xff] }
 0x45b   : > { %v4873_v46 = vpop.xlane.xlu1 %4872  ;;  %5362 = vperm.xlu1 %6949, %v5198_v36   ;;  %v4980_v41 = vpop.xlane.xlu0 %4979  ;;  %v5199_v20 = vmul.f32 %v7254_v8, %v5133_v31  ;;  %v5264_v4 = vsub.f32 %v5220_v14, %v5242_v28  ;;  %v5139_v31 = vld [vmem:[%s10088_s27 + $0xa0] sm:$0xff] }
 0x45c   : > { %7259 = vrsqrt.f32 %v5158_v2  ;;  %v5115_v19 = vmax.f32 %v5093_v1, 0.0  ;;  %v10200_v10 = vmul.f32 0.020408163, %v4873_v46  ;;  %v5050_v26 = vmul.f32 0.020408163, %v4980_v41  ;;  %v5226_v2 = vld [vmem:[%s10101_s30 + $0x98] sm:$0xff] }
 0x45d   : > { %5367 = vperm.xlu0 %6948, %v5199_v20   ;;  %v5243_v21 = vmul.f32 %v5199_v20, %v10158_v59  ;;  %v5135_v59 = vld [vmem:[%s10088_s27 + $0x80] sm:$0xff] }
 0x45e   : > { %v7256_v53 = vpop.eup %7255  ;;  %v5159_v12 = vadd.f32 1e-05, %v5115_v19  ;;  %v5094_v32 = vsub.f32 %v5050_v26, %v5072_v22  ;;  %v5073_v11 = vmul.f32 %v10200_v10, %v10200_v10  ;;  %v5227_v14 = vld [vmem:[%s10101_s30 + $0xa0] sm:$0xff]  ;;  %v5140_v22 = vld [vmem:[%s10088_s27 + $0xa8] sm:$0xff] }
 0x45f   : > { %v4983_v40 = vpop.xlane.xlu1 %4982  ;;  %5494 = vperm.xlu1 %6949, %v5264_v4   ;;  %v4876_v58 = vpop.xlane.xlu0 %4875  ;;  %v5265_v38 = vsub.f32 %v5221_v7, %v5243_v21  ;;  %v5200_v0 = vmul.f32 %v7256_v53, %v5134_v49  ;;  %v5228_v19 = vld [vmem:[%s10101_s30 + $0xa8] sm:$0xff]  ;;  %v5273_v53 = vld [vmem:[%s9962_s18] sm:$0xff] }
 0x460   : > { %7261 = vrsqrt.f32 %v5159_v12  ;;  %v5116_v60 = vmax.f32 %v5094_v32, 0.0  ;;  %v5051_v47 = vmul.f32 0.020408163, %v4983_v40  ;;  %v10206_v23 = vmul.f32 0.020408163, %v4876_v58  ;;  %v5274_v21 = vld [vmem:[%s9962_s18 + $0x8] sm:$0xff] }
 0x461   : > { %5499 = vperm.xlu0 %6948, %v5265_v38   ;;  %v5244_v9 = vmul.f32 %v5200_v0, %v10164_v44 }
 0x462   : > { %v7258_v17 = vpop.eup %7257  ;;  %v5160_v13 = vadd.f32 1e-05, %v5116_v60  ;;  %v5095_v43 = vsub.f32 %v5051_v47, %v5073_v11  ;;  %v5074_v45 = vmul.f32 %v10206_v23, %v10206_v23 }
 0x463   : > { %5372 = vperm.xlu1 %6949, %v5200_v0   ;;  %v4986_v42 = vpop.xlane.xlu0 %4985  ;;  %v5201_v50 = vmul.f32 %v7258_v17, %v5135_v59  ;;  %v5266_v18 = vsub.f32 %v5222_v62, %v5244_v9  ;;  %v5275_v0 = vld [vmem:[%s9962_s18 + $0x10] sm:$0xff]  ;;  %v5276_v9 = vld [vmem:[%s9962_s18 + $0x18] sm:$0xff] }
 0x464   : > { %7263 = vrsqrt.f32 %v5160_v13  ;;  %v5117_v15 = vmax.f32 %v5095_v43, 0.0  ;;  %v5052_v56 = vmul.f32 0.020408163, %v4986_v42  ;;  %v5277_v43 = vld [vmem:[%s9962_s18 + $0x20] sm:$0xff] }
 0x465   : > { %5377 = vperm.xlu0 %6948, %v5201_v50   ;;  %v5245_v44 = vmul.f32 %v5201_v50, %v10172_v54 }
 0x466   : > { %v7260_v16 = vpop.eup %7259  ;;  %v5161_v52 = vadd.f32 1e-05, %v5117_v15  ;;  %v5096_v34 = vsub.f32 %v5052_v56, %v5074_v45 }
 0x467   : > { %5504 = vperm.xlu1 %6949, %v5266_v18   ;;  %v5267_v57 = vsub.f32 %v5223_v51, %v5245_v44  ;;  %v5202_v61 = vmul.f32 %v7260_v16, %v5136_v35  ;;  %v5278_v51 = vld [vmem:[%s9962_s18 + $0x28] sm:$0xff]  ;;  %v5279_v44 = vld [vmem:[%s9962_s18 + $0x30] sm:$0xff] }
 0x468   : > { %7265 = vrsqrt.f32 %v5161_v52  ;;  %v5118_v63 = vmax.f32 %v5096_v34, 0.0 }
 0x469   : > { %5509 = vperm.xlu0 %6948, %v5267_v57   ;;  %v5246_v39 = vmul.f32 %v5202_v61, %v10178_v6 }
 0x46a   : > { %v7262_v33 = vpop.eup %7261  ;;  %v5162_v30 = vadd.f32 1e-05, %v5118_v63 }
 0x46b   : > { %5382 = vperm.xlu1 %6949, %v5202_v61   ;;  %v5203_v54 = vmul.f32 %v7262_v33, %v5137_v25  ;;  %v5268_v37 = vsub.f32 %v5224_v55, %v5246_v39  ;;  %v5280_v25 = vld [vmem:[%s9962_s18 + $0x38] sm:$0xff] }
 0x46c   : > { %7267 = vrsqrt.f32 %v5162_v30  ;;  %v5281_v30 = vld [vmem:[%s9962_s18 + $0x40] sm:$0xff] }
 0x46d   : > { %5387 = vperm.xlu0 %6948, %v5203_v54   ;;  %v5247_v36 = vmul.f32 %v5203_v54, %v10186_v27 }
 0x46e   : > { %v7264_v24 = vpop.eup %7263 }
 0x46f   : > { %5514 = vperm.xlu1 %6949, %v5268_v37   ;;  %v5269_v5 = vsub.f32 %v5225_v48, %v5247_v36  ;;  %v5204_v6 = vmul.f32 %v7264_v24, %v5138_v29  ;;  %v5282_v24 = vld [vmem:[%s9962_s18 + $0x48] sm:$0xff] }
 0x471   : > { %5519 = vperm.xlu0 %6948, %v5269_v5   ;;  %v5248_v28 = vmul.f32 %v5204_v6, %v10192_v3 }
 0x472   : > { %v7266_v8 = vpop.eup %7265 }
 0x473   : > { %5392 = vperm.xlu1 %6949, %v5204_v6   ;;  %v5205_v1 = vmul.f32 %v7266_v8, %v5139_v31  ;;  %v5270_v46 = vsub.f32 %v5226_v2, %v5248_v28  ;;  %v5283_v31 = vld [vmem:[%s9962_s18 + $0x50] sm:$0xff] }
 0x475   : > { %5397 = vperm.xlu0 %6948, %v5205_v1   ;;  %v5249_v27 = vmul.f32 %v5205_v1, %v10200_v10 }
 0x476   : > { %v7268_v41 = vpop.eup %7267 }
 0x477   : > { %5524 = vperm.xlu1 %6949, %v5270_v46   ;;  %v5271_v20 = vsub.f32 %v5227_v14, %v5249_v27  ;;  %v5206_v7 = vmul.f32 %v7268_v41, %v5140_v22  ;;  %v5284_v46 = vld [vmem:[%s9962_s18 + $0x58] sm:$0xff] }
 0x479   : > { %5529 = vperm.xlu0 %6948, %v5271_v20   ;;  %v5250_v3 = vmul.f32 %v5206_v7, %v10206_v23  ;;  %v5285_v20 = vld [vmem:[%s9962_s18 + $0x60] sm:$0xff] }
 0x47b   : > { %5402 = vperm.xlu1 %6949, %v5206_v7   ;;  %v5272_v26 = vsub.f32 %v5228_v19, %v5250_v3 }
 0x47f   : > { %5534 = vperm.xlu1 %6949, %v5272_v26  }
 0x4a4   : > { %v5303_v49 = vpop.permute.xlu0 %5302 }
 0x4a5   : > { %v5406_v10 = vmul.f32 %v5303_v49, %v5274_v21  ;;  %v5286_v21 = vld [vmem:[%s9962_s18 + $0x68] sm:$0xff] }
 0x4a6   : > { %v5298_v4 = vpop.permute.xlu1 %5297 }
 0x4a7   : > { %v5405_v12 = vmul.f32 %v5298_v4, %v5273_v53 }
 0x4aa   : > { %v5435_v32 = vpop.permute.xlu1 %5434  ;;  %v5430_v11 = vpop.permute.xlu0 %5429 }
 0x4ab   : > { %v5538_v40 = vadd.f32 %v5435_v32, %v5406_v10  ;;  %v5537_v58 = vadd.f32 %v5430_v11, %v5405_v12  ;;  %v5287_v12 = vld [vmem:[%s9962_s18 + $0x70] sm:$0xff] }
 0x4ad   : > { %5560 = vst.msk [vmem:[%s9962_s18 + $0x8] sm:$0xff] %vm4788_vm2, %v5538_v40  ;;  %5559 = vst.msk [vmem:[%s9962_s18] sm:$0xff] %vm4788_vm2, %v5537_v58 }
 0x4ae   : > { %v5308_v38 = vpop.permute.xlu1 %5307  ;;  %v5440_v47 = vpop.permute.xlu0 %5439 }
 0x4af   : > { %v5407_v60 = vmul.f32 %v5308_v38, %v5275_v0 }
 0x4b1   : > { %v5539_v23 = vadd.f32 %v5440_v47, %v5407_v60  ;;  %v5288_v60 = vld [vmem:[%s9962_s18 + $0x78] sm:$0xff] }
 0x4b2   : > { %v5313_v59 = vpop.permute.xlu1 %5312 }
 0x4b3   : > { %5561 = vst.msk [vmem:[%s9962_s18 + $0x10] sm:$0xff] %vm4788_vm2, %v5539_v23  ;;  %v5408_v13 = vmul.f32 %v5313_v59, %v5276_v9  ;;  %v5289_v59 = vld [vmem:[%s9962_s18 + $0x80] sm:$0xff] }
 0x4b4   : > { %v5318_v17 = vpop.permute.xlu0 %5317 }
 0x4b5   : > { %v5409_v42 = vmul.f32 %v5318_v17, %v5277_v43 }
 0x4b6   : > { %v5445_v62 = vpop.permute.xlu1 %5444 }
 0x4b7   : > { %v5540_v50 = vadd.f32 %v5445_v62, %v5408_v13 }
 0x4b8   : > { %v5450_v15 = vpop.permute.xlu0 %5449 }
 0x4b9   : > { %5562 = vst.msk [vmem:[%s9962_s18 + $0x18] sm:$0xff] %vm4788_vm2, %v5540_v50  ;;  %v5541_v45 = vadd.f32 %v5450_v15, %v5409_v42  ;;  %v5290_v50 = vld [vmem:[%s9962_s18 + $0x88] sm:$0xff] }
 0x4ba   : > { %v5323_v56 = vpop.permute.xlu1 %5322 }
 0x4bb   : > { %5563 = vst.msk [vmem:[%s9962_s18 + $0x20] sm:$0xff] %vm4788_vm2, %v5541_v45  ;;  %v5410_v18 = vmul.f32 %v5323_v56, %v5278_v51  ;;  %v5291_v56 = vld [vmem:[%s9962_s18 + $0x90] sm:$0xff] }
 0x4bc   : > { %v5328_v35 = vpop.permute.xlu0 %5327 }
 0x4bd   : > { %v5411_v52 = vmul.f32 %v5328_v35, %v5279_v44 }
 0x4be   : > { %v5455_v16 = vpop.permute.xlu1 %5454 }
 0x4bf   : > { %v5542_v34 = vadd.f32 %v5455_v16, %v5410_v18 }
 0x4c0   : > { %v5460_v57 = vpop.permute.xlu0 %5459 }
 0x4c1   : > { %5564 = vst.msk [vmem:[%s9962_s18 + $0x28] sm:$0xff] %vm4788_vm2, %v5542_v34  ;;  %v5543_v61 = vadd.f32 %v5460_v57, %v5411_v52  ;;  %v5292_v34 = vld [vmem:[%s9962_s18 + $0x98] sm:$0xff] }
 0x4c2   : > { %v5333_v63 = vpop.permute.xlu1 %5332 }
 0x4c3   : > { %5565 = vst.msk [vmem:[%s9962_s18 + $0x30] sm:$0xff] %vm4788_vm2, %v5543_v61  ;;  %v5412_v33 = vmul.f32 %v5333_v63, %v5280_v25  ;;  %v5293_v63 = vld [vmem:[%s9962_s18 + $0xa0] sm:$0xff] }
 0x4c4   : > { %v5338_v39 = vpop.permute.xlu0 %5337 }
 0x4c5   : > { %v5413_v54 = vmul.f32 %v5338_v39, %v5281_v30 }
 0x4c6   : > { %v5465_v55 = vpop.permute.xlu1 %5464 }
 0x4c7   : > { %v5544_v48 = vadd.f32 %v5465_v55, %v5412_v33 }
 0x4c8   : > { %v5470_v29 = vpop.permute.xlu0 %5469 }
 0x4c9   : > { %5566 = vst.msk [vmem:[%s9962_s18 + $0x38] sm:$0xff] %vm4788_vm2, %v5544_v48  ;;  %v5545_v37 = vadd.f32 %v5470_v29, %v5413_v54  ;;  %v5294_v48 = vld [vmem:[%s9962_s18 + $0xa8] sm:$0xff] }
 0x4ca   : > { %v5343_v36 = vpop.permute.xlu1 %5342 }
 0x4cb   : > { %5567 = vst.msk [vmem:[%s9962_s18 + $0x40] sm:$0xff] %vm4788_vm2, %v5545_v37  ;;  %v5414_v6 = vmul.f32 %v5343_v36, %v5282_v24 }
 0x4cc   : > { %v5348_v5 = vpop.permute.xlu0 %5347 }
 0x4cd   : > { %v5415_v8 = vmul.f32 %v5348_v5, %v5283_v31 }
 0x4ce   : > { %v5475_v28 = vpop.permute.xlu1 %5474 }
 0x4cf   : > { %v5546_v2 = vadd.f32 %v5475_v28, %v5414_v6 }
 0x4d0   : > { %v5480_v1 = vpop.permute.xlu0 %5479 }
 0x4d1   : > { %5568 = vst.msk [vmem:[%s9962_s18 + $0x48] sm:$0xff] %vm4788_vm2, %v5546_v2  ;;  %v5547_v14 = vadd.f32 %v5480_v1, %v5415_v8 }
 0x4d2   : > { %v5353_v22 = vpop.permute.xlu1 %5352 }
 0x4d3   : > { %5569 = vst.msk [vmem:[%s9962_s18 + $0x50] sm:$0xff] %vm4788_vm2, %v5547_v14  ;;  %v5416_v41 = vmul.f32 %v5353_v22, %v5284_v46 }
 0x4d4   : > { %v5358_v27 = vpop.permute.xlu0 %5357 }
 0x4d5   : > { %v5417_v3 = vmul.f32 %v5358_v27, %v5285_v20 }
 0x4d6   : > { %v5485_v7 = vpop.permute.xlu1 %5484 }
 0x4d7   : > { %v5548_v19 = vadd.f32 %v5485_v7, %v5416_v41 }
 0x4d8   : > { %v5490_v26 = vpop.permute.xlu0 %5489 }
 0x4d9   : > { %5570 = vst.msk [vmem:[%s9962_s18 + $0x58] sm:$0xff] %vm4788_vm2, %v5548_v19  ;;  %v5549_v49 = vadd.f32 %v5490_v26, %v5417_v3 }
 0x4da   : > { %v5363_v4 = vpop.permute.xlu1 %5362 }
 0x4db   : > { %5571 = vst.msk [vmem:[%s9962_s18 + $0x60] sm:$0xff] %vm4788_vm2, %v5549_v49  ;;  %v5418_v10 = vmul.f32 %v5363_v4, %v5286_v21 }
 0x4dc   : > { %v5368_v53 = vpop.permute.xlu0 %5367 }
 0x4dd   : > { %v5419_v11 = vmul.f32 %v5368_v53, %v5287_v12 }
 0x4de   : > { %v5495_v32 = vpop.permute.xlu1 %5494 }
 0x4df   : > { %v5550_v40 = vadd.f32 %v5495_v32, %v5418_v10 }
 0x4e0   : > { %v5500_v58 = vpop.permute.xlu0 %5499 }
 0x4e1   : > { %5572 = vst.msk [vmem:[%s9962_s18 + $0x68] sm:$0xff] %vm4788_vm2, %v5550_v40  ;;  %v5551_v38 = vadd.f32 %v5500_v58, %v5419_v11 }
 0x4e2   : > { %v5373_v0 = vpop.permute.xlu1 %5372 }
 0x4e3   : > { %5573 = vst.msk [vmem:[%s9962_s18 + $0x70] sm:$0xff] %vm4788_vm2, %v5551_v38  ;;  %v5420_v23 = vmul.f32 %v5373_v0, %v5288_v60 }
 0x4e4   : > { %v5378_v47 = vpop.permute.xlu0 %5377 }
 0x4e5   : > { %v5421_v17 = vmul.f32 %v5378_v47, %v5289_v59 }
 0x4e6   : > { %v5505_v9 = vpop.permute.xlu1 %5504 }
 0x4e7   : > { %v5552_v13 = vadd.f32 %v5505_v9, %v5420_v23 }
 0x4e8   : > { %v5510_v43 = vpop.permute.xlu0 %5509 }
 0x4e9   : > { %5574 = vst.msk [vmem:[%s9962_s18 + $0x78] sm:$0xff] %vm4788_vm2, %v5552_v13  ;;  %v5553_v62 = vadd.f32 %v5510_v43, %v5421_v17 }
 0x4ea   : > { %v5383_v42 = vpop.permute.xlu1 %5382 }
 0x4eb   : > { %5575 = vst.msk [vmem:[%s9962_s18 + $0x80] sm:$0xff] %vm4788_vm2, %v5553_v62  ;;  %v5422_v45 = vmul.f32 %v5383_v42, %v5290_v50 }
 0x4ec   : > { %v5388_v15 = vpop.permute.xlu0 %5387 }
 0x4ed   : > { %v5423_v35 = vmul.f32 %v5388_v15, %v5291_v56 }
 0x4ee   : > { %v5515_v51 = vpop.permute.xlu1 %5514 }
 0x4ef   : > { %v5554_v18 = vadd.f32 %v5515_v51, %v5422_v45 }
 0x4f0   : > { %v5520_v44 = vpop.permute.xlu0 %5519 }
 0x4f1   : > { %5576 = vst.msk [vmem:[%s9962_s18 + $0x88] sm:$0xff] %vm4788_vm2, %v5554_v18  ;;  %v5555_v16 = vadd.f32 %v5520_v44, %v5423_v35 }
 0x4f2   : > { %v5393_v52 = vpop.permute.xlu1 %5392 }
 0x4f3   : > { %5577 = vst.msk [vmem:[%s9962_s18 + $0x90] sm:$0xff] %vm4788_vm2, %v5555_v16  ;;  %v5424_v61 = vmul.f32 %v5393_v52, %v5292_v34 }
 0x4f4   : > { %v5398_v57 = vpop.permute.xlu0 %5397 }
 0x4f5   : > { %v5425_v39 = vmul.f32 %v5398_v57, %v5293_v63 }
 0x4f6   : > { %v5525_v25 = vpop.permute.xlu1 %5524 }
 0x4f7   : > { %v5556_v33 = vadd.f32 %v5525_v25, %v5424_v61 }
 0x4f8   : > { %v5530_v30 = vpop.permute.xlu0 %5529 }
 0x4f9   : > { %5578 = vst.msk [vmem:[%s9962_s18 + $0x98] sm:$0xff] %vm4788_vm2, %v5556_v33  ;;  %v5557_v55 = vadd.f32 %v5530_v30, %v5425_v39 }
 0x4fa   : > { %v5403_v54 = vpop.permute.xlu1 %5402 }
 0x4fb   : > { %5579 = vst.msk [vmem:[%s9962_s18 + $0xa0] sm:$0xff] %vm4788_vm2, %v5557_v55  ;;  %v5426_v29 = vmul.f32 %v5403_v54, %v5294_v48  ;;  %5587 = sbr.rel (!%p7419_p4) target bundleno = 1345 (0x541), region = 44 }
 0x4fe   : > { %v5535_v37 = vpop.permute.xlu1 %5534 }
 0x4ff   : > { %v5558_v36 = vadd.f32 %v5535_v37, %v5426_v29 }
 0x501   : > { %5580 = vst.msk [vmem:[%s9962_s18 + $0xa8] sm:$0xff] %vm4788_vm2, %v5558_v36 }
 0x502   : > { %s10422_s6 = smov (!%p5590_p8, %s5589_s6), 22 }
 0x503   : > { %s6111_s12 = sshll.u32 %s10422_s6, 7 }
 0x504   : > { %p6114_p9 = scmp.eq.s32.totalorder %s6111_s12, 0 }
 0x505   : > { %7269 = sdivrem.u32 (!%p6114_p9), %s10422_s6, 22 }
 0x506   : > { %5598 = sbr.rel (%p6114_p9) target bundleno = 1345 (0x541), region = 48 }
 0x50e   : > { %s10309_s26 = spop.drf %7269 }
 0x50f   : > { %p6115_p10 = scmp.le.s32.totalorder %s10309_s26, 0 }
 0x510   : > { %s10414_s21 = smov (!%p6115_p10), %s10303_s11  ;;  %s10415_s28 = smov (!%p6115_p10), %s9962_s18 }
 0x511   : > { %5850 = sbr.rel (%p6115_p10) target bundleno = 1316 (0x524), region = 130  ;;  %s10318_s13 = smov (!%p6115_p10), 0  }
 0x512   : > { %s10320_s14 = smov (!%p6115_p10), 0  }
 0x518 LB: >> { %v5704_v24 = vld [vmem:[%s7335_s28] sm:$0xff]  ;;  %v5706_v5 = vld [vmem:[%s7335_s28 + $0x8] sm:$0xff]  ;;  %v5708_v6 = vld [vmem:[%s7335_s28 + $0x10] sm:$0xff]  ;;  %s5748_s15 = sadd.s32 1, %s7339_s13  ;;  %s5698_s14 = sadd.s32 1, %s7343_s14   ;;  %s7343_s14 = sphi %s10320_s14, %s5698_s14   ;;  %s7339_s13 = sphi %s10318_s13, %s10417_s13   ;;  %s7335_s28 = sphi %s10415_s28, %s5753_s28   ;;  %s7331_s21 = sphi %s10414_s21, %s10416_s21  }
 0x519   : >> { %5705 = vst [vmem:[%s7331_s21] sm:$0xff] %v5704_v24  ;;  %5707 = vst [vmem:[%s7331_s21 + $0x8] sm:$0xff] %v5706_v5  ;;  %v5710_v31 = vld [vmem:[%s7335_s28 + $0x18] sm:$0xff]  ;;  %v5712_v28 = vld [vmem:[%s7335_s28 + $0x20] sm:$0xff]  ;;  %p5749_p11 = scmp.ge.s32.totalorder %s5748_s15, %s10309_s26  ;;  %p5697_p12 = scmp.ge.s32.totalorder %s5698_s14, %s10309_s26 }
 0x51a   : >> { %5709 = vst [vmem:[%s7331_s21 + $0x10] sm:$0xff] %v5708_v6  ;;  %v5714_v8 = vld [vmem:[%s7335_s28 + $0x28] sm:$0xff]  ;;  %5711 = vst [vmem:[%s7331_s21 + $0x18] sm:$0xff] %v5710_v31  ;;  %v5716_v2 = vld [vmem:[%s7335_s28 + $0x30] sm:$0xff] }
 0x51b   : >> { %5713 = vst [vmem:[%s7331_s21 + $0x20] sm:$0xff] %v5712_v28  ;;  %5715 = vst [vmem:[%s7331_s21 + $0x28] sm:$0xff] %v5714_v8  ;;  %v5718_v1 = vld [vmem:[%s7335_s28 + $0x38] sm:$0xff]  ;;  %v5720_v14 = vld [vmem:[%s7335_s28 + $0x40] sm:$0xff]  ;;  %s10424_s15 = smov (%p5749_p11, %s5748_s15), 0 }
 0x51c   : >> { %5717 = vst [vmem:[%s7331_s21 + $0x30] sm:$0xff] %v5716_v2  ;;  %5719 = vst [vmem:[%s7331_s21 + $0x38] sm:$0xff] %v5718_v1  ;;  %v5722_v22 = vld [vmem:[%s7335_s28 + $0x48] sm:$0xff]  ;;  %v5724_v46 = vld [vmem:[%s7335_s28 + $0x50] sm:$0xff]  ;;  %s5751_s16 = smul.u32 176, %s10424_s15  ;;  %s10417_s13 = smov %s10424_s15 }
 0x51d   : >> { %5721 = vst [vmem:[%s7331_s21 + $0x40] sm:$0xff] %v5720_v14  ;;  %v5726_v27 = vld [vmem:[%s7335_s28 + $0x58] sm:$0xff]  ;;  %5723 = vst [vmem:[%s7331_s21 + $0x48] sm:$0xff] %v5722_v22  ;;  %v5728_v41 = vld [vmem:[%s7335_s28 + $0x60] sm:$0xff]  ;;  %5700 = sbr.rel (!%p5697_p12) target bundleno = 1304 (0x518), region = 136 }
 0x51e   : >> { %5725 = vst [vmem:[%s7331_s21 + $0x50] sm:$0xff] %v5724_v46  ;;  %5727 = vst [vmem:[%s7331_s21 + $0x58] sm:$0xff] %v5726_v27  ;;  %v5730_v20 = vld [vmem:[%s7335_s28 + $0x68] sm:$0xff]  ;;  %v5732_v7 = vld [vmem:[%s7335_s28 + $0x70] sm:$0xff]  ;;  %s5754_s17 = scalar_lea.vmem %s10303_s11, %s5751_s16  }
 0x51f   : >> { %5729 = vst [vmem:[%s7331_s21 + $0x60] sm:$0xff] %v5728_v41  ;;  %5731 = vst [vmem:[%s7331_s21 + $0x68] sm:$0xff] %v5730_v20  ;;  %v5734_v3 = vld [vmem:[%s7335_s28 + $0x78] sm:$0xff]  ;;  %v5736_v19 = vld [vmem:[%s7335_s28 + $0x80] sm:$0xff] }
 0x520   : >> { %5733 = vst [vmem:[%s7331_s21 + $0x70] sm:$0xff] %v5732_v7  ;;  %v5738_v26 = vld [vmem:[%s7335_s28 + $0x88] sm:$0xff]  ;;  %5735 = vst [vmem:[%s7331_s21 + $0x78] sm:$0xff] %v5734_v3  ;;  %v5740_v49 = vld [vmem:[%s7335_s28 + $0x90] sm:$0xff] }
 0x521   : >> { %5737 = vst [vmem:[%s7331_s21 + $0x80] sm:$0xff] %v5736_v19  ;;  %5739 = vst [vmem:[%s7331_s21 + $0x88] sm:$0xff] %v5738_v26  ;;  %v5742_v4 = vld [vmem:[%s7335_s28 + $0x98] sm:$0xff]  ;;  %v5744_v21 = vld [vmem:[%s7335_s28 + $0xa0] sm:$0xff] }
 0x522   : >> { %5741 = vst [vmem:[%s7331_s21 + $0x90] sm:$0xff] %v5740_v49  ;;  %5743 = vst [vmem:[%s7331_s21 + $0x98] sm:$0xff] %v5742_v4  ;;  %v5746_v53 = vld [vmem:[%s7335_s28 + $0xa8] sm:$0xff]  ;;  %s5753_s28 = scalar_lea.vmem %s9962_s18, %s5751_s16 [#allocation2]  }
 0x523   : >> { %5745 = vst [vmem:[%s7331_s21 + $0xa0] sm:$0xff] %v5744_v21  ;;  %5747 = vst [vmem:[%s7331_s21 + $0xa8] sm:$0xff] %v5746_v53  ;;  %s10416_s21 = smov %s5754_s17 }
 0x524 PF: > { %7271 = sdivrem.u32 %s10422_s6, 22 }
 0x525   : > { %s6116_s20 = smul.u32 176, %s10309_s26 }
 0x527   : > { %s5759_s23 = scalar_lea.vmem %s9962_s18, %s6116_s20 [#allocation2]   ;;  %s5761_s24 = scalar_lea.vmem %s10303_s11, %s6116_s20  }
 0x52d   : > { %s7272_s27 = spop.drf %7271 }
 0x52e   : > { %p6118_p13 = scmp.le.s32.totalorder %s7272_s27, 0 }
 0x52f   : > { %s7345_s8 = smov (!%p6118_p13), %s5761_s24   ;;  %s7349_s29 = smov (!%p6118_p13), %s5759_s23  }
 0x530   : > { %5864 = sbr.rel (%p6118_p13) target bundleno = 1345 (0x541), region = 141  ;;  %s7353_s30 = smov (!%p6118_p13), 0  }
 0x531   : > { %s7357_s7 = smov (!%p6118_p13), 0  }
 0x537 LB: >> { %v5771_v10 = vld [vmem:[%s7351_s29] sm:$0xff]  ;;  %s5773_s9 = sadd.s32 1, %s7355_s30  ;;  %s5765_s7 = sadd.s32 1, %s7359_s7   ;;  %s7359_s7 = sphi %s7357_s7, %s5765_s7   ;;  %s7355_s30 = sphi %s7353_s30, %s7354_s30   ;;  %s7351_s29 = sphi %s7349_s29, %s5778_s29   ;;  %s7347_s8 = sphi %s7345_s8, %s5779_s8  }
 0x538   : >> { %5772 = vst [vmem:[%s7347_s8] sm:$0xff] %v5771_v10  ;;  %p5774_p0 = scmp.ge.s32.totalorder %s5773_s9, %s7272_s27  ;;  %p5764_p1 = scmp.ge.s32.totalorder %s5765_s7, %s7272_s27 }
 0x53a   : >> { %s10426_s9 = smov (%p5774_p0, %s5773_s9), 0  ;;  %5767 = sbr.rel (!%p5764_p1) target bundleno = 1335 (0x537), region = 147 }
 0x53b   : >> { %s6119_s18 = sshll.u32 %s10426_s9, 3  ;;  %s7354_s30 = smov %s10426_s9  }
 0x53c   : >> { %s5778_s29 = scalar_lea.vmem %s5759_s23, %s6119_s18 [#allocation2]   ;;  %s5779_s8 = scalar_lea.vmem %s5761_s24, %s6119_s18  }
 0x541 PF: > { %p12_p2 = scmp.ge.s32.totalorder %s7409_s22, 4   ;;  %s10418_s18 = smov %s7323_s19 }
 0x542   : > { %s10419_s19 = smov %s7417_s25  ;;  %s10420_s20 = smov %s7409_s22 }
 0x543   :  { %14 = sbr.rel (!%p12_p2) target bundleno = 2 (0x2), region = 158 }

</bundles_post_ra>
